<compile_context>
chip_gen: v5e
topology: v5e:2x2
jax: 0.10.0
libtpu: 0.0.40
codegen_flags: <defaults>
</compile_context>

<pallas_src>
import functools
import math

import jax
import jax.numpy as jnp
from jax.experimental import pallas as pl
from jax.experimental.pallas import tpu as pltpu

# Explicit, deliberate MXU precision (review item #1).  HIGHEST keeps the
# 1e-4 check robust; switch to jax.lax.Precision.HIGH (bf16x3) for ~2x faster
# MXU passes when the accuracy budget allows.
_MM_PRECISION = jax.lax.Precision.HIGHEST


def _mm(a, b):
    return jnp.dot(a, b, preferred_element_type=jnp.float32,
                   precision=_MM_PRECISION)


def _spatial_attention_kernel(x_ref, wq_ref, wk_ref, wv_ref, wo_ref,
                              wseg_ref, wexp_ref, g_ref, o_ref, *,
                              num_joints, joint_lanes):
    """One tile of rows.

    Lane conventions ([tile_n, lanes], everything lane-packed):
      x / q / k / v / acc / out : lane = j*D + h*hd + d            (J*D lanes)
      s / e / p                  : lane = (i*H + h)*J + r (+ zero padding)
    with i = query joint, j = key joint, h = head, d = head-dim element and
    r the rotation index (key joint = (i +/- r) % J).
    """
    J = num_joints
    D = joint_lanes

    x = x_ref[...]

    # Projections: block-diagonal kron(I_J, W) weights, D**-0.5 folded into wq.
    q = _mm(x, wq_ref[...])
    k = _mm(x, wk_ref[...])
    v = _mm(x, wv_ref[...])

    # Scores.  Rotation r aligns key joint (i +/- r) % J with query joint i in
    # the same lanes (XLU roll); the per-(i,h) sum over the head-dim lanes is a
    # structural 0/1 matmul.  Padded score lanes are exactly zero.
    s = _mm(q * k, wseg_ref[0])
    for r in range(1, J):
        k_r = pltpu.roll(k, shift=r * D, axis=1)
        s = s + _mm(q * k_r, wseg_ref[r])

    # Softmax over the J rotations (= over key joints) for each (i, h) group.
    # The row max is constant within every group, hence a valid stabilizer.
    m = jnp.max(s, axis=-1, keepdims=True)
    e = jnp.exp(s - m)
    den = _mm(e, g_ref[...])                 # per-group sum, broadcast back
    # Guard against a whole group underflowing (also keeps padded lanes finite;
    # they are masked by the zero rows of wexp below).
    p = e / jnp.maximum(den, jnp.float32(1e-30))

    # Weighted value sum over key joints: probability expansion is a 0/1
    # matmul; the key-joint reduction itself is plain VPU multiplies/adds.
    acc = _mm(p, wexp_ref[0]) * v
    for r in range(1, J):
        v_r = pltpu.roll(v, shift=r * D, axis=1)
        acc = acc + _mm(p, wexp_ref[r]) * v_r

    # Shared output projection, block-diagonal per query joint.
    o_ref[...] = _mm(acc, wo_ref[...]).astype(o_ref.dtype)  # lane-dense store


def _round_up(x, m):
    return ((x + m - 1) // m) * m


def _choose_tile_n(n, max_tile=1024):
    """Row-tile height: multiple of 8, <= max_tile, and (when there is enough
    work) chosen so the grid has >= 2 steps so both v7x TensorCores get work."""
    steps = max(pl.cdiv(n, max_tile), 1)
    if n > 8:
        steps = max(steps, 2)
    return max(_round_up(pl.cdiv(n, steps), 8), 8)


def _build_fused_weights(w_query, w_key, w_value, w_output, num_heads):
    """One-time host construction of the packed weight matrices."""
    J, D, _ = w_query.shape
    H = num_heads
    hd = D // H
    JD = J * D
    SL = _round_up(J * H * J, 128)            # padded score-lane count
    f32 = jnp.float32
    eye_j = jnp.eye(J, dtype=f32)

    # Block-diagonal projections (attention scale folded into the query).
    wq_bd = jnp.einsum('ik,iae->iake', eye_j,
                       w_query.astype(f32) * (D ** -0.5)).reshape(JD, JD)
    wk_bd = jnp.kron(eye_j, w_key.astype(f32))
    wv_bd = jnp.kron(eye_j, w_value.astype(f32))
    wo_bd = jnp.kron(eye_j, w_output.astype(f32))

    # Per-rotation head-dim segment sum: lane (i*H+h)*hd+d -> lane (i*H+h)*J+r.
    ih = jnp.arange(JD) // hd                                  # = i*H + h
    wseg = jnp.stack([jax.nn.one_hot(ih * J + r, SL, dtype=f32)
                      for r in range(J)])                      # [J, JD, SL]
    # Per-rotation probability expansion is exactly the transpose (padded score
    # lanes hit all-zero rows and never reach the output).
    wexp = jnp.transpose(wseg, (0, 2, 1))                      # [J, SL, JD]

    # Softmax group sum (+ broadcast back): groups of J consecutive real lanes;
    # identity on the padded lanes keeps them finite (masked later by wexp).
    real = J * H * J
    grp = jnp.arange(real) // J
    g = jnp.zeros((SL, SL), f32).at[:real, :real].set(
        (grp[:, None] == grp[None, :]).astype(f32))
    if SL > real:
        pad = jnp.arange(real, SL)
        g = g.at[pad, pad].set(1.0)

    return wq_bd, wk_bd, wv_bd, wo_bd, wseg, wexp, g


def spatial_attention(x, w_query, w_key, w_value, w_output, num_heads, *,
                      max_tile_n=1024):
    B, S, J, D = x.shape
    H = num_heads
    assert D % H == 0, "token_dim must be divisible by num_heads"
    N = B * S
    JD = J * D
    SL = _round_up(J * H * J, 128)

    tile_n = _choose_tile_n(N, max_tile_n)
    n_pad = _round_up(N, tile_n)

    x_flat = x.reshape(N, JD).astype(jnp.float32)
    if n_pad != N:
        # Zero rows flow through the kernel as finite values and are sliced off.
        x_flat = jnp.pad(x_flat, ((0, n_pad - N), (0, 0)))

    weights = _build_fused_weights(w_query, w_key, w_value, w_output, H)

    macs_per_row = 4 * JD * JD + J * JD * SL + SL * SL + J * SL * JD
    cost = pl.CostEstimate(
        flops=2 * n_pad * macs_per_row,
        transcendentals=n_pad * SL,
        bytes_accessed=2 * n_pad * JD * 4 + sum(int(w.size) * 4 for w in weights))

    def _const_map(rank):
        zeros = (0,) * rank
        return lambda i: zeros

    weight_specs = [pl.BlockSpec(w.shape, _const_map(w.ndim)) for w in weights]

    kernel = functools.partial(_spatial_attention_kernel,
                               num_joints=J, joint_lanes=D)

    out = pl.pallas_call(
        kernel,
        out_shape=jax.ShapeDtypeStruct((n_pad, JD), x.dtype),
        grid=(n_pad // tile_n,),
        in_specs=[pl.BlockSpec((tile_n, JD), lambda i: (i, 0))] + weight_specs,
        out_specs=pl.BlockSpec((tile_n, JD), lambda i: (i, 0)),
        compiler_params=pltpu.CompilerParams(
            dimension_semantics=("parallel",),
            vmem_limit_bytes=32 * 1024 * 1024),
        cost_estimate=cost,
    )(x_flat, *weights)

    return out[:N].reshape(B, S, J, D)


# ---- pure-JAX reference (mirrors the PyTorch forward exactly) ----
def spatial_attention_ref(x, wq, wk, wv, wo, num_heads):
    B, S, J, D = x.shape
    H, hd = num_heads, D // num_heads
    prec = _MM_PRECISION
    q = jnp.einsum('bsjd,jde->bsje', x, wq, precision=prec)
    k = jnp.einsum('bsjd,de->bsje', x, wk, precision=prec)
    v = jnp.einsum('bsjd,de->bsje', x, wv, precision=prec)

    def split(t):   # [..., J, D] -> [..., H, J, hd]
        return jnp.swapaxes(t.reshape(B, S, J, H, hd), -3, -2)

    qh, kh, vh = split(q), split(k), split(v)
    attn = jnp.einsum('bshid,bshjd->bshij', qh, kh, precision=prec) * (D ** -0.5)
    attn = jax.nn.softmax(attn, axis=-1)
    out = jnp.einsum('bshij,bshjd->bshid', attn, vh, precision=prec)
    out = jnp.swapaxes(out, -3, -2).reshape(B, S, J, D)
    return jnp.einsum('bsjd,de->bsje', out, wo, precision=prec)


def xavier_uniform(key, shape):
    # torch.nn.init.xavier_uniform_ fan computation (gain=1)
    rf = 1
    for s in shape[2:]:
        rf *= s
    fan_in = shape[1] * rf
    fan_out = shape[0] * rf
    bound = math.sqrt(6.0 / (fan_in + fan_out))
    return jax.random.uniform(key, shape, jnp.float32, -bound, bound)


if __name__ == "__main__":
    # num_emb = num_joints = 4, seq_len = 8, token_dim = 32, heads = 4
    B, S, J, D, H = 2, 8, 4, 32, 4

    key = jax.random.PRNGKey(0)
    kx, kq, kk, kv, ko = jax.random.split(key, 5)
    x = jax.random.normal(kx, (B, S, J, D), jnp.float32)
    w_query = xavier_uniform(kq, (J, D, D))    # W_query [num_emb, token_dim, token_dim]
    w_key = xavier_uniform(kk, (D, D))
    w_value = xavier_uniform(kv, (D, D))
    w_output = xavier_uniform(ko, (D, D))

    out = spatial_attention(x, w_query, w_key, w_value, w_output, H)
    out = jax.block_until_ready(out)

    ref = spatial_attention_ref(x, w_query, w_key, w_value, w_output, H)
    assert out.shape == (B, S, J, D)
    err = float(jnp.max(jnp.abs(out - ref)))
    assert jnp.allclose(out, ref, atol=1e-4, rtol=1e-4), f"max abs err {err}"
    print("KERNEL_OK")
</pallas_src>

<mosaic_0001>
module attributes {stable_mosaic.version = 11 : i64} {
  func.func @_spatial_attention_kernel(%arg0: i32, %arg1: memref<8x128xf32, #tpu.memory_space<vmem>>, %arg2: memref<128x128xf32, #tpu.memory_space<vmem>>, %arg3: memref<128x128xf32, #tpu.memory_space<vmem>>, %arg4: memref<128x128xf32, #tpu.memory_space<vmem>>, %arg5: memref<128x128xf32, #tpu.memory_space<vmem>>, %arg6: memref<4x128x128xf32, #tpu.memory_space<vmem>>, %arg7: memref<4x128x128xf32, #tpu.memory_space<vmem>>, %arg8: memref<128x128xf32, #tpu.memory_space<vmem>>, %arg9: memref<8x128xf32, #tpu.memory_space<vmem>>) attributes {dimension_semantics = [#tpu.dimension_semantics<parallel>], iteration_bounds = array<i64: 2>, scalar_prefetch = 0 : i64, scratch_operands = 0 : i64, tpu.core_type = #tpu.core_type<tc>, window_params = [{transform_indices = @transform_0, window_bounds = array<i64: 8, 128>}, {pipeline_mode = #tpu.pipeline_mode<synchronous>, transform_indices = @transform_1, window_bounds = array<i64: 128, 128>}, {pipeline_mode = #tpu.pipeline_mode<synchronous>, transform_indices = @transform_2, window_bounds = array<i64: 128, 128>}, {pipeline_mode = #tpu.pipeline_mode<synchronous>, transform_indices = @transform_3, window_bounds = array<i64: 128, 128>}, {pipeline_mode = #tpu.pipeline_mode<synchronous>, transform_indices = @transform_4, window_bounds = array<i64: 128, 128>}, {pipeline_mode = #tpu.pipeline_mode<synchronous>, transform_indices = @transform_5, window_bounds = array<i64: 4, 128, 128>}, {pipeline_mode = #tpu.pipeline_mode<synchronous>, transform_indices = @transform_6, window_bounds = array<i64: 4, 128, 128>}, {pipeline_mode = #tpu.pipeline_mode<synchronous>, transform_indices = @transform_7, window_bounds = array<i64: 128, 128>}, {transform_indices = @transform_8, window_bounds = array<i64: 8, 128>}]} {
    %c0 = arith.constant 0 : index
    %c0_0 = arith.constant 0 : index
    %0 = vector.load %arg1[%c0, %c0_0] : memref<8x128xf32, #tpu.memory_space<vmem>>, vector<8x128xf32>
    %c0_1 = arith.constant 0 : index
    %c0_2 = arith.constant 0 : index
    %1 = vector.load %arg2[%c0_1, %c0_2] : memref<128x128xf32, #tpu.memory_space<vmem>>, vector<128x128xf32>
    %cst = arith.constant dense<0.000000e+00> : vector<8x128xf32>
    %2 = tpu.matmul %0, %1, %cst {dimension_numbers = #tpu.dot_dimension_numbers<[1], [0], [0], [1], [0, 0, 1, 1], [], []>, precision = #tpu.contract_precision<fp32>} : vector<8x128xf32>, vector<128x128xf32>, vector<8x128xf32> -> vector<8x128xf32>
    %c0_3 = arith.constant 0 : index
    %c0_4 = arith.constant 0 : index
    %3 = vector.load %arg3[%c0_3, %c0_4] : memref<128x128xf32, #tpu.memory_space<vmem>>, vector<128x128xf32>
    %cst_5 = arith.constant dense<0.000000e+00> : vector<8x128xf32>
    %4 = tpu.matmul %0, %3, %cst_5 {dimension_numbers = #tpu.dot_dimension_numbers<[1], [0], [0], [1], [0, 0, 1, 1], [], []>, precision = #tpu.contract_precision<fp32>} : vector<8x128xf32>, vector<128x128xf32>, vector<8x128xf32> -> vector<8x128xf32>
    %c0_6 = arith.constant 0 : index
    %c0_7 = arith.constant 0 : index
    %5 = vector.load %arg4[%c0_6, %c0_7] : memref<128x128xf32, #tpu.memory_space<vmem>>, vector<128x128xf32>
    %cst_8 = arith.constant dense<0.000000e+00> : vector<8x128xf32>
    %6 = tpu.matmul %0, %5, %cst_8 {dimension_numbers = #tpu.dot_dimension_numbers<[1], [0], [0], [1], [0, 0, 1, 1], [], []>, precision = #tpu.contract_precision<fp32>} : vector<8x128xf32>, vector<128x128xf32>, vector<8x128xf32> -> vector<8x128xf32>
    %7 = arith.mulf %2, %4 : vector<8x128xf32>
    %c0_9 = arith.constant 0 : index
    %c0_10 = arith.constant 0 : index
    %c0_11 = arith.constant 0 : index
    %8 = vector.load %arg6[%c0_9, %c0_10, %c0_11] : memref<4x128x128xf32, #tpu.memory_space<vmem>>, vector<1x128x128xf32>
    %9 = vector.shape_cast %8 : vector<1x128x128xf32> to vector<128x128xf32>
    %cst_12 = arith.constant dense<0.000000e+00> : vector<8x128xf32>
    %10 = tpu.matmul %7, %9, %cst_12 {dimension_numbers = #tpu.dot_dimension_numbers<[1], [0], [0], [1], [0, 0, 1, 1], [], []>, precision = #tpu.contract_precision<fp32>} : vector<8x128xf32>, vector<128x128xf32>, vector<8x128xf32> -> vector<8x128xf32>
    %c32_i32 = arith.constant 32 : i32
    %11 = tpu.dynamic_rotate %4 by %c32_i32 dim 1 : vector<8x128xf32>, i32 -> vector<8x128xf32>
    %12 = arith.mulf %2, %11 : vector<8x128xf32>
    %c1 = arith.constant 1 : index
    %c0_13 = arith.constant 0 : index
    %c0_14 = arith.constant 0 : index
    %13 = vector.load %arg6[%c1, %c0_13, %c0_14] : memref<4x128x128xf32, #tpu.memory_space<vmem>>, vector<1x128x128xf32>
    %14 = vector.shape_cast %13 : vector<1x128x128xf32> to vector<128x128xf32>
    %cst_15 = arith.constant dense<0.000000e+00> : vector<8x128xf32>
    %15 = tpu.matmul %12, %14, %cst_15 {dimension_numbers = #tpu.dot_dimension_numbers<[1], [0], [0], [1], [0, 0, 1, 1], [], []>, precision = #tpu.contract_precision<fp32>} : vector<8x128xf32>, vector<128x128xf32>, vector<8x128xf32> -> vector<8x128xf32>
    %16 = arith.addf %10, %15 : vector<8x128xf32>
    %c64_i32 = arith.constant 64 : i32
    %17 = tpu.dynamic_rotate %4 by %c64_i32 dim 1 : vector<8x128xf32>, i32 -> vector<8x128xf32>
    %18 = arith.mulf %2, %17 : vector<8x128xf32>
    %c2 = arith.constant 2 : index
    %c0_16 = arith.constant 0 : index
    %c0_17 = arith.constant 0 : index
    %19 = vector.load %arg6[%c2, %c0_16, %c0_17] : memref<4x128x128xf32, #tpu.memory_space<vmem>>, vector<1x128x128xf32>
    %20 = vector.shape_cast %19 : vector<1x128x128xf32> to vector<128x128xf32>
    %cst_18 = arith.constant dense<0.000000e+00> : vector<8x128xf32>
    %21 = tpu.matmul %18, %20, %cst_18 {dimension_numbers = #tpu.dot_dimension_numbers<[1], [0], [0], [1], [0, 0, 1, 1], [], []>, precision = #tpu.contract_precision<fp32>} : vector<8x128xf32>, vector<128x128xf32>, vector<8x128xf32> -> vector<8x128xf32>
    %22 = arith.addf %16, %21 : vector<8x128xf32>
    %c96_i32 = arith.constant 96 : i32
    %23 = tpu.dynamic_rotate %4 by %c96_i32 dim 1 : vector<8x128xf32>, i32 -> vector<8x128xf32>
    %24 = arith.mulf %2, %23 : vector<8x128xf32>
    %c3 = arith.constant 3 : index
    %c0_19 = arith.constant 0 : index
    %c0_20 = arith.constant 0 : index
    %25 = vector.load %arg6[%c3, %c0_19, %c0_20] : memref<4x128x128xf32, #tpu.memory_space<vmem>>, vector<1x128x128xf32>
    %26 = vector.shape_cast %25 : vector<1x128x128xf32> to vector<128x128xf32>
    %cst_21 = arith.constant dense<0.000000e+00> : vector<8x128xf32>
    %27 = tpu.matmul %24, %26, %cst_21 {dimension_numbers = #tpu.dot_dimension_numbers<[1], [0], [0], [1], [0, 0, 1, 1], [], []>, precision = #tpu.contract_precision<fp32>} : vector<8x128xf32>, vector<128x128xf32>, vector<8x128xf32> -> vector<8x128xf32>
    %28 = arith.addf %22, %27 : vector<8x128xf32>
    %cst_22 = arith.constant dense<0xFF800000> : vector<8xf32>
    %29 = vector.multi_reduction <maximumf>, %28, %cst_22 [1] : vector<8x128xf32> to vector<8xf32>
    %30 = vector.shape_cast %29 : vector<8xf32> to vector<8x1xf32>
    %31 = vector.broadcast %30 : vector<8x1xf32> to vector<8x128xf32>
    %32 = arith.subf %28, %31 : vector<8x128xf32>
    %33 = math.exp %32 : vector<8x128xf32>
    %c0_23 = arith.constant 0 : index
    %c0_24 = arith.constant 0 : index
    %34 = vector.load %arg8[%c0_23, %c0_24] : memref<128x128xf32, #tpu.memory_space<vmem>>, vector<128x128xf32>
    %cst_25 = arith.constant dense<0.000000e+00> : vector<8x128xf32>
    %35 = tpu.matmul %33, %34, %cst_25 {dimension_numbers = #tpu.dot_dimension_numbers<[1], [0], [0], [1], [0, 0, 1, 1], [], []>, precision = #tpu.contract_precision<fp32>} : vector<8x128xf32>, vector<128x128xf32>, vector<8x128xf32> -> vector<8x128xf32>
    %cst_26 = arith.constant 1.000000e-30 : f32
    %36 = vector.broadcast %cst_26 : f32 to vector<8x128xf32>
    %37 = arith.maximumf %35, %36 : vector<8x128xf32>
    %38 = arith.divf %33, %37 : vector<8x128xf32>
    %c0_27 = arith.constant 0 : index
    %c0_28 = arith.constant 0 : index
    %c0_29 = arith.constant 0 : index
    %39 = vector.load %arg7[%c0_27, %c0_28, %c0_29] : memref<4x128x128xf32, #tpu.memory_space<vmem>>, vector<1x128x128xf32>
    %40 = vector.shape_cast %39 : vector<1x128x128xf32> to vector<128x128xf32>
    %cst_30 = arith.constant dense<0.000000e+00> : vector<8x128xf32>
    %41 = tpu.matmul %38, %40, %cst_30 {dimension_numbers = #tpu.dot_dimension_numbers<[1], [0], [0], [1], [0, 0, 1, 1], [], []>, precision = #tpu.contract_precision<fp32>} : vector<8x128xf32>, vector<128x128xf32>, vector<8x128xf32> -> vector<8x128xf32>
    %42 = arith.mulf %41, %6 : vector<8x128xf32>
    %c32_i32_31 = arith.constant 32 : i32
    %43 = tpu.dynamic_rotate %6 by %c32_i32_31 dim 1 : vector<8x128xf32>, i32 -> vector<8x128xf32>
    %c1_32 = arith.constant 1 : index
    %c0_33 = arith.constant 0 : index
    %c0_34 = arith.constant 0 : index
    %44 = vector.load %arg7[%c1_32, %c0_33, %c0_34] : memref<4x128x128xf32, #tpu.memory_space<vmem>>, vector<1x128x128xf32>
    %45 = vector.shape_cast %44 : vector<1x128x128xf32> to vector<128x128xf32>
    %cst_35 = arith.constant dense<0.000000e+00> : vector<8x128xf32>
    %46 = tpu.matmul %38, %45, %cst_35 {dimension_numbers = #tpu.dot_dimension_numbers<[1], [0], [0], [1], [0, 0, 1, 1], [], []>, precision = #tpu.contract_precision<fp32>} : vector<8x128xf32>, vector<128x128xf32>, vector<8x128xf32> -> vector<8x128xf32>
    %47 = arith.mulf %46, %43 : vector<8x128xf32>
    %48 = arith.addf %42, %47 : vector<8x128xf32>
    %c64_i32_36 = arith.constant 64 : i32
    %49 = tpu.dynamic_rotate %6 by %c64_i32_36 dim 1 : vector<8x128xf32>, i32 -> vector<8x128xf32>
    %c2_37 = arith.constant 2 : index
    %c0_38 = arith.constant 0 : index
    %c0_39 = arith.constant 0 : index
    %50 = vector.load %arg7[%c2_37, %c0_38, %c0_39] : memref<4x128x128xf32, #tpu.memory_space<vmem>>, vector<1x128x128xf32>
    %51 = vector.shape_cast %50 : vector<1x128x128xf32> to vector<128x128xf32>
    %cst_40 = arith.constant dense<0.000000e+00> : vector<8x128xf32>
    %52 = tpu.matmul %38, %51, %cst_40 {dimension_numbers = #tpu.dot_dimension_numbers<[1], [0], [0], [1], [0, 0, 1, 1], [], []>, precision = #tpu.contract_precision<fp32>} : vector<8x128xf32>, vector<128x128xf32>, vector<8x128xf32> -> vector<8x128xf32>
    %53 = arith.mulf %52, %49 : vector<8x128xf32>
    %54 = arith.addf %48, %53 : vector<8x128xf32>
    %c96_i32_41 = arith.constant 96 : i32
    %55 = tpu.dynamic_rotate %6 by %c96_i32_41 dim 1 : vector<8x128xf32>, i32 -> vector<8x128xf32>
    %c3_42 = arith.constant 3 : index
    %c0_43 = arith.constant 0 : index
    %c0_44 = arith.constant 0 : index
    %56 = vector.load %arg7[%c3_42, %c0_43, %c0_44] : memref<4x128x128xf32, #tpu.memory_space<vmem>>, vector<1x128x128xf32>
    %57 = vector.shape_cast %56 : vector<1x128x128xf32> to vector<128x128xf32>
    %cst_45 = arith.constant dense<0.000000e+00> : vector<8x128xf32>
    %58 = tpu.matmul %38, %57, %cst_45 {dimension_numbers = #tpu.dot_dimension_numbers<[1], [0], [0], [1], [0, 0, 1, 1], [], []>, precision = #tpu.contract_precision<fp32>} : vector<8x128xf32>, vector<128x128xf32>, vector<8x128xf32> -> vector<8x128xf32>
    %59 = arith.mulf %58, %55 : vector<8x128xf32>
    %60 = arith.addf %54, %59 : vector<8x128xf32>
    %c0_46 = arith.constant 0 : index
    %c0_47 = arith.constant 0 : index
    %61 = vector.load %arg5[%c0_46, %c0_47] : memref<128x128xf32, #tpu.memory_space<vmem>>, vector<128x128xf32>
    %cst_48 = arith.constant dense<0.000000e+00> : vector<8x128xf32>
    %62 = tpu.matmul %60, %61, %cst_48 {dimension_numbers = #tpu.dot_dimension_numbers<[1], [0], [0], [1], [0, 0, 1, 1], [], []>, precision = #tpu.contract_precision<fp32>} : vector<8x128xf32>, vector<128x128xf32>, vector<8x128xf32> -> vector<8x128xf32>
    %c0_49 = arith.constant 0 : index
    %c0_50 = arith.constant 0 : index
    %63 = vector.load %arg9[%c0_49, %c0_50] : memref<8x128xf32, #tpu.memory_space<vmem>>, vector<8x128xf32>
    tpu.vector_store %arg9[%c0_49, %c0_50], %62 {strides = array<i32>} : memref<8x128xf32, #tpu.memory_space<vmem>>, vector<8x128xf32>,
    return
  }
  func.func @transform_0(%arg0: i32) -> (i32, i32) {
    %c0_i32 = arith.constant 0 : i32
    %c0_i32_0 = arith.constant 0 : i32
    return %arg0, %c0_i32 : i32, i32
  }
  func.func @transform_1(%arg0: i32) -> (i32, i32) {
    %c0_i32 = arith.constant 0 : i32
    %c0_i32_0 = arith.constant 0 : i32
    %c0_i32_1 = arith.constant 0 : i32
    return %c0_i32, %c0_i32_0 : i32, i32
  }
  func.func @transform_2(%arg0: i32) -> (i32, i32) {
    %c0_i32 = arith.constant 0 : i32
    %c0_i32_0 = arith.constant 0 : i32
    %c0_i32_1 = arith.constant 0 : i32
    return %c0_i32, %c0_i32_0 : i32, i32
  }
  func.func @transform_3(%arg0: i32) -> (i32, i32) {
    %c0_i32 = arith.constant 0 : i32
    %c0_i32_0 = arith.constant 0 : i32
    %c0_i32_1 = arith.constant 0 : i32
    return %c0_i32, %c0_i32_0 : i32, i32
  }
  func.func @transform_4(%arg0: i32) -> (i32, i32) {
    %c0_i32 = arith.constant 0 : i32
    %c0_i32_0 = arith.constant 0 : i32
    %c0_i32_1 = arith.constant 0 : i32
    return %c0_i32, %c0_i32_0 : i32, i32
  }
  func.func @transform_5(%arg0: i32) -> (i32, i32, i32) {
    %c0_i32 = arith.constant 0 : i32
    %c0_i32_0 = arith.constant 0 : i32
    %c0_i32_1 = arith.constant 0 : i32
    %c0_i32_2 = arith.constant 0 : i32
    return %c0_i32, %c0_i32_0, %c0_i32_1 : i32, i32, i32
  }
  func.func @transform_6(%arg0: i32) -> (i32, i32, i32) {
    %c0_i32 = arith.constant 0 : i32
    %c0_i32_0 = arith.constant 0 : i32
    %c0_i32_1 = arith.constant 0 : i32
    %c0_i32_2 = arith.constant 0 : i32
    return %c0_i32, %c0_i32_0, %c0_i32_1 : i32, i32, i32
  }
  func.func @transform_7(%arg0: i32) -> (i32, i32) {
    %c0_i32 = arith.constant 0 : i32
    %c0_i32_0 = arith.constant 0 : i32
    %c0_i32_1 = arith.constant 0 : i32
    return %c0_i32, %c0_i32_0 : i32, i32
  }
  func.func @transform_8(%arg0: i32) -> (i32, i32) {
    %c0_i32 = arith.constant 0 : i32
    %c0_i32_0 = arith.constant 0 : i32
    return %arg0, %c0_i32 : i32, i32
  }
}

</mosaic_0001>

<bundles_post_ra>
// kernel: tpu_custom_call.1
= control target key start
LH: loop header
LB: loop body
LE: loop exit
PB: predicated region body
PF: predicated region fallthrough
CT: control target
= control target key end

     0   :  { %s9290_s0 = inlined_call_operand.hbm [shape: f32[16,128], index: 0, kind: input, shape index: {}]   ;;  %s9291_s1 = inlined_call_operand.hbm [shape: f32[128,128], index: 1, kind: input, shape index: {}]   ;;  %s9292_s2 = inlined_call_operand.hbm [shape: f32[128,128], index: 2, kind: input, shape index: {}]   ;;  %s9293_s3 = inlined_call_operand.hbm [shape: f32[128,128], index: 3, kind: input, shape index: {}]   ;;  %s9294_s4 = inlined_call_operand.hbm [shape: f32[128,128], index: 4, kind: input, shape index: {}]   ;;  %s9295_s5 = inlined_call_operand.hbm [shape: f32[4,128,128], index: 5, kind: input, shape index: {}]   ;;  %s9296_s6 = inlined_call_operand.hbm [shape: f32[4,128,128], index: 6, kind: input, shape index: {}]   ;;  %s9297_s7 = inlined_call_operand.hbm [shape: f32[128,128], index: 7, kind: input, shape index: {}]   ;;  %s9298_s8 = inlined_call_operand.hbm [shape: f32[16,128], index: 8, kind: output, shape index: {}]  }
   0x1   :  { %9388 = sst [smem:[#allocation29_spill]] %s9291_s1 }
   0x2   :  { %9389 = sst [smem:[#allocation30_spill]] %s9292_s2 }
   0x3   :  { %13 = vsyncpa [#allocation3], 0 }
   0x4   :  { %15 = vsyncpa [#allocation3 + $0x1], 0 }
   0x5   :  { %16 = vsyncpa [#allocation6], 0 }
   0x6   :  { %17 = vsyncpa [#allocation9], 0 }
   0x7   :  { %18 = vsyncpa [#allocation12], 0 }
   0x8   :  { %19 = vsyncpa [#allocation15], 0 }
   0x9   :  { %20 = vsyncpa [#allocation4], 0 }
   0xa   :  { %22 = vsyncpa [#allocation4 + $0x1], 0  ;;  %s5820_s27 = smov 0   ;;  %s5822_s28 = smov 0  }
   0xb   :  { %s5824_s29 = smov 0   ;;  %s5826_s30 = smov 0  }
   0xc LB: > { %s9390_s1 = sld [smem:[#allocation29_spill]]  ;;  %s5844_s12 = sadd.s32 4294967295, %s5761_s30   ;;  %s5761_s30 = sphi %s5826_s30, %s9528_s30   ;;  %s5757_s29 = sphi %s5824_s29, %s9527_s29   ;;  %s5753_s28 = sphi %s5822_s28, %s9526_s28   ;;  %s5749_s27 = sphi %s5820_s27, %s9525_s27  }
   0xd   : > { %p5288_p0 = scmp.ge.s32.totalorder %s5761_s30, 1  ;;  %p49_p1 = scmp.eq.s32.totalorder %s5844_s12, 0 }
   0xe   : > { %p232_p2 = scmp.lt.s32.totalorder %s5761_s30, 3  ;;  %s5763_s14 = smov [#allocation5]  }
   0xf   : > { %s245_s15 = sshll.u32 %s5763_s14, 4  ;;  %s271_s18 = sshll.u32 %s9293_s3, 4  ;;  %s246_s15 = int_to_ptr.vmem [resolvable:$true] %s245_s15  ;;  %s272_s18 = int_to_ptr.hbm [resolvable:$true] %s271_s18 }
  0x10   : > { %p5849_p3 = pnand %p5288_p0, %p232_p2  ;;  %s299_s22 = sshll.u32 %s9295_s5, 4  ;;  %s300_s22 = int_to_ptr.hbm [resolvable:$true] %s299_s22 }
  0x11   : > { %s5764_s23 = smov [#allocation8]   ;;  %s5765_s25 = smov 128  }
  0x12   : > { %s243_s11 = sshll.u32 %s9390_s1, 4  ;;  %p5345_p4 = pneg %p5849_p3  ;;  %s244_s11 = int_to_ptr.hbm [resolvable:$true] %s243_s11 }
  0x13   : > { %s273_s24 = sshll.u32 %s5764_s23, 4  ;;  %s5766_s26 = smov 8   ;;  %s274_s24 = int_to_ptr.vmem [resolvable:$true] %s273_s24 }
  0x14   : > { %p5861_p6 = pnand %p5345_p4, %p49_p1  ;;  %s9393_s2 = sld [smem:[#allocation30_spill]] }
  0x15   : > { %s5767_s16 = smov [#allocation11]   ;;  %s313_s9 = sshll.u32 %s9296_s6, 4  ;;  %s314_s9 = int_to_ptr.hbm [resolvable:$true] %s313_s9 }
  0x16   : > { %5348 = dma.hbm_to_vmem [thread:$0]  (!%p5861_p6), %s244_s11, 2048, %s246_s15, [#allocation6], %s5765_s25, %s5765_s25, %s5766_s26  }
  0x17   : > { %5354 = dma.hbm_to_vmem [thread:$0]  (!%p5861_p6), %s272_s18, 2048, %s274_s24, [#allocation9], %s5765_s25, %s5765_s25, %s5766_s26  }
  0x18   : > { %s301_s17 = sshll.u32 %s5767_s16, 4  ;;  %s5768_s11 = smov [#allocation7]   ;;  %s302_s17 = int_to_ptr.vmem [resolvable:$true] %s301_s17 }
  0x19   : > { %5360 = dma.hbm_to_vmem [thread:$0]  (!%p5861_p6), %s300_s22, 8192, %s302_s17, [#allocation12], %s5765_s25, %s5765_s25, %s5766_s26  }
  0x1a   : > { %s257_s14 = sshll.u32 %s9393_s2, 4  ;;  %s259_s15 = sshll.u32 %s5768_s11, 4  ;;  %s258_s14 = int_to_ptr.hbm [resolvable:$true] %s257_s14  ;;  %s260_s15 = int_to_ptr.vmem [resolvable:$true] %s259_s15 }
  0x1b   : > { %s285_s18 = sshll.u32 %s9294_s4, 4  ;;  %s5769_s22 = smov [#allocation10]   ;;  %s286_s18 = int_to_ptr.hbm [resolvable:$true] %s285_s18 }
  0x1c   : > { %5351 = dma.hbm_to_vmem [thread:$0]  (!%p5861_p6), %s258_s14, 2048, %s260_s15, [#allocation6], %s5765_s25, %s5765_s25, %s5766_s26  }
  0x1d   : > { %s287_s10 = sshll.u32 %s5769_s22, 4  ;;  %s5770_s14 = smov [#allocation13]   ;;  %s288_s10 = int_to_ptr.vmem [resolvable:$true] %s287_s10 }
  0x1e   : > { %5357 = dma.hbm_to_vmem [thread:$0]  (!%p5861_p6), %s286_s18, 2048, %s288_s10, [#allocation9], %s5765_s25, %s5765_s25, %s5766_s26  }
  0x1f   : > { %s315_s16 = sshll.u32 %s5770_s14, 4  ;;  %s327_s15 = sshll.u32 %s9297_s7, 4  ;;  %s316_s16 = int_to_ptr.vmem [resolvable:$true] %s315_s16  ;;  %s328_s15 = int_to_ptr.hbm [resolvable:$true] %s327_s15 }
  0x20   : > { %5363 = dma.hbm_to_vmem [thread:$0]  (!%p5861_p6), %s314_s9, 8192, %s316_s16, [#allocation12], %s5765_s25, %s5765_s25, %s5766_s26  }
  0x21   : > { %s5771_s20 = smov [#allocation14]   ;;  %s5287_s18 = sadd.s32 4294967294, %s5761_s30  }
  0x22   : > { %s329_s21 = sshll.u32 %s5771_s20, 4  ;;  %s5917_s23 = sadd.s32 1, %s5761_s30   ;;  %s330_s21 = int_to_ptr.vmem [resolvable:$true] %s329_s21 }
  0x23   : > { %5366 = dma.hbm_to_vmem [thread:$0]  (!%p5861_p6), %s328_s15, 2048, %s330_s21, [#allocation15], %s5765_s25, %s5765_s25, %s5766_s26  }
  0x24   : > { %s35_s24 = sadd.s32 1, %s5757_s29  ;;  %s32_s22 = ssub.s32 %s5761_s30, %s5917_s23 }
  0x25   : > { %p42_p7 = scmp.ne.s32.totalorder %s5757_s29, %s5753_s28  ;;  %p33_p8 = scmp.eq.s32.totalorder %s32_s22, 0 }
  0x26   : > { %p43_p9 = scmp.eq.s32.totalorder %s5761_s30, 0  ;;  %p48_p10 = scmp.ne.s32.totalorder %s5753_s28, %s5749_s27 }
  0x27   : > { %p219_p11 = scmp.eq.s32.totalorder %s5844_s12, 1  ;;  %p225_p0 = scmp.eq.s32.totalorder %s5287_s18, 1 }
  0x28   : > { %s5929_s9 = scalar_select %p33_p8, %s5757_s29, %s35_s24  }
  0x29   : > { %p5933_p12 = por %p49_p1, %p48_p10  ;;  %p5937_p13 = por %p219_p11, %p42_p7 }
  0x2a   : > { %p44_p2 = por %p43_p9, %p42_p7  ;;  %s343_s26 = sand.u32 1, %s5757_s29  }
  0x2b   : > { %p5942_p4 = por %p225_p0, %p48_p10  ;;  %p5382_p6 = scmp.lt.s32.totalorder %s5761_s30, 2 }
  0x2c   : > { %s5297_s14 = sshll.u32 %s343_s26, 3  ;;  %s5298_s16 = sshll.u32 %s5761_s30, 3 }
  0x2d   : > { %s351_s15 = scalar_lea.hbm %s9290_s0, %s5298_s16  ;;  %s347_s21 = scalar_lea.vmem [#allocation2], %s5297_s14 }
  0x2e   : > { %s353_s20 = sshll.u32 %s351_s15, 4  ;;  %s355_s24 = sshll.u32 %s347_s21, 4  ;;  %s354_s20 = int_to_ptr.hbm [resolvable:$true] %s353_s20  ;;  %s356_s24 = int_to_ptr.vmem [resolvable:$true] %s355_s24 }
  0x2f   : > { %p5951_p8 = pnand %p5382_p6, %p44_p2  ;;  %s344_s22 = scalar_lea.sflag [#allocation3], %s343_s26 }
  0x30   : > { %s5649_s1 = sshra.s32 %s354_s20, 4  ;;  %s5656_s14 = scalar_lea.hbm %s9290_s0, 16  ;;  %s5650_s1 = int_to_ptr.hbm [resolvable:$true] %s5649_s1 }
  0x31   : > { %s5651_s2 = scalar_lea.hbm %s5650_s1, 8  ;;  %p5653_p9 = pneg %p5951_p8 }
  0x32   : > { %p5652_p7 = scmp.ne.s32.totalorder %s5650_s1, %s5651_s2  ;;  %p5657_p0 = scmp.lt.s32.totalorder %s5650_s1, %s9290_s0 }
  0x33   : > { %p5658_p2 = scmp.lt.s32.totalorder %s5656_s14, %s5651_s2 }
  0x34   : > { %p5654_p10 = pnand %p5653_p9, %p5652_p7 }
  0x35   : > { %p5659_p6 = por %p5658_p2, %p5657_p0 }
  0x36   : > { %p5655_p11 = pneg %p5654_p10 }
  0x38   : > { %p5660_p5 = pnand %p5659_p6, %p5655_p11 }
  0x3a   : > { %5663 = shalt.err (!%p5660_p5)
}
  0x3b   : > { %5370 = dma.hbm_to_vmem [thread:$0]  (!%p5951_p8), %s354_s20, 128, %s356_s24, %s344_s22  }
  0x3c   : > { %364 = sbr.rel (%p5849_p3) target bundleno = 1463 (0x5b7), region = 52 }
  0x41   : > { %s5968_s26 = sand.u32 1, %s5753_s28  }
  0x42   : > { %s5300_s21 = sshll.u32 %s5968_s26, 3  ;;  %s367_s16 = scalar_lea.sflag [#allocation3], %s5968_s26 }
  0x43   : > { %s5974_s1 = scalar_lea.vmem [#allocation2], %s5300_s21 }
  0x44   : > { %5724 = dma.done.wait (%p5933_p12), %s367_s16, 128  }
  0x45   : > { %5726 = vsyncadd (%p5933_p12), %s367_s16, 4294967168 }
  0x46   : > { %5728 = dma.done.wait (%p49_p1), [#allocation6], 4096  }
  0x47   : > { %5730 = vsyncadd (%p49_p1), [#allocation6], 4294963200 }
  0x48   : > { %5732 = dma.done.wait (%p49_p1), [#allocation9], 4096  }
  0x49   : > { %5734 = vsyncadd (%p49_p1), [#allocation9], 4294963200 }
  0x4a   : > { %5736 = dma.done.wait (%p49_p1), [#allocation12], 16384  }
  0x4b   : > { %5738 = vsyncadd (%p49_p1), [#allocation12], 4294950912 }
  0x4c   : > { %5740 = dma.done.wait (%p49_p1), [#allocation15], 2048  }
  0x4d   : > { %5742 = vsyncadd (%p49_p1), [#allocation15], 4294965248  ;;  %v455_v0 = vld [vmem:[#allocation5 + $0x78] sm:$0xff]  ;;  %v454_v1 = vld [vmem:[#allocation5 + $0x70] sm:$0xff]  ;;  %s5772_s2 = smov 96   ;;  %s5773_s13 = smov 32  }
  0x4e   : > { %v453_v2 = vld [vmem:[#allocation5 + $0x68] sm:$0xff]  ;;  %v5996_v3 = vand.u32 4294901760, %v455_v0  ;;  %v5998_v4 = vand.u32 4294901760, %v454_v1  ;;  %v452_v6 = vld [vmem:[#allocation5 + $0x60] sm:$0xff]  ;;  %v451_v7 = vld [vmem:[#allocation5 + $0x58] sm:$0xff]  ;;  %s5774_s19 = smov 64  }
  0x4f   : > { %v6000_v5 = vand.u32 4294901760, %v453_v2  ;;  %v450_v8 = vld [vmem:[#allocation5 + $0x50] sm:$0xff]  ;;  %v6002_v9 = vand.u32 4294901760, %v452_v6  ;;  %v6004_v10 = vand.u32 4294901760, %v451_v7  ;;  %v449_v12 = vld [vmem:[#allocation5 + $0x48] sm:$0xff]  ;;  %v448_v13 = vld [vmem:[#allocation5 + $0x40] sm:$0xff] }
  0x50   : > { %v6006_v11 = vand.u32 4294901760, %v450_v8  ;;  %457 = vmatpush.msra.mxu0 %v5996_v3  ;;  %v6010_v14 = vsub.f32 %v455_v0, %v5996_v3  ;;  %v6013_v15 = vsub.f32 %v454_v1, %v5998_v4  ;;  %653 = vmatpush.msra.mxu3 %v5996_v3  ;;  %v6019_v17 = vand.u32 4294901760, %v449_v12  ;;  %v447_v21 = vld [vmem:[#allocation5 + $0x38] sm:$0xff]  ;;  %v446_v34 = vld [vmem:[#allocation5 + $0x30] sm:$0xff]  ;;  %v445_v35 = vld [vmem:[#allocation5 + $0x28] sm:$0xff]  ;;  %s5310_s20 = sshll.u32 %s5844_s12, 3 }
  0x51   : > { %v6017_v16 = vsub.f32 %v453_v2, %v6000_v5  ;;  %v6022_v18 = vsub.f32 %v452_v6, %v6002_v9  ;;  %v6025_v19 = vsub.f32 %v451_v7, %v6004_v10  ;;  %v6035_v25 = vand.u32 4294901760, %v448_v13  ;;  %v444_v40 = vld [vmem:[#allocation5 + $0x20] sm:$0xff]  ;;  %v443_v48 = vld [vmem:[#allocation5 + $0x18] sm:$0xff]  ;;  %v442_v53 = vld [vmem:[#allocation5 + $0x10] sm:$0xff]  ;;  %s5145_s22 = scalar_lea.hbm %s9298_s8, %s5310_s20  ;;  %s438_s17 = scalar_lea.vmem [#allocation16], %s5300_s21 }
  0x52   : > { %v6028_v20 = vsub.f32 %v450_v8, %v6006_v11  ;;  %600 = vmatpush.msra.mxu2 %v6010_v14  ;;  %459 = vmatpush.msra.mxu0 %v5998_v4  ;;  %v9313_v22 = vand.u32 4294901760, %v6010_v14  ;;  %v9312_v23 = vand.u32 4294901760, %v6013_v15  ;;  %v6041_v28 = vsub.f32 %v449_v12, %v6019_v17  ;;  %v812_v55 = vld [vmem:[#allocation7 + $0x78] sm:$0xff]  ;;  %v441_v60 = vld [vmem:[#allocation5 + $0x8] sm:$0xff]  ;;  %v811_v63 = vld [vmem:[#allocation7 + $0x70] sm:$0xff]  ;;  %s5147_s14 = sshll.u32 %s438_s17, 4  ;;  %s5148_s14 = int_to_ptr.vmem [resolvable:$true] %s5147_s14 }
  0x53   : > { %v9311_v24 = vand.u32 4294901760, %v6017_v16  ;;  %655 = vmatpush.msra.mxu3 %v5998_v4  ;;  %v9308_v26 = vand.u32 4294901760, %v6022_v18  ;;  %v9307_v27 = vand.u32 4294901760, %v6025_v19  ;;  %v6054_v32 = vand.u32 4294901760, %v447_v21  ;;  %v440_v6 = vld [vmem:[#allocation5] sm:$0xff]  ;;  %s5149_s11 = sshll.u32 %s5145_s22, 4  ;;  %s5150_s11 = int_to_ptr.hbm [resolvable:$true] %s5149_s11 }
  0x54   : > { %603 = vmatpush.msra.mxu2 %v6013_v15  ;;  %461 = vmatpush.msra.mxu0 %v6000_v5  ;;  %v500_v29 = vsub.f32 %v6010_v14, %v9313_v22  ;;  %v506_v30 = vsub.f32 %v6013_v15, %v9312_v23  ;;  %v9305_v33 = vand.u32 4294901760, %v6028_v20  ;;  %v6064_v39 = vsub.f32 %v448_v13, %v6035_v25  ;;  %v810_v13 = vld [vmem:[#allocation7 + $0x68] sm:$0xff]  ;;  %s5135_s12 = scalar_lea.sflag [#allocation4], %s5968_s26  ;;  %s5693_s15 = sshra.s32 %s5150_s11, 4  ;;  %s5694_s15 = int_to_ptr.hbm [resolvable:$true] %s5693_s15 }
  0x55   : > { %v512_v31 = vsub.f32 %v6017_v16, %v9311_v24  ;;  %657 = vmatpush.msra.mxu3 %v6000_v5  ;;  %v518_v38 = vsub.f32 %v6022_v18, %v9308_v26  ;;  %v524_v41 = vsub.f32 %v6025_v19, %v9307_v27  ;;  %v6071_v42 = vsub.f32 %v447_v21, %v6054_v32  ;;  %s5695_s16 = scalar_lea.hbm %s5694_s15, 8  ;;  %s5699_s21 = scalar_lea.hbm %s9298_s8, 16 }
  0x56   : > { %v501_v36 = vand.u32 4294901760, %v500_v29  ;;  %606 = vmatpush.msra.mxu2 %v6017_v16  ;;  %463 = vmatpush.msra.mxu0 %v6002_v9  ;;  %v507_v37 = vand.u32 4294901760, %v506_v30  ;;  %v9304_v44 = vand.u32 4294901760, %v6041_v28  ;;  %v6075_v45 = vand.u32 4294901760, %v446_v34  ;;  %p5696_p1 = scmp.ne.s32.totalorder %s5694_s15, %s5695_s16  ;;  %p5700_p12 = scmp.lt.s32.totalorder %s5694_s15, %s9298_s8 }
  0x57   : > { %659 = vmatpush.msra.mxu3 %v6002_v9  ;;  %v513_v43 = vand.u32 4294901760, %v512_v31  ;;  %v6077_v46 = vand.u32 4294901760, %v445_v35  ;;  %v6081_v47 = vand.u32 4294901760, %v444_v40  ;;  %v519_v49 = vand.u32 4294901760, %v518_v38  ;;  %p5701_p8 = scmp.lt.s32.totalorder %s5699_s21, %s5695_s16 }
  0x58   : > { %502 = vmatpush.msra.mxu1 %v501_v36  ;;  %609 = vmatpush.msra.mxu2 %v6022_v18  ;;  %v530_v50 = vsub.f32 %v6028_v20, %v9305_v33  ;;  %v9303_v51 = vand.u32 4294901760, %v6064_v39  ;;  %v6089_v52 = vsub.f32 %v446_v34, %v6075_v45  ;;  %v9301_v54 = vand.u32 4294901760, %v6071_v42  ;;  %v805_v33 = vld [vmem:[#allocation7 + $0x40] sm:$0xff]  ;;  %p5697_p3 = pnand %p5696_p1, %p5937_p13 }
  0x59   : > { %465 = vmatpush.msra.mxu0 %v6004_v10  ;;  %661 = vmatpush.msra.mxu3 %v6004_v10  ;;  %v525_v56 = vand.u32 4294901760, %v524_v41  ;;  %v536_v57 = vsub.f32 %v6041_v28, %v9304_v44  ;;  %v6099_v58 = vsub.f32 %v445_v35, %v6077_v46  ;;  %v6101_v59 = vand.u32 4294901760, %v443_v48  ;;  %p5702_p7 = por %p5701_p8, %p5700_p12 }
  0x5a   : > { %508 = vmatpush.msra.mxu1 %v507_v37  ;;  %612 = vmatpush.msra.mxu2 %v6025_v19  ;;  %v6106_v61 = vsub.f32 %v444_v40, %v6081_v47  ;;  %v6108_v62 = vand.u32 4294901760, %v442_v53  ;;  %v531_v0 = vand.u32 4294901760, %v530_v50  ;;  %v542_v1 = vsub.f32 %v6064_v39, %v9303_v51  ;;  %v809_v37 = vld [vmem:[#allocation7 + $0x60] sm:$0xff]  ;;  %v808_v50 = vld [vmem:[#allocation7 + $0x58] sm:$0xff]  ;;  %p5698_p5 = pneg %p5697_p3 }
  0x5b   : > { %467 = vmatpush.msra.mxu0 %v6006_v11  ;;  %663 = vmatpush.msra.mxu3 %v6006_v11  ;;  %v9300_v2 = vand.u32 4294901760, %v6089_v52  ;;  %v6115_v7 = vand.u32 4294901760, %v812_v55  ;;  %v548_v8 = vsub.f32 %v6071_v42, %v9301_v54  ;;  %v6122_v12 = vand.u32 4294901760, %v441_v60  ;;  %v806_v54 = vld [vmem:[#allocation7 + $0x48] sm:$0xff] }
  0x5c   : > { %514 = vmatpush.msra.mxu1 %v513_v43  ;;  %615 = vmatpush.msra.mxu2 %v6028_v20  ;;  %v537_v21 = vand.u32 4294901760, %v536_v57  ;;  %v9299_v29 = vand.u32 4294901760, %v6099_v58  ;;  %v6127_v30 = vsub.f32 %v443_v48, %v6101_v59  ;;  %v6129_v31 = vand.u32 4294901760, %v811_v63  ;;  %p5703_p9 = pnand %p5702_p7, %p5698_p5 }
  0x5d   : > { %469 = vmatpush.msra.mxu0 %v6019_v17  ;;  %665 = vmatpush.msra.mxu3 %v6019_v17  ;;  %9398 = vst [vmem:[#allocation23_spill] sm:$0xff] %v6122_v12  ;;  %v9302_v34 = vand.u32 4294901760, %v6106_v61  ;;  %v6135_v35 = vsub.f32 %v442_v53, %v6108_v62  ;;  %v6137_v36 = vand.u32 4294901760, %v440_v6  ;;  %v543_v38 = vand.u32 4294901760, %v542_v1 }
  0x5e   : > { %520 = vmatpush.msra.mxu1 %v519_v49  ;;  %618 = vmatpush.msra.mxu2 %v6041_v28  ;;  %v554_v40 = vsub.f32 %v6089_v52, %v9300_v2  ;;  %v6144_v41 = vsub.f32 %v812_v55, %v6115_v7  ;;  %v6146_v43 = vand.u32 4294901760, %v810_v13  ;;  %v549_v48 = vand.u32 4294901760, %v548_v8 }
  0x5f   : > { %471 = vmatpush.msra.mxu0 %v6035_v25  ;;  %667 = vmatpush.msra.mxu3 %v6035_v25  ;;  %9399 = vst [vmem:[#allocation24_spill] sm:$0xff] %v6137_v36  ;;  %v6151_v49 = vsub.f32 %v441_v60, %v6122_v12  ;;  %v560_v53 = vsub.f32 %v6099_v58, %v9299_v29  ;;  %v9306_v55 = vand.u32 4294901760, %v6127_v30  ;;  %v6161_v57 = vand.u32 4294901760, %v809_v37 }
  0x60   : > { %526 = vmatpush.msra.mxu1 %v525_v56  ;;  %621 = vmatpush.msra.mxu2 %v6064_v39  ;;  %v6159_v56 = vsub.f32 %v811_v63, %v6129_v31  ;;  %v566_v60 = vsub.f32 %v6106_v61, %v9302_v34  ;;  %v9309_v1 = vand.u32 4294901760, %v6135_v35  ;;  %v6170_v8 = vsub.f32 %v440_v6, %v6137_v36 }
  0x61   : > { %473 = vmatpush.msra.mxu0 %v6054_v32  ;;  %669 = vmatpush.msra.mxu3 %v6054_v32  ;;  %v555_v63 = vand.u32 4294901760, %v554_v40  ;;  %v6175_v29 = vsub.f32 %v810_v13, %v6146_v43  ;;  %v6177_v2 = vand.u32 4294901760, %v808_v50  ;;  %v9315_v34 = vand.u32 4294901760, %v6151_v49 }
  0x62   : > { %532 = vmatpush.msra.mxu1 %v531_v0  ;;  %624 = vmatpush.msra.mxu2 %v6071_v42  ;;  %9400 = vst [vmem:[#allocation25_spill] sm:$0xff] %v6159_v56  ;;  %v807_v0 = vld [vmem:[#allocation7 + $0x50] sm:$0xff]  ;;  %v572_v13 = vsub.f32 %v6127_v30, %v9306_v55  ;;  %v9314_v40 = vand.u32 4294901760, %v6159_v56  ;;  %v6190_v51 = vsub.f32 %v809_v37, %v6161_v57  ;;  %v9318_v44 = vand.u32 4294901760, %v6170_v8 }
  0x63   : > { %475 = vmatpush.msra.mxu0 %v6075_v45  ;;  %671 = vmatpush.msra.mxu3 %v6075_v45  ;;  %9401 = vst [vmem:[#allocation26_spill] sm:$0xff] %v6175_v29  ;;  %v6182_v6 = vand.u32 4294901760, %v807_v0  ;;  %v567_v55 = vand.u32 4294901760, %v566_v60  ;;  %v9319_v27 = vand.u32 4294901760, %v6175_v29  ;;  %v6206_v26 = vsub.f32 %v808_v50, %v6177_v2  ;;  %v804_v60 = vld [vmem:[#allocation7 + $0x38] sm:$0xff] }
  0x64   : > { %538 = vmatpush.msra.mxu1 %v537_v21  ;;  %627 = vmatpush.msra.mxu2 %v6089_v52  ;;  %v9310_v21 = vand.u32 4294901760, %v6144_v41  ;;  %9402 = vst [vmem:[#allocation27_spill] sm:$0xff] %v6190_v51  ;;  %v863_v50 = vsub.f32 %v6159_v56, %v9314_v40  ;;  %v6221_v23 = vand.u32 4294901760, %v805_v33  ;;  %v6236_v24 = vand.u32 4294901760, %v804_v60 }
  0x65   : > { %477 = vmatpush.msra.mxu0 %v6077_v46  ;;  %673 = vmatpush.msra.mxu3 %v6077_v46 }
  0x66   : > { %544 = vmatpush.msra.mxu1 %v543_v38  ;;  %630 = vmatpush.msra.mxu2 %v6099_v58  ;;  %v561_v38 = vand.u32 4294901760, %v560_v53  ;;  %v6198_v53 = vand.u32 4294901760, %v806_v54  ;;  %v857_v37 = vsub.f32 %v6144_v41, %v9310_v21  ;;  %v573_v21 = vand.u32 4294901760, %v572_v13  ;;  %v803_v13 = vld [vmem:[#allocation7 + $0x30] sm:$0xff] }
  0x67   : > { %479 = vmatpush.msra.mxu0 %v6081_v47  ;;  %675 = vmatpush.msra.mxu3 %v6081_v47 }
  0x68   : > { %550 = vmatpush.msra.mxu1 %v549_v48  ;;  %633 = vmatpush.msra.mxu2 %v6106_v61  ;;  %v578_v48 = vsub.f32 %v6135_v35, %v9309_v1  ;;  %v6214_v1 = vsub.f32 %v807_v0, %v6182_v6  ;;  %v590_v0 = vsub.f32 %v6170_v8, %v9318_v44  ;;  %v858_v40 = vand.u32 4294901760, %v857_v37  ;;  %v802_v44 = vld [vmem:[#allocation7 + $0x28] sm:$0xff] }
  0x69   : > { %481 = vmatpush.msra.mxu0 %v6101_v59  ;;  %677 = vmatpush.msra.mxu3 %v6101_v59  ;;  %v9403_v37 = vand.u32 4294901760, %v6190_v51 }
  0x6a   : > { %556 = vmatpush.msra.mxu1 %v555_v63  ;;  %636 = vmatpush.msra.mxu2 %v6127_v30  ;;  %v584_v63 = vsub.f32 %v6151_v49, %v9315_v34  ;;  %v579_v22 = vand.u32 4294901760, %v578_v48  ;;  %v869_v34 = vsub.f32 %v6175_v29, %v9319_v27  ;;  %v6246_v48 = vsub.f32 %v805_v33, %v6221_v23 }
  0x6b   : > { %483 = vmatpush.msra.mxu0 %v6108_v62  ;;  %679 = vmatpush.msra.mxu3 %v6108_v62  ;;  %v875_v27 = vsub.f32 %v6190_v51, %v9403_v37  ;;  %v6248_v29 = vand.u32 4294901760, %v803_v13  ;;  %v6258_v33 = vsub.f32 %v804_v60, %v6236_v24  ;;  %v6260_v51 = vand.u32 4294901760, %v802_v44 }
  0x6c   : > { %562 = vmatpush.msra.mxu1 %v561_v38  ;;  %639 = vmatpush.msra.mxu2 %v6135_v35  ;;  %v6229_v38 = vsub.f32 %v806_v54, %v6198_v53  ;;  %v585_v56 = vand.u32 4294901760, %v584_v63  ;;  %v9404_v63 = vand.u32 4294901760, %v6010_v14  ;;  %v591_v54 = vand.u32 4294901760, %v590_v0 }
  0x6d   : > { %485 = vmatpush.msra.mxu0 %v6122_v12  ;;  %681 = vmatpush.msra.mxu3 %v6122_v12  ;;  %v9405_v12 = vand.u32 4294901760, %v6206_v26  ;;  %v9406_v14 = vand.u32 4294901760, %v6013_v15  ;;  %v9407_v0 = vand.u32 4294901760, %v6214_v1  ;;  %v6270_v60 = vsub.f32 %v803_v13, %v6248_v29 }
  0x6e   : > { %568 = vmatpush.msra.mxu1 %v567_v55  ;;  %642 = vmatpush.msra.mxu2 %v6151_v49  ;;  %v864_v55 = vand.u32 4294901760, %v863_v50  ;;  %v870_v50 = vand.u32 4294901760, %v869_v34  ;;  %v876_v34 = vand.u32 4294901760, %v875_v27  ;;  %v9408_v15 = vand.u32 4294901760, %v6017_v16 }
  0x6f   : > { %487 = vmatpush.msra.mxu0 %v6137_v36  ;;  %683 = vmatpush.msra.mxu3 %v6137_v36  ;;  %v801_v36 = vld [vmem:[#allocation7 + $0x20] sm:$0xff]  ;;  %v881_v37 = vsub.f32 %v6206_v26, %v9405_v12  ;;  %v6282_v13 = vsub.f32 %v802_v44, %v6260_v51  ;;  %v9409_v16 = vand.u32 4294901760, %v6022_v18  ;;  %v798_v12 = vld [vmem:[#allocation7 + $0x8] sm:$0xff]  ;;  %v910_v44 = vand.u32 4294901760, %v6270_v60 }
  0x70   : > { %574 = vmatpush.msra.mxu1 %v573_v21  ;;  %645 = vmatpush.msra.mxu2 %v6170_v8  ;;  %v9326_v21 = vand.u32 4294901760, %v6229_v38 }
  0x71   : > { %694 = vmatpush.msrb.mxu0 %v9404_v63  ;;  %859 = vmatpush.msrb.mxu3 %v858_v40  ;;  %v800_v40 = vld [vmem:[#allocation7 + $0x18] sm:$0xff]  ;;  %v6272_v63 = vand.u32 4294901760, %v801_v36  ;;  %v882_v27 = vand.u32 4294901760, %v881_v37 }
  0x72   : > { %814 = vmatpush.msrb.mxu2 %v6115_v7  ;;  %580 = vmatpush.msra.mxu1 %v579_v22  ;;  %v887_v22 = vsub.f32 %v6214_v1, %v9407_v0  ;;  %v799_v0 = vld [vmem:[#allocation7 + $0x10] sm:$0xff] }
  0x73   : > { %698 = vmatpush.msrb.mxu0 %v9406_v14  ;;  %865 = vmatpush.msrb.mxu3 %v864_v55  ;;  %v893_v14 = vsub.f32 %v6229_v38, %v9326_v21  ;;  %v6284_v55 = vand.u32 4294901760, %v800_v40  ;;  %v6295_v37 = vsub.f32 %v801_v36, %v6272_v63  ;;  %v6297_v21 = vand.u32 4294901760, %v799_v0 }
  0x74   : > { %816 = vmatpush.msrb.mxu2 %v6129_v31  ;;  %586 = vmatpush.msra.mxu1 %v585_v56  ;;  %v904_v56 = vand.u32 4294901760, %v6258_v33 }
  0x75   : > { %702 = vmatpush.msrb.mxu0 %v9408_v15  ;;  %871 = vmatpush.msrb.mxu3 %v870_v50  ;;  %v888_v15 = vand.u32 4294901760, %v887_v22  ;;  %v894_v18 = vand.u32 4294901760, %v893_v14  ;;  %v6308_v36 = vsub.f32 %v800_v40, %v6284_v55  ;;  %v911_v14 = vsub.f32 %v6270_v60, %v910_v44 }
  0x76   : > { %818 = vmatpush.msrb.mxu2 %v6146_v43  ;;  %592 = vmatpush.msra.mxu1 %v591_v54  ;;  %v9410_v54 = vand.u32 4294901760, %v6246_v48  ;;  %v905_v22 = vsub.f32 %v6258_v33, %v904_v56  ;;  %v6322_v40 = vsub.f32 %v799_v0, %v6297_v21 }
  0x77   : > { %706 = vmatpush.msrb.mxu0 %v9409_v16  ;;  %877 = vmatpush.msrb.mxu3 %v876_v34  ;;  %v916_v34 = vand.u32 4294901760, %v6282_v13  ;;  %v6310_v16 = vand.u32 4294901760, %v798_v12 }
  0x78   : > { %761 = vmatpush.msrb.mxu1 %v5996_v3  ;;  %820 = vmatpush.msrb.mxu2 %v6161_v57  ;;  %v899_v50 = vsub.f32 %v6246_v48, %v9410_v54  ;;  %v9411_v3 = vand.u32 4294901760, %v6025_v19  ;;  %v439_v54 = vld [vmem:[%s5974_s1] sm:$0xff] }
  0x79   : > { %883 = vmatpush.msrb.mxu3 %v882_v27  ;;  %v922_v27 = vand.u32 4294901760, %v6295_v37  ;;  %v6335_v0 = vsub.f32 %v798_v12, %v6310_v16  ;;  %v9415_v12 = vand.u32 4294901760, %v6071_v42 }
  0x7a   : > { %763 = vmatpush.msrb.mxu1 %v5998_v4  ;;  %710 = vmatpush.msrb.mxu0 %v9411_v3  ;;  %v9412_v4 = vand.u32 4294901760, %v6028_v20  ;;  %v900_v19 = vand.u32 4294901760, %v899_v50  ;;  %v6327_v20 = vand.u32 4294901760, %v439_v54  ;;  %v797_v3 = vld [vmem:[#allocation7] sm:$0xff]  ;;  %v917_v50 = vsub.f32 %v6282_v13, %v916_v34 }
  0x7b   : > { %822 = vmatpush.msrb.mxu2 %v6177_v2  ;;  %889 = vmatpush.msrb.mxu3 %v888_v15  ;;  %v906_v15 = vand.u32 4294901760, %v905_v22  ;;  %v934_v22 = vand.u32 4294901760, %v6322_v40 }
  0x7c   : > { %765 = vmatpush.msrb.mxu1 %v6000_v5  ;;  %714 = vmatpush.msrb.mxu0 %v9412_v4  ;;  %v9413_v5 = vand.u32 4294901760, %v6041_v28  ;;  %v928_v4 = vand.u32 4294901760, %v6308_v36  ;;  %v912_v28 = vand.u32 4294901760, %v911_v14  ;;  %v940_v14 = vand.u32 4294901760, %v6335_v0 }
  0x7d   : > { %824 = vmatpush.msrb.mxu2 %v6182_v6  ;;  %895 = vmatpush.msrb.mxu3 %v894_v18  ;;  %v923_v18 = vsub.f32 %v6295_v37, %v922_v27 }
  0x7e   : > { %767 = vmatpush.msrb.mxu1 %v6002_v9  ;;  %718 = vmatpush.msrb.mxu0 %v9413_v5  ;;  %v9414_v9 = vand.u32 4294901760, %v6064_v39  ;;  %v6345_v5 = vand.u32 4294901760, %v797_v3  ;;  %v918_v39 = vand.u32 4294901760, %v917_v50  ;;  %v9417_v50 = vand.u32 4294901760, %v6099_v58 }
  0x7f   : > { %826 = vmatpush.msrb.mxu2 %v6198_v53  ;;  %901 = vmatpush.msrb.mxu3 %v900_v19  ;;  %v929_v19 = vsub.f32 %v6308_v36, %v928_v4  ;;  %v924_v42 = vand.u32 4294901760, %v923_v18 }
  0x80   : > { %769 = vmatpush.msrb.mxu1 %v6004_v10  ;;  %722 = vmatpush.msrb.mxu0 %v9414_v9  ;;  %v6351_v10 = vsub.f32 %v439_v54, %v6327_v20  ;;  %v935_v54 = vsub.f32 %v6322_v40, %v934_v22  ;;  %v941_v9 = vsub.f32 %v6335_v0, %v940_v14 }
  0x81   : > { %828 = vmatpush.msrb.mxu2 %v6221_v23  ;;  %907 = vmatpush.msrb.mxu3 %v906_v15  ;;  %v6366_v15 = vsub.f32 %v797_v3, %v6345_v5  ;;  %v9418_v3 = vand.u32 4294901760, %v6106_v61  ;;  %v9420_v61 = vand.u32 4294901760, %v6135_v35 }
  0x82   : > { %771 = vmatpush.msrb.mxu1 %v6006_v11  ;;  %726 = vmatpush.msrb.mxu0 %v9415_v12  ;;  %v9416_v11 = vand.u32 4294901760, %v6089_v52  ;;  %v930_v52 = vand.u32 4294901760, %v929_v19  ;;  %v9430_v19 = vld [vmem:[#allocation27_spill] sm:$0xff] }
  0x83   : > { %830 = vmatpush.msrb.mxu2 %v6236_v24  ;;  %913 = vmatpush.msrb.mxu3 %v912_v28  ;;  %v946_v58 = vand.u32 4294901760, %v6366_v15  ;;  %v9419_v28 = vand.u32 4294901760, %v6127_v30  ;;  %v9421_v30 = vand.u32 4294901760, %v6151_v49  ;;  %v9425_v49 = vld [vmem:[#allocation25_spill] sm:$0xff] }
  0x84   : > { %773 = vmatpush.msrb.mxu1 %v6019_v17  ;;  %730 = vmatpush.msrb.mxu0 %v9416_v11  ;;  %v6372_v17 = vand.u32 4294901760, %v6351_v10  ;;  %v9431_v11 = vand.u32 4294901760, %v9430_v19 }
  0x85   : > { %832 = vmatpush.msrb.mxu2 %v6248_v29  ;;  %919 = vmatpush.msrb.mxu3 %v918_v39  ;;  %v9428_v39 = vld [vmem:[#allocation26_spill] sm:$0xff] }
  0x86   : > { %775 = vmatpush.msrb.mxu1 %v6035_v25  ;;  %734 = vmatpush.msrb.mxu0 %v9417_v50  ;;  %v936_v25 = vand.u32 4294901760, %v935_v54  ;;  %v491_v18 = vsub.f32 %v6351_v10, %v6372_v17  ;;  %v1164_v54 = vld [vmem:[#allocation8 + $0x50] sm:$0xff] }
  0x87   : > { %834 = vmatpush.msrb.mxu2 %v6260_v51  ;;  %925 = vmatpush.msrb.mxu3 %v924_v42 }
  0x88   : > { %777 = vmatpush.msrb.mxu1 %v6054_v32  ;;  %738 = vmatpush.msrb.mxu0 %v9418_v3  ;;  %v942_v32 = vand.u32 4294901760, %v941_v9  ;;  %v6399_v12 = vand.u32 4294901760, %v491_v18 }
  0x89   : > { %836 = vmatpush.msrb.mxu2 %v6272_v63  ;;  %931 = vmatpush.msrb.mxu3 %v930_v52  ;;  %v6549_v52 = vand.u32 4294901760, %v1164_v54 }
  0x8a   : > { %779 = vmatpush.msrb.mxu1 %v6075_v45  ;;  %742 = vmatpush.msrb.mxu0 %v9419_v28  ;;  %v947_v45 = vsub.f32 %v6366_v15, %v946_v58 }
  0x8b   : > { %838 = vmatpush.msrb.mxu2 %v6284_v55  ;;  %937 = vmatpush.msrb.mxu3 %v936_v25  ;;  %v1163_v25 = vld [vmem:[#allocation8 + $0x48] sm:$0xff] }
  0x8c   : > { %781 = vmatpush.msrb.mxu1 %v6077_v46  ;;  %746 = vmatpush.msrb.mxu0 %v9420_v61  ;;  %v9422_v46 = vand.u32 4294901760, %v6170_v8  ;;  %v948_v35 = vand.u32 4294901760, %v947_v45  ;;  %v9426_v8 = vand.u32 4294901760, %v9425_v49  ;;  %v6559_v18 = vand.u32 4294901760, %v1163_v25  ;;  %v1162_v45 = vld [vmem:[#allocation8 + $0x40] sm:$0xff] }
  0x8d   : > { %840 = vmatpush.msrb.mxu2 %v6297_v21  ;;  %943 = vmatpush.msrb.mxu3 %v942_v32  ;;  %v6562_v32 = vsub.f32 %v1164_v54, %v6549_v52 }
  0x8e   : > { %783 = vmatpush.msrb.mxu1 %v6081_v47  ;;  %750 = vmatpush.msrb.mxu0 %v9421_v30  ;;  %v9423_v47 = vand.u32 4294901760, %v6144_v41 }
  0x8f   : > { %842 = vmatpush.msrb.mxu2 %v6310_v16  ;;  %493 = vmatmul.f32.vlgmr.msra.gmra.mxu0 %v6399_v12 }
  0x90   : > { %785 = vmatpush.msrb.mxu1 %v6101_v59  ;;  %648 = vmatmul.f32.vlgmr.msra.gmra.mxu2 %v6351_v10  ;;  %v9424_v59 = vld [vmem:[#allocation23_spill] sm:$0xff] }
  0x91   : > { %754 = vmatpush.msrb.mxu0 %v9422_v46  ;;  %844 = vmatpush.msrb.mxu2 %v6345_v5  ;;  %v1243_v46 = vand.u32 4294901760, %v6562_v32 }
  0x92   : > { %787 = vmatpush.msrb.mxu1 %v6108_v62  ;;  %687 = vmatmul.f32.vlgmr.msra.gmra.mxu3 %v6372_v17  ;;  %v9427_v62 = vld [vmem:[#allocation24_spill] sm:$0xff] }
  0x93   : > { %957 = vmatpush.msra.mxu0 %v6144_v41  ;;  %1051 = vmatpush.msra.mxu2 %v9423_v47  ;;  %v9429_v41 = vand.u32 4294901760, %v9428_v39  ;;  %v6577_v47 = vsub.f32 %v1163_v25, %v6559_v18 }
  0x94   : > { %789 = vmatpush.msrb.mxu1 %v9424_v59  ;;  %949 = vmatpush.msrb.mxu3 %v948_v35  ;;  %v6574_v35 = vand.u32 4294901760, %v1162_v45 }
  0x95   : > { %594 = vmatmul.f32.vlgmr.msra.gmra.mxu1 %v6327_v20  ;;  %960 = vmatpush.msra.mxu0 %v9425_v49  ;;  %v1161_v49 = vld [vmem:[#allocation8 + $0x38] sm:$0xff] }
  0x96   : > { %1055 = vmatpush.msra.mxu2 %v9426_v8  ;;  %1118 = vmatpush.msra.mxu3 %v6115_v7 }
  0x97   : > { %791 = vmatpush.msrb.mxu1 %v9427_v62  ;;  %963 = vmatpush.msra.mxu0 %v9428_v39  ;;  %v1244_v62 = vsub.f32 %v6562_v32, %v1243_v46  ;;  %v1249_v39 = vand.u32 4294901760, %v6577_v47 }
  0x98   : > { %1059 = vmatpush.msra.mxu2 %v9429_v41  ;;  %1120 = vmatpush.msra.mxu3 %v6129_v31  ;;  %v6586_v41 = vand.u32 4294901760, %v1161_v49 }
  0x99   : > { %1010 = vmatpush.msra.mxu1 %v6115_v7  ;;  %966 = vmatpush.msra.mxu0 %v9430_v19  ;;  %v9432_v7 = vand.u32 4294901760, %v6206_v26  ;;  %v6589_v19 = vsub.f32 %v1162_v45, %v6574_v35 }
  0x9a   : > { %1063 = vmatpush.msra.mxu2 %v9431_v11  ;;  %1122 = vmatpush.msra.mxu3 %v6146_v43  ;;  %v1160_v11 = vld [vmem:[#allocation8 + $0x30] sm:$0xff] }
  0x9b   : > { %1012 = vmatpush.msra.mxu1 %v6129_v31  ;;  %756 = vmatmul.f32.vlgmr.msrb.gmra.mxu0 %v6327_v20  ;;  %v9433_v31 = vand.u32 4294901760, %v6214_v1 }
  0x9c   : > { %969 = vmatpush.msra.mxu0 %v6206_v26  ;;  %1067 = vmatpush.msra.mxu2 %v9432_v7  ;;  %v9434_v26 = vand.u32 4294901760, %v6229_v38  ;;  %v1245_v7 = vand.u32 4294901760, %v1244_v62 }
  0x9d   : > { %1014 = vmatpush.msra.mxu1 %v6146_v43  ;;  %1124 = vmatpush.msra.mxu3 %v6161_v57  ;;  %v9435_v43 = vand.u32 4294901760, %v6246_v48 }
  0x9e   : > { %793 = vmatmul.f32.vlgmr.msrb.gmra.mxu1 %v6327_v20  ;;  %972 = vmatpush.msra.mxu0 %v6214_v1  ;;  %v1168_v1 = vld [vmem:[#allocation8 + $0x70] sm:$0xff] }
  0x9f   : > { %1016 = vmatpush.msra.mxu1 %v6161_v57  ;;  %1071 = vmatpush.msra.mxu2 %v9433_v31  ;;  %v1250_v31 = vsub.f32 %v6577_v47, %v1249_v39 }
  0xa0   : > { %1126 = vmatpush.msra.mxu3 %v6177_v2  ;;  %975 = vmatpush.msra.mxu0 %v6229_v38  ;;  %v6507_v38 = vand.u32 4294901760, %v1168_v1 }
  0xa1   : > { %1018 = vmatpush.msra.mxu1 %v6177_v2  ;;  %1075 = vmatpush.msra.mxu2 %v9434_v26  ;;  %v6596_v26 = vand.u32 4294901760, %v1160_v11 }
  0xa2   : > { %1128 = vmatpush.msra.mxu3 %v6182_v6  ;;  %978 = vmatpush.msra.mxu0 %v6246_v48 }
  0xa3   : > { %1020 = vmatpush.msra.mxu1 %v6182_v6  ;;  %1079 = vmatpush.msra.mxu2 %v9435_v43  ;;  %v6599_v43 = vsub.f32 %v1161_v49, %v6586_v41 }
  0xa4   : > { %1130 = vmatpush.msra.mxu3 %v6198_v53  ;;  %981 = vmatpush.msra.mxu0 %v6258_v33 }
  0xa5   : > { %1022 = vmatpush.msra.mxu1 %v6198_v53  ;;  %1083 = vmatpush.msra.mxu2 %v904_v56  ;;  %v6515_v56 = vsub.f32 %v1168_v1, %v6507_v38  ;;  %v1261_v1 = vand.u32 4294901760, %v6599_v43 }
  0xa6   : > { %1132 = vmatpush.msra.mxu3 %v6221_v23  ;;  %984 = vmatpush.msra.mxu0 %v6270_v60 }
  0xa7   : > { %1024 = vmatpush.msra.mxu1 %v6221_v23  ;;  %1087 = vmatpush.msra.mxu2 %v910_v44 }
  0xa8   : > { %1134 = vmatpush.msra.mxu3 %v6236_v24  ;;  %987 = vmatpush.msra.mxu0 %v6282_v13  ;;  %v1166_v13 = vld [vmem:[#allocation8 + $0x60] sm:$0xff] }
  0xa9   : > { %1026 = vmatpush.msra.mxu1 %v6236_v24  ;;  %1091 = vmatpush.msra.mxu2 %v916_v34  ;;  %v6524_v34 = vand.u32 4294901760, %v1166_v13 }
  0xaa   : > { %1136 = vmatpush.msra.mxu3 %v6248_v29  ;;  %990 = vmatpush.msra.mxu0 %v6295_v37  ;;  %v1219_v37 = vand.u32 4294901760, %v6515_v56 }
  0xab   : > { %1028 = vmatpush.msra.mxu1 %v6248_v29  ;;  %1095 = vmatpush.msra.mxu2 %v922_v27  ;;  %v1165_v27 = vld [vmem:[#allocation8 + $0x58] sm:$0xff]  ;;  %v6542_v42 = vsub.f32 %v1166_v13, %v6524_v34 }
  0xac   : > { %1138 = vmatpush.msra.mxu3 %v6260_v51  ;;  %850 = vmatmul.f32.vlgmr.msrb.gmra.mxu2 %v6399_v12 }
  0xad   : > { %951 = vmatmul.f32.vlgmr.msrb.gmra.mxu3 %v6327_v20  ;;  %993 = vmatpush.msra.mxu0 %v6308_v36  ;;  %v1231_v3 = vand.u32 4294901760, %v6542_v42 }
  0xae   : > { %1030 = vmatpush.msra.mxu1 %v6260_v51  ;;  %1099 = vmatpush.msra.mxu2 %v928_v4  ;;  %v1169_v51 = vld [vmem:[#allocation8 + $0x78] sm:$0xff] }
  0xaf   : > { %1140 = vmatpush.msra.mxu3 %v6272_v63  ;;  %996 = vmatpush.msra.mxu0 %v6322_v40  ;;  %v6501_v57 = vand.u32 4294901760, %v1169_v51  ;;  %v1232_v61 = vsub.f32 %v6542_v42, %v1231_v3 }
  0xb0   : > { %1032 = vmatpush.msra.mxu1 %v6272_v63  ;;  %1103 = vmatpush.msra.mxu2 %v934_v22 }
  0xb1   : > { %1142 = vmatpush.msra.mxu3 %v6284_v55  ;;  %999 = vmatpush.msra.mxu0 %v6335_v0  ;;  %v6505_v53 = vsub.f32 %v1169_v51, %v6501_v57  ;;  %v1220_v0 = vsub.f32 %v6515_v56, %v1219_v37  ;;  %v1233_v59 = vand.u32 4294901760, %v1232_v61  ;;  %v1158_v51 = vld [vmem:[#allocation8 + $0x20] sm:$0xff] }
  0xb2   : > { %1034 = vmatpush.msra.mxu1 %v6284_v55  ;;  %1107 = vmatpush.msra.mxu2 %v940_v14 }
  0xb3   : > { %1144 = vmatpush.msra.mxu3 %v6297_v21  ;;  %1002 = vmatpush.msra.mxu0 %v6366_v15  ;;  %v1213_v60 = vand.u32 4294901760, %v6505_v53  ;;  %v1221_v15 = vand.u32 4294901760, %v1220_v0 }
  0xb4   : > { %1036 = vmatpush.msra.mxu1 %v6297_v21  ;;  %1111 = vmatpush.msra.mxu2 %v946_v58  ;;  %v1167_v21 = vld [vmem:[#allocation8 + $0x68] sm:$0xff] }
  0xb5   : > { %1146 = vmatpush.msra.mxu3 %v6310_v16  ;;  %1005 = vmatmul.f32.vlgmr.msra.gmra.mxu0 %v6351_v10  ;;  %v6512_v63 = vand.u32 4294901760, %v1167_v21  ;;  %v1214_v44 = vsub.f32 %v6505_v53, %v1213_v60 }
  0xb6   : > { %1113 = vmatmul.f32.vlgmr.msra.gmra.mxu2 %v6327_v20  ;;  %1038 = vmatpush.msra.mxu1 %v6310_v16 }
  0xb7   : > { %1148 = vmatpush.msra.mxu3 %v6345_v5  ;;  %1171 = vmatpush.msrb.mxu0 %v6501_v57  ;;  %v6527_v36 = vsub.f32 %v1167_v21, %v6512_v63  ;;  %v1215_v4 = vand.u32 4294901760, %v1214_v44  ;;  %v1156_v21 = vld [vmem:[#allocation8 + $0x10] sm:$0xff] }
  0xb8   : > { %1150 = vmatmul.f32.vlgmr.msra.gmra.mxu3 %v6327_v20  ;;  %1040 = vmatpush.msra.mxu1 %v6345_v5  ;;  %v6536_v5 = vand.u32 4294901760, %v1165_v27 }
  0xb9   : > { %1044 = vmatmul.f32.vlgmr.msra.gmra.mxu1 %v6372_v17  ;;  %1367 = vmatpush.msrb.mxu3 %v6501_v57  ;;  %v1225_v22 = vand.u32 4294901760, %v6527_v36 }
  0xba   : > { %1173 = vmatpush.msrb.mxu0 %v6507_v38  ;;  %1314 = vmatpush.msrb.mxu2 %v6505_v53  ;;  %v6552_v9 = vsub.f32 %v1165_v27, %v6536_v5  ;;  %v1154_v27 = vld [vmem:[#allocation8] sm:$0xff] }
  0xbb   : > { %1369 = vmatpush.msrb.mxu3 %v6507_v38  ;;  %1216 = vmatpush.msrb.mxu1 %v1215_v4  ;;  %v1226_v50 = vsub.f32 %v6527_v36, %v1225_v22 }
  0xbc   : > { %1175 = vmatpush.msrb.mxu0 %v6512_v63  ;;  %1317 = vmatpush.msrb.mxu2 %v6515_v56  ;;  %v1237_v28 = vand.u32 4294901760, %v6552_v9 }
  0xbd   : > { %1371 = vmatpush.msrb.mxu3 %v6512_v63  ;;  %1222 = vmatpush.msrb.mxu1 %v1221_v15  ;;  %v1227_v58 = vand.u32 4294901760, %v1226_v50 }
  0xbe   : > { %1177 = vmatpush.msrb.mxu0 %v6524_v34  ;;  %1320 = vmatpush.msrb.mxu2 %v6527_v36  ;;  %v1238_v30 = vsub.f32 %v6552_v9, %v1237_v28 }
  0xbf   : > { %1373 = vmatpush.msrb.mxu3 %v6524_v34  ;;  %1228 = vmatpush.msrb.mxu1 %v1227_v58 }
  0xc0   : > { %1179 = vmatpush.msrb.mxu0 %v6536_v5  ;;  %1323 = vmatpush.msrb.mxu2 %v6542_v42  ;;  %v1239_v8 = vand.u32 4294901760, %v1238_v30 }
  0xc1   : > { %1375 = vmatpush.msrb.mxu3 %v6536_v5  ;;  %1234 = vmatpush.msrb.mxu1 %v1233_v59  ;;  %v6648_v59 = vand.u32 4294901760, %v1154_v27 }
  0xc2   : > { %1181 = vmatpush.msrb.mxu0 %v6549_v52  ;;  %1326 = vmatpush.msrb.mxu2 %v6552_v9 }
  0xc3   : > { %1377 = vmatpush.msrb.mxu3 %v6549_v52  ;;  %1240 = vmatpush.msrb.mxu1 %v1239_v8 }
  0xc4   : > { %1183 = vmatpush.msrb.mxu0 %v6559_v18  ;;  %1329 = vmatpush.msrb.mxu2 %v6562_v32 }
  0xc5   : > { %1379 = vmatpush.msrb.mxu3 %v6559_v18  ;;  %1246 = vmatpush.msrb.mxu1 %v1245_v7 }
  0xc6   : > { %1185 = vmatpush.msrb.mxu0 %v6574_v35  ;;  %1332 = vmatpush.msrb.mxu2 %v6577_v47 }
  0xc7   : > { %1381 = vmatpush.msrb.mxu3 %v6574_v35 }
  0xc8   : > { %1187 = vmatpush.msrb.mxu0 %v6586_v41  ;;  %1335 = vmatpush.msrb.mxu2 %v6589_v19 }
  0xc9   : > { %1383 = vmatpush.msrb.mxu3 %v6586_v41 }
  0xca   : > { %1189 = vmatpush.msrb.mxu0 %v6596_v26  ;;  %1338 = vmatpush.msrb.mxu2 %v6599_v43 }
  0xcb   : > { %1385 = vmatpush.msrb.mxu3 %v6596_v26 }
 0x10c   : > { %v494_v23 = vpop.f32.mrf.mxu0 }
 0x112   : > { %v595_v24 = vpop.f32.mrf.mxu1 }
 0x113   : > { %v596_v2 = vadd.f32 %v595_v24, %v494_v23  ;;  %v649_v29 = vpop.f32.mrf.mxu2  ;;  %v1255_v23 = vand.u32 4294901760, %v6589_v19  ;;  %v1159_v24 = vld [vmem:[#allocation8 + $0x28] sm:$0xff] }
 0x115   : > { %v650_v6 = vadd.f32 %v649_v29, %v596_v2  ;;  %v688_v48 = vpop.f32.mrf.mxu3  ;;  %v1157_v2 = vld [vmem:[#allocation8 + $0x18] sm:$0xff]  ;;  %v1251_v29 = vand.u32 4294901760, %v1250_v31  ;;  %v1256_v13 = vsub.f32 %v6589_v19, %v1255_v23 }
 0x116   : > { %v6617_v44 = vand.u32 4294901760, %v1157_v2 }
 0x117   : > { %v689_v33 = vadd.f32 %v688_v48, %v650_v6  ;;  %v6606_v6 = vand.u32 4294901760, %v1159_v24  ;;  %v6609_v48 = vsub.f32 %v1160_v11, %v6596_v26  ;;  %1252 = vmatpush.msrb.mxu1 %v1251_v29  ;;  %v1257_v15 = vand.u32 4294901760, %v1256_v13 }
 0x118   : > { %v757_v55 = vpop.f32.mrf.mxu0  ;;  %v6637_v25 = vsub.f32 %v1157_v2, %v6617_v44 }
 0x119   : > { %v758_v16 = vadd.f32 %v757_v55, %v689_v33  ;;  %v1155_v33 = vld [vmem:[#allocation8 + $0x8] sm:$0xff]  ;;  %v6615_v55 = vand.u32 4294901760, %v1158_v51  ;;  %1191 = vmatpush.msrb.mxu0 %v6606_v6  ;;  %v1267_v4 = vand.u32 4294901760, %v6609_v48  ;;  %v6628_v0 = vsub.f32 %v1159_v24, %v6606_v6  ;;  %1387 = vmatpush.msrb.mxu3 %v6606_v6 }
 0x11a   : > { %v6630_v54 = vand.u32 4294901760, %v1155_v33  ;;  %1341 = vmatpush.msrb.mxu2 %v6609_v48  ;;  %1258 = vmatpush.msrb.mxu1 %v1257_v15  ;;  %v1285_v8 = vand.u32 4294901760, %v6637_v25  ;;  %v6663_v24 = vsub.f32 %v1154_v27, %v6648_v59 }
 0x11b   : > { %v794_v40 = vpop.f32.mrf.mxu1  ;;  %v6634_v50 = vsub.f32 %v1158_v51, %v6615_v55  ;;  %v1268_v45 = vsub.f32 %v6609_v48, %v1267_v4  ;;  %1193 = vmatpush.msrb.mxu0 %v6615_v55  ;;  %v1273_v30 = vand.u32 4294901760, %v6628_v0  ;;  %1389 = vmatpush.msrb.mxu3 %v6615_v55 }
 0x11c   : > { %v6539_v14 = vadd.f32 %v794_v40, %v758_v16  ;;  %v6619_v16 = vand.u32 4294901760, %v1156_v21  ;;  %v1262_v40 = vsub.f32 %v6599_v43, %v1261_v1  ;;  %v6655_v11 = vsub.f32 %v1155_v33, %v6630_v54  ;;  %1344 = vmatpush.msrb.mxu2 %v6628_v0 }
 0x11d   : > { %v1279_v49 = vand.u32 4294901760, %v6634_v50  ;;  %v1269_v7 = vand.u32 4294901760, %v1268_v45  ;;  %v1274_v31 = vsub.f32 %v6628_v0, %v1273_v30  ;;  %1195 = vmatpush.msrb.mxu0 %v6617_v44  ;;  %v1286_v2 = vsub.f32 %v6637_v25, %v1285_v8  ;;  %1391 = vmatpush.msrb.mxu3 %v6617_v44 }
 0x11e   : > { %v6640_v58 = vsub.f32 %v1156_v21, %v6619_v16  ;;  %v1263_v61 = vand.u32 4294901760, %v1262_v40  ;;  %v1297_v29 = vand.u32 4294901760, %v6655_v11  ;;  %1347 = vmatpush.msrb.mxu2 %v6634_v50  ;;  %v1303_v15 = vand.u32 4294901760, %v6663_v24 }
 0x11f   : > { %v1280_v51 = vsub.f32 %v6634_v50, %v1279_v49  ;;  %v1275_v21 = vand.u32 4294901760, %v1274_v31  ;;  %1197 = vmatpush.msrb.mxu0 %v6619_v16  ;;  %1393 = vmatpush.msrb.mxu3 %v6619_v16  ;;  %v1287_v45 = vand.u32 4294901760, %v1286_v2 }
 0x120   : > { %v1291_v62 = vand.u32 4294901760, %v6640_v58  ;;  %1264 = vmatpush.msrb.mxu1 %v1263_v61  ;;  %1350 = vmatpush.msrb.mxu2 %v6637_v25  ;;  %v1304_v2 = vsub.f32 %v6663_v24, %v1303_v15 }
 0x121   : > { %v1281_v27 = vand.u32 4294901760, %v1280_v51  ;;  %1199 = vmatpush.msrb.mxu0 %v6630_v54  ;;  %1395 = vmatpush.msrb.mxu3 %v6630_v54 }
 0x122   : > { %1270 = vmatpush.msrb.mxu1 %v1269_v7  ;;  %v1292_v40 = vsub.f32 %v6640_v58, %v1291_v62  ;;  %v1298_v7 = vsub.f32 %v6655_v11, %v1297_v29  ;;  %1353 = vmatpush.msrb.mxu2 %v6640_v58 }
 0x123   : > { %1201 = vmatpush.msrb.mxu0 %v6648_v59  ;;  %1397 = vmatpush.msrb.mxu3 %v6648_v59 }
 0x124   : > { %1276 = vmatpush.msrb.mxu1 %v1275_v21  ;;  %v1293_v51 = vand.u32 4294901760, %v1292_v40  ;;  %1207 = vmatmul.f32.vlgmr.msrb.gmra.mxu0 %v6399_v12 }
 0x125   : > { %1408 = vmatpush.msra.mxu0 %v1213_v60  ;;  %1356 = vmatpush.msrb.mxu2 %v6655_v11  ;;  %v1305_v60 = vand.u32 4294901760, %v1304_v2 }
 0x126   : > { %1282 = vmatpush.msrb.mxu1 %v1281_v27  ;;  %v1547_v27 = vld [vmem:[#allocation11 + $0xf8] sm:$0xff]  ;;  %1401 = vmatmul.f32.vlgmr.msrb.gmra.mxu3 %v6372_v17 }
 0x127   : > { %1412 = vmatpush.msra.mxu0 %v1219_v37  ;;  %v6702_v40 = vand.u32 4294901760, %v1547_v27  ;;  %1359 = vmatpush.msrb.mxu2 %v6663_v24 }
 0x128   : > { %1288 = vmatpush.msrb.mxu1 %v1287_v45  ;;  %1362 = vmatmul.f32.vlgmr.msrb.gmra.mxu2 %v6351_v10 }
 0x129   : > { %1416 = vmatpush.msra.mxu0 %v1225_v22  ;;  %v6708_v37 = vsub.f32 %v1547_v27, %v6702_v40  ;;  %1549 = vmatpush.msra.mxu2 %v6702_v40 }
 0x12a   : > { %1294 = vmatpush.msrb.mxu1 %v1293_v51 }
 0x12b   : > { %1420 = vmatpush.msra.mxu0 %v1231_v3  ;;  %v1591_v22 = vand.u32 4294901760, %v6708_v37 }
 0x12d   : > { %1424 = vmatpush.msra.mxu0 %v1237_v28  ;;  %v1592_v10 = vsub.f32 %v6708_v37, %v1591_v22  ;;  %v1543_v28 = vld [vmem:[#allocation11 + $0xd8] sm:$0xff] }
 0x12f   : > { %v851_v33 = vpop.f32.mrf.mxu2  ;;  %1428 = vmatpush.msra.mxu0 %v1243_v46 }
 0x130   : > { %v952_v13 = vpop.f32.mrf.mxu3 }
 0x131   : > { %v953_v61 = vadd.f32 %v952_v13, %v851_v33  ;;  %v1299_v33 = vand.u32 4294901760, %v1298_v7  ;;  %v1545_v7 = vld [vmem:[#allocation11 + $0xe8] sm:$0xff]  ;;  %1432 = vmatpush.msra.mxu0 %v1249_v39 }
 0x132   : > { %v1006_v31 = vpop.f32.mrf.mxu0  ;;  %v6721_v3 = vand.u32 4294901760, %v1545_v7 }
 0x133   : > { %v1007_v21 = vadd.f32 %v1006_v31, %v953_v61  ;;  %v1546_v61 = vld [vmem:[#allocation11 + $0xf0] sm:$0xff]  ;;  %1300 = vmatpush.msrb.mxu1 %v1299_v33  ;;  %v1544_v31 = vld [vmem:[#allocation11 + $0xe0] sm:$0xff]  ;;  %v1593_v33 = vand.u32 4294901760, %v1592_v10  ;;  %1436 = vmatpush.msra.mxu0 %v1255_v23 }
 0x134   : > { %v6710_v17 = vand.u32 4294901760, %v1546_v61  ;;  %v6724_v51 = vand.u32 4294901760, %v1544_v31 }
 0x135   : > { %1306 = vmatpush.msrb.mxu1 %v1305_v60  ;;  %1594 = vmatpush.msra.mxu3 %v1593_v33 }
 0x136   : > { %v1045_v13 = vpop.f32.mrf.mxu1  ;;  %v6719_v42 = vsub.f32 %v1546_v61, %v6710_v17  ;;  %v6742_v2 = vsub.f32 %v1544_v31, %v6724_v51  ;;  %1308 = vmatmul.f32.vlgmr.msrb.gmra.mxu1 %v6327_v20  ;;  %1551 = vmatpush.msra.mxu2 %v6710_v17  ;;  %v1541_v61 = vld [vmem:[#allocation11 + $0xc8] sm:$0xff] }
 0x137   : > { %v1046_v53 = vadd.f32 %v1045_v13, %v1007_v21  ;;  %1475 = vmatpush.msra.mxu1 %v6501_v57  ;;  %v6736_v57 = vsub.f32 %v1545_v7, %v6721_v3  ;;  %v6744_v21 = vand.u32 4294901760, %v1543_v28  ;;  %v1540_v7 = vld [vmem:[#allocation11 + $0xc0] sm:$0xff]  ;;  %1440 = vmatpush.msra.mxu0 %v1261_v1 }
 0x138   : > { %v1597_v9 = vand.u32 4294901760, %v6719_v42  ;;  %v1609_v32 = vand.u32 4294901760, %v6742_v2  ;;  %1553 = vmatpush.msra.mxu2 %v6721_v3  ;;  %v6790_v10 = vand.u32 4294901760, %v1540_v7 }
 0x139   : > { %v1114_v12 = vpop.f32.mrf.mxu2  ;;  %1477 = vmatpush.msra.mxu1 %v6507_v38  ;;  %v1603_v27 = vand.u32 4294901760, %v6736_v57  ;;  %v1542_v38 = vld [vmem:[#allocation11 + $0xd0] sm:$0xff]  ;;  %v6757_v46 = vsub.f32 %v1543_v28, %v6744_v21  ;;  %1444 = vmatpush.msra.mxu0 %v1267_v4 }
 0x13a   : > { %v1115_v56 = vadd.f32 %v1114_v12, %v1046_v53  ;;  %v1598_v13 = vsub.f32 %v6719_v42, %v1597_v9  ;;  %v6759_v53 = vand.u32 4294901760, %v1542_v38  ;;  %1555 = vmatpush.msra.mxu2 %v6724_v51 }
 0x13b   : > { %v1151_v45 = vpop.f32.mrf.mxu3  ;;  %1479 = vmatpush.msra.mxu1 %v6512_v63  ;;  %v1604_v12 = vsub.f32 %v6736_v57, %v1603_v27  ;;  %v1610_v63 = vsub.f32 %v6742_v2, %v1609_v32  ;;  %v1615_v47 = vand.u32 4294901760, %v6757_v46  ;;  %1448 = vmatpush.msra.mxu0 %v1273_v30 }
 0x13c   : > { %v6713_v36 = vadd.f32 %v1151_v45, %v1115_v56  ;;  %v1599_v60 = vand.u32 4294901760, %v1598_v13  ;;  %v6773_v39 = vsub.f32 %v1542_v38, %v6759_v53  ;;  %v6775_v56 = vand.u32 4294901760, %v1541_v61  ;;  %1557 = vmatpush.msra.mxu2 %v6744_v21  ;;  %v1538_v38 = vld [vmem:[#allocation11 + $0xb0] sm:$0xff] }
 0x13d   : > { %1481 = vmatpush.msra.mxu1 %v6524_v34  ;;  %v1605_v45 = vand.u32 4294901760, %v1604_v12  ;;  %v1611_v34 = vand.u32 4294901760, %v1610_v63  ;;  %v1616_v19 = vsub.f32 %v6757_v46, %v1615_v47  ;;  %v6802_v13 = vsub.f32 %v1540_v7, %v6790_v10  ;;  %1452 = vmatpush.msra.mxu0 %v1279_v49  ;;  %v1536_v7 = vld [vmem:[#allocation11 + $0xa0] sm:$0xff] }
 0x13e   : > { %2592 = vrot.lane.b32.xlu1 %v6713_v36, %s5772_s2  ;;  %1528 = vrot.lane.b32.xlu0 %v6713_v36, %s5773_s13  ;;  %v1621_v23 = vand.u32 4294901760, %v6773_v39  ;;  %v6786_v31 = vsub.f32 %v1541_v61, %v6775_v56  ;;  %v1537_v61 = vld [vmem:[#allocation11 + $0xa8] sm:$0xff] }
 0x13f   : > { %1600 = vmatpush.msra.mxu3 %v1599_v60  ;;  %1483 = vmatpush.msra.mxu1 %v6536_v5  ;;  %v1539_v5 = vld [vmem:[#allocation11 + $0xb8] sm:$0xff]  ;;  %v1617_v43 = vand.u32 4294901760, %v1616_v19  ;;  %v6814_v60 = vand.u32 4294901760, %v1538_v38  ;;  %v1633_v12 = vand.u32 4294901760, %v6802_v13  ;;  %v6825_v63 = vand.u32 4294901760, %v1537_v61 }
 0x140   : > { %v1622_v1 = vsub.f32 %v6773_v39, %v1621_v23  ;;  %v1627_v28 = vand.u32 4294901760, %v6786_v31  ;;  %v6799_v33 = vand.u32 4294901760, %v1539_v5  ;;  %1559 = vmatpush.msra.mxu2 %v6759_v53  ;;  %1456 = vmatpush.msra.mxu0 %v1285_v8 }
 0x141   : > { %1606 = vmatpush.msra.mxu3 %v1605_v45  ;;  %1485 = vmatpush.msra.mxu1 %v6549_v52  ;;  %v6823_v30 = vsub.f32 %v1538_v38, %v6814_v60  ;;  %v1634_v45 = vsub.f32 %v6802_v13, %v1633_v12  ;;  %v6839_v49 = vsub.f32 %v1537_v61, %v6825_v63  ;;  %v1534_v38 = vld [vmem:[#allocation11 + $0x90] sm:$0xff]  ;;  %v1533_v61 = vld [vmem:[#allocation11 + $0x88] sm:$0xff] }
 0x142   : > { %v1623_v52 = vand.u32 4294901760, %v1622_v1  ;;  %v1628_v48 = vsub.f32 %v6786_v31, %v1627_v28  ;;  %v6812_v4 = vsub.f32 %v1539_v5, %v6799_v33  ;;  %1561 = vmatpush.msra.mxu2 %v6775_v56  ;;  %v1535_v5 = vld [vmem:[#allocation11 + $0x98] sm:$0xff]  ;;  %1460 = vmatpush.msra.mxu0 %v1291_v62 }
 0x143   : > { %1612 = vmatpush.msra.mxu3 %v1611_v34  ;;  %1487 = vmatpush.msra.mxu1 %v6559_v18  ;;  %v1645_v50 = vand.u32 4294901760, %v6823_v30  ;;  %v6841_v34 = vand.u32 4294901760, %v1536_v7  ;;  %v1635_v19 = vand.u32 4294901760, %v1634_v45  ;;  %v1651_v8 = vand.u32 4294901760, %v6839_v49 }
 0x144   : > { %v1629_v18 = vand.u32 4294901760, %v1628_v48  ;;  %v1639_v0 = vand.u32 4294901760, %v6812_v4  ;;  %1563 = vmatpush.msra.mxu2 %v6790_v10  ;;  %v6855_v1 = vand.u32 4294901760, %v1535_v5  ;;  %1464 = vmatpush.msra.mxu0 %v1297_v29 }
 0x145   : > { %1618 = vmatpush.msra.mxu3 %v1617_v43  ;;  %1489 = vmatpush.msra.mxu1 %v6574_v35  ;;  %v1646_v25 = vsub.f32 %v6823_v30, %v1645_v50  ;;  %v6852_v43 = vsub.f32 %v1536_v7, %v6841_v34  ;;  %v1652_v58 = vsub.f32 %v6839_v49, %v1651_v8  ;;  %v1532_v7 = vld [vmem:[#allocation11 + $0x80] sm:$0xff] }
 0x146   : > { %2230 = vrot.lane.b32.xlu0 %v6713_v36, %s5774_s19  ;;  %v1640_v35 = vsub.f32 %v6812_v4, %v1639_v0  ;;  %1565 = vmatpush.msra.mxu2 %v6799_v33  ;;  %v6867_v48 = vsub.f32 %v1535_v5, %v6855_v1 }
 0x147   : > { %1624 = vmatpush.msra.mxu3 %v1623_v52  ;;  %1491 = vmatpush.msra.mxu1 %v6586_v41  ;;  %v1657_v62 = vand.u32 4294901760, %v6852_v43  ;;  %v6864_v52 = vand.u32 4294901760, %v1534_v38 }
 0x148   : > { %v1641_v41 = vand.u32 4294901760, %v1640_v35  ;;  %1567 = vmatpush.msra.mxu2 %v6814_v60  ;;  %1468 = vmatpush.msra.mxu0 %v1303_v15  ;;  %v1663_v45 = vand.u32 4294901760, %v6867_v48  ;;  %v6889_v35 = vand.u32 4294901760, %v1532_v7 }
 0x149   : > { %1630 = vmatpush.msra.mxu3 %v1629_v18  ;;  %1493 = vmatpush.msra.mxu1 %v6596_v26  ;;  %v1647_v26 = vand.u32 4294901760, %v1646_v25  ;;  %v1658_v11 = vsub.f32 %v6852_v43, %v1657_v62  ;;  %v6877_v29 = vsub.f32 %v1534_v38, %v6864_v52  ;;  %v6879_v18 = vand.u32 4294901760, %v1533_v61 }
 0x14a   : > { %1692 = vmatpush.msrb.mxu0 %v6708_v37  ;;  %1569 = vmatpush.msra.mxu2 %v6825_v63  ;;  %v1524_v37 = vld [vmem:[#allocation11 + $0x60] sm:$0xff] }
 0x14b   : > { %1636 = vmatpush.msra.mxu3 %v1635_v19  ;;  %1495 = vmatpush.msra.mxu1 %v6606_v6  ;;  %v1653_v6 = vand.u32 4294901760, %v1652_v58  ;;  %v1669_v24 = vand.u32 4294901760, %v6877_v29  ;;  %v6887_v15 = vsub.f32 %v1533_v61, %v6879_v18  ;;  %v1664_v19 = vsub.f32 %v6867_v48, %v1663_v45 }
 0x14c   : > { %1470 = vmatmul.f32.vlgmr.msra.gmra.mxu0 %v6327_v20  ;;  %1571 = vmatpush.msra.mxu2 %v6841_v34 }
 0x14d   : > { %1642 = vmatpush.msra.mxu3 %v1641_v41  ;;  %1497 = vmatpush.msra.mxu1 %v6615_v55  ;;  %v1659_v55 = vand.u32 4294901760, %v1658_v11  ;;  %v1675_v5 = vand.u32 4294901760, %v6887_v15  ;;  %v6902_v41 = vsub.f32 %v1532_v7, %v6889_v35  ;;  %v1665_v25 = vand.u32 4294901760, %v1664_v19 }
 0x14e   : > { %1695 = vmatpush.msrb.mxu0 %v6719_v42  ;;  %1573 = vmatpush.msra.mxu2 %v6855_v1 }
 0x14f   : > { %1648 = vmatpush.msra.mxu3 %v1647_v26  ;;  %1499 = vmatpush.msra.mxu1 %v6617_v44  ;;  %v1670_v44 = vsub.f32 %v6877_v29, %v1669_v24  ;;  %v1681_v26 = vand.u32 4294901760, %v6902_v41 }
 0x150   : > { %1698 = vmatpush.msrb.mxu0 %v6736_v57  ;;  %1575 = vmatpush.msra.mxu2 %v6864_v52 }
 0x151   : > { %1654 = vmatpush.msra.mxu3 %v1653_v6  ;;  %1501 = vmatpush.msra.mxu1 %v6619_v16  ;;  %v1671_v38 = vand.u32 4294901760, %v1670_v44  ;;  %v1676_v16 = vsub.f32 %v6887_v15, %v1675_v5  ;;  %v1682_v61 = vsub.f32 %v6902_v41, %v1681_v26 }
 0x152   : > { %1701 = vmatpush.msrb.mxu0 %v6742_v2  ;;  %1577 = vmatpush.msra.mxu2 %v6879_v18  ;;  %v1522_v2 = vld [vmem:[#allocation11 + $0x50] sm:$0xff] }
 0x153   : > { %1660 = vmatpush.msra.mxu3 %v1659_v55  ;;  %1503 = vmatpush.msra.mxu1 %v6630_v54  ;;  %v1677_v58 = vand.u32 4294901760, %v1676_v16  ;;  %v1683_v54 = vand.u32 4294901760, %v1682_v61 }
 0x154   : > { %1704 = vmatpush.msrb.mxu0 %v6757_v46  ;;  %1579 = vmatpush.msra.mxu2 %v6889_v35  ;;  %v1521_v46 = vld [vmem:[#allocation11 + $0x48] sm:$0xff] }
 0x155   : > { %1666 = vmatpush.msra.mxu3 %v1665_v25  ;;  %1505 = vmatpush.msra.mxu1 %v6648_v59  ;;  %v1526_v59 = vld [vmem:[#allocation11 + $0x70] sm:$0xff] }
 0x156   : > { %1507 = vmatmul.f32.vlgmr.msra.gmra.mxu1 %v6327_v20  ;;  %1707 = vmatpush.msrb.mxu0 %v6773_v39  ;;  %v1527_v20 = vld [vmem:[#allocation11 + $0x78] sm:$0xff] }
 0x157   : > { %1745 = vmatpush.msrb.mxu1 %v6702_v40  ;;  %1672 = vmatpush.msra.mxu3 %v1671_v38  ;;  %v6937_v6 = vand.u32 4294901760, %v1527_v20 }
 0x158   : > { %1710 = vmatpush.msrb.mxu0 %v6786_v31  ;;  %1786 = vmatpush.msrb.mxu2 %v1591_v22 }
 0x159   : > { %1747 = vmatpush.msrb.mxu1 %v6710_v17  ;;  %1678 = vmatpush.msra.mxu3 %v1677_v58  ;;  %v6954_v42 = vsub.f32 %v1527_v20, %v6937_v6 }
 0x15a   : > { %1713 = vmatpush.msrb.mxu0 %v6802_v13  ;;  %1790 = vmatpush.msrb.mxu2 %v1597_v9  ;;  %v1518_v13 = vld [vmem:[#allocation11 + $0x30] sm:$0xff] }
 0x15b   : > { %1749 = vmatpush.msrb.mxu1 %v6721_v3  ;;  %1684 = vmatpush.msra.mxu3 %v1683_v54  ;;  %v7043_v61 = vand.u32 4294901760, %v1518_v13  ;;  %v1516_v54 = vld [vmem:[#allocation11 + $0x20] sm:$0xff] }
 0x15c   : > { %1716 = vmatpush.msrb.mxu0 %v6812_v4  ;;  %1794 = vmatpush.msrb.mxu2 %v1603_v27  ;;  %v1517_v4 = vld [vmem:[#allocation11 + $0x28] sm:$0xff] }
 0x15d   : > { %1751 = vmatpush.msrb.mxu1 %v6724_v51  ;;  %1853 = vmatpush.msrb.mxu3 %v6702_v40  ;;  %v1525_v40 = vld [vmem:[#allocation11 + $0x68] sm:$0xff] }
 0x15e   : > { %1719 = vmatpush.msrb.mxu0 %v6823_v30  ;;  %v6951_v22 = vand.u32 4294901760, %v1525_v40  ;;  %1798 = vmatpush.msrb.mxu2 %v1609_v32 }
 0x15f   : > { %1753 = vmatpush.msrb.mxu1 %v6744_v21  ;;  %1855 = vmatpush.msrb.mxu3 %v6710_v17  ;;  %v6944_v17 = vand.u32 4294901760, %v1526_v59 }
 0x160   : > { %1722 = vmatpush.msrb.mxu0 %v6839_v49  ;;  %1802 = vmatpush.msrb.mxu2 %v1615_v47  ;;  %v6972_v57 = vsub.f32 %v1525_v40, %v6951_v22  ;;  %v6986_v47 = vand.u32 4294901760, %v1522_v2  ;;  %v7068_v40 = vsub.f32 %v1518_v13, %v7043_v61 }
 0x161   : > { %1755 = vmatpush.msrb.mxu1 %v6759_v53  ;;  %1857 = vmatpush.msrb.mxu3 %v6721_v3  ;;  %v6961_v3 = vand.u32 4294901760, %v1524_v37  ;;  %v6964_v9 = vsub.f32 %v1526_v59, %v6944_v17 }
 0x162   : > { %1725 = vmatpush.msrb.mxu0 %v6852_v43  ;;  %1806 = vmatpush.msrb.mxu2 %v1621_v23  ;;  %v1944_v39 = vand.u32 4294901760, %v6972_v57  ;;  %v7013_v55 = vsub.f32 %v1522_v2, %v6986_v47 }
 0x163   : > { %1757 = vmatpush.msrb.mxu1 %v6775_v56  ;;  %1859 = vmatpush.msrb.mxu3 %v6724_v51  ;;  %v1523_v51 = vld [vmem:[#allocation11 + $0x58] sm:$0xff]  ;;  %v6983_v32 = vsub.f32 %v1524_v37, %v6961_v3  ;;  %v7070_v37 = vand.u32 4294901760, %v1516_v54 }
 0x164   : > { %1728 = vmatpush.msrb.mxu0 %v6867_v48  ;;  %v6975_v27 = vand.u32 4294901760, %v1523_v51  ;;  %1810 = vmatpush.msrb.mxu2 %v1627_v28  ;;  %v1519_v28 = vld [vmem:[#allocation11 + $0x38] sm:$0xff]  ;;  %v1962_v16 = vand.u32 4294901760, %v7013_v55 }
 0x165   : > { %1759 = vmatpush.msrb.mxu1 %v6790_v10  ;;  %1861 = vmatpush.msrb.mxu3 %v6744_v21  ;;  %v1932_v21 = vand.u32 4294901760, %v6954_v42  ;;  %v1950_v31 = vand.u32 4294901760, %v6983_v32  ;;  %v7029_v38 = vand.u32 4294901760, %v1519_v28  ;;  %v7092_v2 = vsub.f32 %v1516_v54, %v7070_v37 }
 0x166   : > { %1731 = vmatpush.msrb.mxu0 %v6877_v29  ;;  %v6999_v11 = vsub.f32 %v1523_v51, %v6975_v27  ;;  %1814 = vmatpush.msrb.mxu2 %v1633_v12  ;;  %v1963_v49 = vsub.f32 %v7013_v55, %v1962_v16 }
 0x167   : > { %1761 = vmatpush.msrb.mxu1 %v6799_v33  ;;  %1863 = vmatpush.msrb.mxu3 %v6759_v53  ;;  %v1938_v53 = vand.u32 4294901760, %v6964_v9  ;;  %v1933_v23 = vsub.f32 %v6954_v42, %v1932_v21  ;;  %v7055_v20 = vsub.f32 %v1519_v28, %v7029_v38 }
 0x168   : > { %1734 = vmatpush.msrb.mxu0 %v6887_v15  ;;  %1818 = vmatpush.msrb.mxu2 %v1639_v0  ;;  %v1956_v44 = vand.u32 4294901760, %v6999_v11 }
 0x169   : > { %1763 = vmatpush.msrb.mxu1 %v6814_v60  ;;  %1865 = vmatpush.msrb.mxu3 %v6775_v56  ;;  %v1520_v56 = vld [vmem:[#allocation11 + $0x40] sm:$0xff]  ;;  %v1939_v7 = vsub.f32 %v6964_v9, %v1938_v53  ;;  %v1934_v12 = vand.u32 4294901760, %v1933_v23 }
 0x16a   : > { %1737 = vmatpush.msrb.mxu0 %v6902_v41  ;;  %v7015_v19 = vand.u32 4294901760, %v1520_v56  ;;  %1822 = vmatpush.msrb.mxu2 %v1645_v50  ;;  %v1957_v30 = vsub.f32 %v6999_v11, %v1956_v44 }
 0x16b   : > { %1765 = vmatpush.msrb.mxu1 %v6825_v63  ;;  %1867 = vmatpush.msrb.mxu3 %v6790_v10  ;;  %v7001_v10 = vand.u32 4294901760, %v1521_v46  ;;  %v1940_v0 = vand.u32 4294901760, %v1939_v7  ;;  %v1514_v7 = vld [vmem:[#allocation11 + $0x10] sm:$0xff] }
 0x16c   : > { %1890 = vmatpush.msra.mxu0 %v6937_v6  ;;  %v7041_v58 = vsub.f32 %v1520_v56, %v7015_v19  ;;  %1826 = vmatpush.msrb.mxu2 %v1651_v8  ;;  %v1958_v43 = vand.u32 4294901760, %v1957_v30 }
 0x16d   : > { %1767 = vmatpush.msrb.mxu1 %v6841_v34  ;;  %1869 = vmatpush.msrb.mxu3 %v6799_v33  ;;  %v1945_v33 = vsub.f32 %v6972_v57, %v1944_v39  ;;  %v7027_v25 = vsub.f32 %v1521_v46, %v7001_v10  ;;  %v1515_v46 = vld [vmem:[#allocation11 + $0x18] sm:$0xff] }
 0x16e   : > { %1892 = vmatpush.msra.mxu0 %v6944_v17  ;;  %1830 = vmatpush.msrb.mxu2 %v1657_v62  ;;  %v1974_v8 = vand.u32 4294901760, %v7041_v58  ;;  %v1980_v62 = vand.u32 4294901760, %v7055_v20 }
 0x16f   : > { %1769 = vmatpush.msrb.mxu1 %v6855_v1  ;;  %1871 = vmatpush.msrb.mxu3 %v6814_v60  ;;  %v1951_v60 = vsub.f32 %v6983_v32, %v1950_v31  ;;  %v1968_v50 = vand.u32 4294901760, %v7027_v25 }
 0x170   : > { %1894 = vmatpush.msra.mxu0 %v6951_v22  ;;  %1834 = vmatpush.msrb.mxu2 %v1663_v45  ;;  %v1975_v48 = vsub.f32 %v7041_v58, %v1974_v8  ;;  %v1986_v45 = vand.u32 4294901760, %v7068_v40 }
 0x171   : > { %1771 = vmatpush.msrb.mxu1 %v6864_v52  ;;  %1873 = vmatpush.msrb.mxu3 %v6825_v63  ;;  %v1946_v63 = vand.u32 4294901760, %v1945_v33  ;;  %v1952_v59 = vand.u32 4294901760, %v1951_v60  ;;  %v7119_v33 = vand.u32 4294901760, %v1514_v7  ;;  %v1513_v60 = vld [vmem:[#allocation11 + $0x8] sm:$0xff] }
 0x172   : > { %1896 = vmatpush.msra.mxu0 %v6961_v3  ;;  %1838 = vmatpush.msrb.mxu2 %v1669_v24  ;;  %v1976_v56 = vand.u32 4294901760, %v1975_v48  ;;  %v1987_v15 = vsub.f32 %v7068_v40, %v1986_v45 }
 0x173   : > { %1773 = vmatpush.msrb.mxu1 %v6879_v18  ;;  %1875 = vmatpush.msrb.mxu3 %v6841_v34  ;;  %v7057_v34 = vand.u32 4294901760, %v1517_v4 }
 0x174   : > { %1898 = vmatpush.msra.mxu0 %v6975_v27  ;;  %1842 = vmatpush.msrb.mxu2 %v1675_v5  ;;  %v7109_v5 = vand.u32 4294901760, %v1515_v46 }
 0x175   : > { %1775 = vmatpush.msrb.mxu1 %v6889_v35  ;;  %1877 = vmatpush.msrb.mxu3 %v6855_v1  ;;  %v1969_v1 = vsub.f32 %v7027_v25, %v1968_v50  ;;  %v7081_v51 = vsub.f32 %v1517_v4, %v7057_v34 }
 0x176   : > { %1900 = vmatpush.msra.mxu0 %v6986_v47  ;;  %1846 = vmatpush.msrb.mxu2 %v1681_v26  ;;  %v1988_v26 = vand.u32 4294901760, %v1987_v15  ;;  %v7122_v13 = vsub.f32 %v1515_v46, %v7109_v5 }
 0x177   : > { %1935 = vmatpush.msra.mxu1 %v1934_v12  ;;  %1879 = vmatpush.msrb.mxu3 %v6864_v52  ;;  %v1964_v52 = vand.u32 4294901760, %v1963_v49  ;;  %v1970_v29 = vand.u32 4294901760, %v1969_v1  ;;  %v1992_v24 = vand.u32 4294901760, %v7081_v51  ;;  %v1512_v49 = vld [vmem:[#allocation11] sm:$0xff] }
 0x178   : > { %1902 = vmatpush.msra.mxu0 %v7001_v10  ;;  %v2004_v4 = vand.u32 4294901760, %v7122_v13 }
 0x179   : > { %1941 = vmatpush.msra.mxu1 %v1940_v0  ;;  %1881 = vmatpush.msrb.mxu3 %v6879_v18  ;;  %v1981_v18 = vsub.f32 %v7055_v20, %v1980_v62  ;;  %v1993_v41 = vsub.f32 %v7081_v51, %v1992_v24  ;;  %v7126_v0 = vand.u32 4294901760, %v1513_v60 }
 0x17a   : > { %1904 = vmatpush.msra.mxu0 %v7015_v19  ;;  %v2005_v30 = vsub.f32 %v7122_v13, %v2004_v4 }
 0x17b   : > { %1947 = vmatpush.msra.mxu1 %v1946_v63  ;;  %1883 = vmatpush.msrb.mxu3 %v6889_v35  ;;  %v1998_v35 = vand.u32 4294901760, %v7092_v2  ;;  %v1982_v23 = vand.u32 4294901760, %v1981_v18  ;;  %v1994_v12 = vand.u32 4294901760, %v1993_v41  ;;  %v7129_v63 = vsub.f32 %v1514_v7, %v7119_v33 }
 0x17c   : > { %1906 = vmatpush.msra.mxu0 %v7029_v38  ;;  %v7140_v1 = vsub.f32 %v1513_v60, %v7126_v0 }
 0x17d   : > { %1953 = vmatpush.msra.mxu1 %v1952_v59  ;;  %v1999_v28 = vsub.f32 %v7092_v2, %v1998_v35  ;;  %v2010_v59 = vand.u32 4294901760, %v7129_v63 }
 0x17e   : > { %1908 = vmatpush.msra.mxu0 %v7043_v61 }
 0x17f   : > { %1959 = vmatpush.msra.mxu1 %v1958_v43  ;;  %v2000_v54 = vand.u32 4294901760, %v1999_v28  ;;  %v7137_v43 = vand.u32 4294901760, %v1512_v49  ;;  %v2011_v48 = vsub.f32 %v7129_v63, %v2010_v59  ;;  %v1511_v28 = vmul.f32 %v6713_v36, %v6539_v14 }
 0x180   : > { %1910 = vmatpush.msra.mxu0 %v7057_v34 }
 0x181   : > { %1965 = vmatpush.msra.mxu1 %v1964_v52  ;;  %v2006_v52 = vand.u32 4294901760, %v2005_v30  ;;  %v7148_v18 = vsub.f32 %v1512_v49, %v7137_v43  ;;  %v2012_v46 = vand.u32 4294901760, %v2011_v48  ;;  %v7159_v7 = vand.u32 4294901760, %v1511_v28 }
 0x182   : > { %1912 = vmatpush.msra.mxu0 %v7070_v37 }
 0x183   : > { %1971 = vmatpush.msra.mxu1 %v1970_v29  ;;  %v2016_v29 = vand.u32 4294901760, %v7140_v1  ;;  %v2022_v15 = vand.u32 4294901760, %v7148_v18 }
 0x184   : > { %1914 = vmatpush.msra.mxu0 %v7109_v5 }
 0x185   : > { %1977 = vmatpush.msra.mxu1 %v1976_v56  ;;  %v2017_v56 = vsub.f32 %v7140_v1, %v2016_v29  ;;  %v2023_v41 = vsub.f32 %v7148_v18, %v2022_v15 }
 0x186   : > { %1916 = vmatpush.msra.mxu0 %v7119_v33 }
 0x187   : > { %1983 = vmatpush.msra.mxu1 %v1982_v23  ;;  %v2018_v23 = vand.u32 4294901760, %v2017_v56 }
 0x188   : > { %1918 = vmatpush.msra.mxu0 %v7126_v0 }
 0x189   : > { %1989 = vmatpush.msra.mxu1 %v1988_v26  ;;  %v2024_v26 = vand.u32 4294901760, %v2023_v41  ;;  %v2239_v41 = vld [vmem:[#allocation11 + $0x128] sm:$0xff] }
 0x18a   : > { %1920 = vmatpush.msra.mxu0 %v7137_v43 }
 0x18b   : > { %1995 = vmatpush.msra.mxu1 %v1994_v12 }
 0x18d   : > { %2001 = vmatpush.msra.mxu1 %v2000_v54  ;;  %v7163_v54 = vsub.f32 %v1511_v28, %v7159_v7 }
 0x18f   : > { %2007 = vmatpush.msra.mxu1 %v2006_v52  ;;  %v1923_v52 = vand.u32 4294901760, %v7163_v54 }
 0x191   : > { %2013 = vmatpush.msra.mxu1 %v2012_v46  ;;  %v1924_v46 = vsub.f32 %v7163_v54, %v1923_v52 }
 0x193   : > { %2019 = vmatpush.msra.mxu1 %v2018_v23 }
 0x195   : > { %2025 = vmatpush.msra.mxu1 %v2024_v26 }
 0x1b0   : > { %v1529_v12 = vpop.permute.xlu0 %1528 }
 0x1b1   : > { %v1530_v60 = vmul.f32 %v1529_v12, %v6539_v14  ;;  %v2238_v12 = vld [vmem:[#allocation11 + $0x120] sm:$0xff] }
 0x1b3   : > { %v1580_v30 = vand.u32 4294901760, %v1530_v60 }
 0x1b5   : > { %v1581_v49 = vsub.f32 %v1530_v60, %v1580_v30  ;;  %1686 = vmatmul.f32.vlgmr.msra.gmra.mxu3 %v1580_v30  ;;  %v7318_v60 = vand.u32 4294901760, %v2239_v41 }
 0x1b6   : > { %2086 = vmatpush.msra.mxu3 %v6937_v6 }
 0x1b7   : > { %v1582_v48 = vand.u32 4294901760, %v1581_v49  ;;  %1740 = vmatmul.f32.vlgmr.msrb.gmra.mxu0 %v1581_v49 }
 0x1b8   : > { %2088 = vmatpush.msra.mxu3 %v6944_v17  ;;  %2127 = vmatpush.msrb.mxu0 %v1932_v21  ;;  %v1925_v21 = vand.u32 4294901760, %v1924_v46 }
 0x1b9   : > { %v1583_v36 = vsub.f32 %v1581_v49, %v1582_v48  ;;  %1779 = vmatmul.f32.vlgmr.msrb.gmra.mxu1 %v1582_v48  ;;  %v2237_v49 = vld [vmem:[#allocation11 + $0x118] sm:$0xff]  ;;  %v7330_v48 = vand.u32 4294901760, %v2238_v12 }
 0x1ba   : > { %2090 = vmatpush.msra.mxu3 %v6951_v22  ;;  %2131 = vmatpush.msrb.mxu0 %v1938_v53 }
 0x1bb   : > { %2194 = vmatpush.msrb.mxu1 %v6937_v6  ;;  %v1584_v56 = vand.u32 4294901760, %v1583_v36  ;;  %v2249_v6 = vld [vmem:[#allocation11 + $0x178] sm:$0xff] }
 0x1bc   : > { %2092 = vmatpush.msra.mxu3 %v6961_v3  ;;  %2135 = vmatpush.msrb.mxu0 %v1944_v39 }
 0x1bd   : > { %2196 = vmatpush.msrb.mxu1 %v6944_v17  ;;  %1585 = vmatmul.f32.vlgmr.msra.gmra.mxu2 %v1584_v56  ;;  %v2248_v17 = vld [vmem:[#allocation11 + $0x170] sm:$0xff]  ;;  %v7340_v56 = vsub.f32 %v2239_v41, %v7318_v60 }
 0x1be   : > { %1885 = vmatmul.f32.vlgmr.msrb.gmra.mxu3 %v1580_v30  ;;  %2033 = vmatpush.msra.mxu2 %v6954_v42  ;;  %v2247_v42 = vld [vmem:[#allocation11 + $0x168] sm:$0xff] }
 0x1bf   : > { %2094 = vmatpush.msra.mxu3 %v6975_v27  ;;  %2139 = vmatpush.msrb.mxu0 %v1950_v31  ;;  %v2244_v31 = vld [vmem:[#allocation11 + $0x150] sm:$0xff] }
 0x1c0   : > { %2198 = vmatpush.msrb.mxu1 %v6951_v22  ;;  %1926 = vmatmul.f32.vlgmr.msra.gmra.mxu0 %v1925_v21  ;;  %v7198_v22 = vand.u32 4294901760, %v2249_v6  ;;  %v7342_v21 = vand.u32 4294901760, %v2237_v49 }
 0x1c1   : > { %2036 = vmatpush.msra.mxu2 %v6964_v9  ;;  %2096 = vmatpush.msra.mxu3 %v6986_v47  ;;  %v2246_v9 = vld [vmem:[#allocation11 + $0x160] sm:$0xff] }
 0x1c2   : > { %2143 = vmatpush.msrb.mxu0 %v1956_v44  ;;  %2200 = vmatpush.msrb.mxu1 %v6961_v3  ;;  %v7204_v3 = vand.u32 4294901760, %v2248_v17 }
 0x1c3   : > { %2027 = vmatmul.f32.vlgmr.msra.gmra.mxu1 %v7159_v7  ;;  %2039 = vmatpush.msra.mxu2 %v6972_v57  ;;  %v7212_v57 = vsub.f32 %v2249_v6, %v7198_v22  ;;  %v2235_v6 = vld [vmem:[#allocation11 + $0x108] sm:$0xff] }
 0x1c4   : > { %2098 = vmatpush.msra.mxu3 %v7001_v10  ;;  %2147 = vmatpush.msrb.mxu0 %v1962_v16  ;;  %v7222_v53 = vsub.f32 %v2248_v17, %v7204_v3 }
 0x1c5   : > { %2202 = vmatpush.msrb.mxu1 %v6975_v27  ;;  %2042 = vmatpush.msra.mxu2 %v6983_v32  ;;  %v7214_v27 = vand.u32 4294901760, %v2247_v42  ;;  %v2245_v32 = vld [vmem:[#allocation11 + $0x158] sm:$0xff]  ;;  %v9344_v39 = vand.u32 4294901760, %v7212_v57 }
 0x1c6   : > { %2100 = vmatpush.msra.mxu3 %v7015_v19  ;;  %2151 = vmatpush.msrb.mxu0 %v1968_v50 }
 0x1c7   : > { %2204 = vmatpush.msrb.mxu1 %v6986_v47  ;;  %1848 = vmatmul.f32.vlgmr.msrb.gmra.mxu2 %v1580_v30  ;;  %v7224_v47 = vand.u32 4294901760, %v2246_v9  ;;  %v2294_v16 = vsub.f32 %v7212_v57, %v9344_v39  ;;  %v2602_v39 = vld [vmem:[#allocation11 + $0x1b0] sm:$0xff] }
 0x1c8   : > { %2045 = vmatpush.msra.mxu2 %v6999_v11  ;;  %2102 = vmatpush.msra.mxu3 %v7029_v38  ;;  %v7233_v11 = vsub.f32 %v2247_v42, %v7214_v27 }
 0x1c9   : > { %2155 = vmatpush.msrb.mxu0 %v1974_v8  ;;  %2206 = vmatpush.msrb.mxu1 %v7001_v10  ;;  %v7235_v10 = vand.u32 4294901760, %v2245_v32  ;;  %v7244_v44 = vsub.f32 %v2246_v9, %v7224_v47  ;;  %v7352_v9 = vsub.f32 %v2238_v12, %v7330_v48 }
 0x1ca   : > { %2048 = vmatpush.msra.mxu2 %v7013_v55  ;;  %2104 = vmatpush.msra.mxu3 %v7043_v61  ;;  %v2243_v55 = vld [vmem:[#allocation11 + $0x148] sm:$0xff] }
 0x1cb   : > { %2159 = vmatpush.msrb.mxu0 %v1980_v62  ;;  %2208 = vmatpush.msrb.mxu1 %v7015_v19  ;;  %v9343_v19 = vand.u32 4294901760, %v7222_v53  ;;  %v7260_v50 = vand.u32 4294901760, %v2243_v55  ;;  %v2241_v62 = vld [vmem:[#allocation11 + $0x138] sm:$0xff] }
 0x1cc   : > { %2051 = vmatpush.msra.mxu2 %v7027_v25  ;;  %2106 = vmatpush.msra.mxu3 %v7057_v34  ;;  %v7248_v25 = vand.u32 4294901760, %v2244_v31 }
 0x1cd   : > { %2163 = vmatpush.msrb.mxu0 %v1986_v45  ;;  %2210 = vmatpush.msrb.mxu1 %v7029_v38  ;;  %v2242_v38 = vld [vmem:[#allocation11 + $0x140] sm:$0xff] }
 0x1ce   : > { %2054 = vmatpush.msra.mxu2 %v7041_v58  ;;  %2108 = vmatpush.msra.mxu3 %v7070_v37  ;;  %v9342_v58 = vand.u32 4294901760, %v7233_v11  ;;  %v7271_v8 = vand.u32 4294901760, %v2242_v38 }
 0x1cf   : > { %2167 = vmatpush.msrb.mxu0 %v1992_v24  ;;  %2212 = vmatpush.msrb.mxu1 %v7043_v61  ;;  %v7258_v61 = vsub.f32 %v2245_v32, %v7235_v10 }
 0x1d0   : > { %2057 = vmatpush.msra.mxu2 %v7055_v20  ;;  %2110 = vmatpush.msra.mxu3 %v7109_v5  ;;  %v2300_v20 = vsub.f32 %v7222_v53, %v9343_v19  ;;  %v2306_v45 = vsub.f32 %v7233_v11, %v9342_v58  ;;  %v7299_v23 = vsub.f32 %v2242_v38, %v7271_v8  ;;  %v9332_v38 = vand.u32 4294901760, %v7340_v56 }
 0x1d1   : > { %2171 = vmatpush.msrb.mxu0 %v1998_v35  ;;  %2214 = vmatpush.msrb.mxu1 %v7057_v34  ;;  %v9340_v34 = vand.u32 4294901760, %v7244_v44  ;;  %v9339_v24 = vand.u32 4294901760, %v7258_v61  ;;  %v7286_v35 = vsub.f32 %v2243_v55, %v7260_v50 }
 0x1d2   : > { %2060 = vmatpush.msra.mxu2 %v7068_v40  ;;  %2112 = vmatpush.msra.mxu3 %v7119_v33  ;;  %v7276_v40 = vsub.f32 %v2244_v31, %v7248_v25  ;;  %v9335_v30 = vand.u32 4294901760, %v7299_v23  ;;  %v2234_v31 = vld [vmem:[#allocation11 + $0x100] sm:$0xff] }
 0x1d3   : > { %2175 = vmatpush.msrb.mxu0 %v2004_v4  ;;  %2216 = vmatpush.msrb.mxu1 %v7070_v37  ;;  %v2295_v37 = vand.u32 4294901760, %v2294_v16  ;;  %v7290_v4 = vand.u32 4294901760, %v2241_v62  ;;  %v9337_v28 = vand.u32 4294901760, %v7286_v35  ;;  %v7364_v16 = vsub.f32 %v2237_v49, %v7342_v21  ;;  %v2611_v49 = vld [vmem:[#allocation11 + $0x1f8] sm:$0xff] }
 0x1d4   : > { %2063 = vmatpush.msra.mxu2 %v7081_v51  ;;  %2114 = vmatpush.msra.mxu3 %v7126_v0  ;;  %v2240_v51 = vld [vmem:[#allocation11 + $0x130] sm:$0xff] }
 0x1d5   : > { %2179 = vmatpush.msrb.mxu0 %v2010_v59  ;;  %2218 = vmatpush.msrb.mxu1 %v7109_v5  ;;  %v2301_v5 = vand.u32 4294901760, %v2300_v20  ;;  %v2312_v59 = vsub.f32 %v7244_v44, %v9340_v34  ;;  %v7305_v26 = vand.u32 4294901760, %v2240_v51  ;;  %v2330_v46 = vsub.f32 %v7286_v35, %v9337_v28 }
 0x1d6   : > { %2066 = vmatpush.msra.mxu2 %v7092_v2  ;;  %2116 = vmatpush.msra.mxu3 %v7137_v43  ;;  %v9338_v2 = vand.u32 4294901760, %v7276_v40  ;;  %v7366_v20 = vand.u32 4294901760, %v2235_v6 }
 0x1d7   : > { %2183 = vmatpush.msrb.mxu0 %v2016_v29  ;;  %2220 = vmatpush.msrb.mxu1 %v7119_v33  ;;  %v2307_v33 = vand.u32 4294901760, %v2306_v45  ;;  %v2318_v29 = vsub.f32 %v7258_v61, %v9339_v24  ;;  %v7378_v45 = vand.u32 4294901760, %v2234_v31 }
 0x1d8   : > { %2120 = vmatmul.f32.vlgmr.msra.gmra.mxu3 %v1923_v52  ;;  %2069 = vmatpush.msra.mxu2 %v7122_v13  ;;  %v7316_v13 = vsub.f32 %v2241_v62, %v7290_v4  ;;  %v7328_v52 = vsub.f32 %v2240_v51, %v7305_v26  ;;  %v9331_v62 = vand.u32 4294901760, %v7352_v9  ;;  %v7388_v41 = vsub.f32 %v2235_v6, %v7366_v20 }
 0x1d9   : > { %2296 = vmatpush.msrb.mxu3 %v2295_v37  ;;  %2187 = vmatpush.msrb.mxu0 %v2022_v15  ;;  %v2313_v15 = vand.u32 4294901760, %v2312_v59  ;;  %v2319_v36 = vand.u32 4294901760, %v2318_v29  ;;  %v9330_v59 = vand.u32 4294901760, %v7364_v16 }
 0x1da   : > { %2222 = vmatpush.msrb.mxu1 %v7126_v0  ;;  %2189 = vmatmul.f32.vlgmr.msrb.gmra.mxu0 %v7159_v7  ;;  %v2324_v0 = vsub.f32 %v7276_v40, %v9338_v2  ;;  %v9333_v42 = vand.u32 4294901760, %v7328_v52  ;;  %9436 = vst [vmem:[#allocation23_spill] sm:$0xff] %v7388_v41  ;;  %v2360_v29 = vsub.f32 %v7352_v9, %v9331_v62 }
 0x1db   : > { %2302 = vmatpush.msrb.mxu3 %v2301_v5  ;;  %2394 = vmatpush.msra.mxu0 %v7212_v57  ;;  %v2354_v5 = vsub.f32 %v7340_v56, %v9332_v38 }
 0x1dc   : > { %2072 = vmatpush.msra.mxu2 %v7129_v63  ;;  %2224 = vmatpush.msrb.mxu1 %v7137_v43  ;;  %v2236_v63 = vld [vmem:[#allocation11 + $0x110] sm:$0xff]  ;;  %v9334_v43 = vand.u32 4294901760, %v7316_v13  ;;  %v2325_v17 = vand.u32 4294901760, %v2324_v0  ;;  %v2361_v6 = vand.u32 4294901760, %v2360_v29 }
 0x1dd   : > { %2226 = vmatmul.f32.vlgmr.msrb.gmra.mxu1 %v7159_v7  ;;  %2308 = vmatpush.msrb.mxu3 %v2307_v33  ;;  %v2336_v7 = vsub.f32 %v7299_v23, %v9335_v30  ;;  %v7354_v32 = vand.u32 4294901760, %v2236_v63  ;;  %v2355_v0 = vand.u32 4294901760, %v2354_v5  ;;  %v2609_v5 = vld [vmem:[#allocation11 + $0x1e8] sm:$0xff] }
 0x1de   : > { %2397 = vmatpush.msra.mxu0 %v7222_v53  ;;  %2447 = vmatpush.msra.mxu1 %v7198_v22  ;;  %v2342_v55 = vsub.f32 %v7316_v13, %v9334_v43 }
 0x1df   : > { %2075 = vmatpush.msra.mxu2 %v7140_v1  ;;  %2314 = vmatpush.msrb.mxu3 %v2313_v15  ;;  %v2331_v1 = vand.u32 4294901760, %v2330_v46  ;;  %v7376_v37 = vsub.f32 %v2236_v63, %v7354_v32  ;;  %v7398_v15 = vsub.f32 %v2234_v31, %v7378_v45  ;;  %v9327_v46 = vand.u32 4294901760, %v7388_v41  ;;  %v2231_v63 = vpop.permute.xlu0 %2230 }
 0x1e0   : > { %2400 = vmatpush.msra.mxu0 %v7233_v11  ;;  %2449 = vmatpush.msra.mxu1 %v7204_v3  ;;  %v2343_v51 = vand.u32 4294901760, %v2342_v55  ;;  %v7414_v31 = vand.u32 4294901760, %v2611_v49  ;;  %v2232_v55 = vmul.f32 %v2231_v63, %v6539_v14  ;;  %v7436_v63 = vand.u32 4294901760, %v2609_v5 }
 0x1e1   : > { %2078 = vmatpush.msra.mxu2 %v7148_v18  ;;  %2320 = vmatpush.msrb.mxu3 %v2319_v36  ;;  %v2337_v18 = vand.u32 4294901760, %v2336_v7  ;;  %v9329_v12 = vand.u32 4294901760, %v7376_v37  ;;  %9437 = vst [vmem:[#allocation25_spill] sm:$0xff] %v7398_v15  ;;  %v2366_v36 = vsub.f32 %v7364_v16, %v9330_v59  ;;  %v2610_v7 = vld [vmem:[#allocation11 + $0x1f0] sm:$0xff] }
 0x1e2   : > { %2081 = vmatmul.f32.vlgmr.msra.gmra.mxu2 %v7163_v54  ;;  %2403 = vmatpush.msra.mxu0 %v7244_v44  ;;  %v2348_v54 = vsub.f32 %v7328_v52, %v9333_v42 }
 0x1e3   : > { %2251 = vmatpush.msrb.mxu2 %v7198_v22  ;;  %2451 = vmatpush.msra.mxu1 %v7214_v27 }
 0x1e4   : > { %2326 = vmatpush.msrb.mxu3 %v2325_v17  ;;  %2406 = vmatpush.msra.mxu0 %v7258_v61  ;;  %v2349_v33 = vand.u32 4294901760, %v2348_v54  ;;  %v2372_v17 = vsub.f32 %v7376_v37, %v9329_v12  ;;  %v2378_v54 = vsub.f32 %v7388_v41, %v9327_v46  ;;  %v7438_v46 = vand.u32 4294901760, %v2232_v55 }
 0x1e5   : > { %2253 = vmatpush.msrb.mxu2 %v7204_v3  ;;  %2453 = vmatpush.msra.mxu1 %v7224_v47 }
 0x1e6   : > { %2332 = vmatpush.msrb.mxu3 %v2331_v1  ;;  %2409 = vmatpush.msra.mxu0 %v7276_v40  ;;  %v9328_v1 = vand.u32 4294901760, %v7398_v15  ;;  %v2283_v62 = vsub.f32 %v2232_v55, %v7438_v46 }
 0x1e7   : > { %2255 = vmatpush.msrb.mxu2 %v7214_v27  ;;  %2455 = vmatpush.msra.mxu1 %v7235_v10 }
 0x1e8   : > { %2338 = vmatpush.msrb.mxu3 %v2337_v18  ;;  %2412 = vmatpush.msra.mxu0 %v7286_v35  ;;  %v2367_v18 = vand.u32 4294901760, %v2366_v36  ;;  %v2384_v29 = vsub.f32 %v7398_v15, %v9328_v1  ;;  %v2608_v36 = vld [vmem:[#allocation11 + $0x1e0] sm:$0xff]  ;;  %v2607_v1 = vld [vmem:[#allocation11 + $0x1d8] sm:$0xff]  ;;  %v2284_v30 = vand.u32 4294901760, %v2283_v62 }
 0x1e9   : > { %2257 = vmatpush.msrb.mxu2 %v7224_v47  ;;  %2457 = vmatpush.msra.mxu1 %v7248_v25 }
 0x1ea   : > { %2344 = vmatpush.msrb.mxu3 %v2343_v51  ;;  %2415 = vmatpush.msra.mxu0 %v7299_v23  ;;  %v7423_v51 = vand.u32 4294901760, %v2610_v7  ;;  %v2385_v12 = vand.u32 4294901760, %v2384_v29  ;;  %v2605_v29 = vld [vmem:[#allocation11 + $0x1c8] sm:$0xff]  ;;  %v2285_v28 = vsub.f32 %v2283_v62, %v2284_v30 }
 0x1eb   : > { %2259 = vmatpush.msrb.mxu2 %v7235_v10  ;;  %2459 = vmatpush.msra.mxu1 %v7260_v50 }
 0x1ec   : > { %2350 = vmatpush.msrb.mxu3 %v2349_v33  ;;  %2418 = vmatpush.msra.mxu0 %v7316_v13  ;;  %v2373_v33 = vand.u32 4294901760, %v2372_v17  ;;  %v7442_v17 = vsub.f32 %v2610_v7, %v7423_v51  ;;  %v7453_v7 = vsub.f32 %v2609_v5, %v7436_v63  ;;  %v2604_v5 = vld [vmem:[#allocation11 + $0x1c0] sm:$0xff] }
 0x1ed   : > { %2261 = vmatpush.msrb.mxu2 %v7248_v25  ;;  %2461 = vmatpush.msra.mxu1 %v7271_v8  ;;  %v7490_v24 = vand.u32 4294901760, %v2604_v5 }
 0x1ee   : > { %2356 = vmatpush.msrb.mxu3 %v2355_v0  ;;  %2421 = vmatpush.msra.mxu0 %v7328_v52  ;;  %v7432_v0 = vsub.f32 %v2611_v49, %v7414_v31  ;;  %v7446_v49 = vand.u32 4294901760, %v2608_v36  ;;  %9438 = vst [vmem:[#allocation24_spill] sm:$0xff] %v7453_v7 }
 0x1ef   : > { %2263 = vmatpush.msrb.mxu2 %v7260_v50  ;;  %2463 = vmatpush.msra.mxu1 %v7290_v4 }
 0x1f0   : > { %2362 = vmatpush.msrb.mxu3 %v2361_v6  ;;  %2424 = vmatpush.msra.mxu0 %v7340_v56  ;;  %v2379_v6 = vand.u32 4294901760, %v2378_v54  ;;  %v9336_v59 = vand.u32 4294901760, %v7432_v0  ;;  %v7455_v54 = vand.u32 4294901760, %v2607_v1  ;;  %v7463_v38 = vsub.f32 %v2608_v36, %v7446_v49 }
 0x1f1   : > { %2265 = vmatpush.msrb.mxu2 %v7271_v8  ;;  %2465 = vmatpush.msra.mxu1 %v7305_v26  ;;  %v7477_v36 = vand.u32 4294901760, %v2605_v29 }
 0x1f2   : > { %2368 = vmatpush.msrb.mxu3 %v2367_v18  ;;  %2427 = vmatpush.msra.mxu0 %v7352_v9  ;;  %v2606_v18 = vld [vmem:[#allocation11 + $0x1d0] sm:$0xff]  ;;  %v2656_v55 = vsub.f32 %v7432_v0, %v9336_v59  ;;  %v7475_v43 = vsub.f32 %v2607_v1, %v7455_v54  ;;  %v2603_v59 = vld [vmem:[#allocation11 + $0x1b8] sm:$0xff]  ;;  %v1309_v1 = vpop.f32.mrf.mxu1 }
 0x1f3   : > { %2267 = vmatpush.msrb.mxu2 %v7290_v4  ;;  %2467 = vmatpush.msra.mxu1 %v7318_v60  ;;  %v7465_v42 = vand.u32 4294901760, %v2606_v18  ;;  %v7502_v19 = vand.u32 4294901760, %v2603_v59 }
 0x1f4   : > { %2374 = vmatpush.msrb.mxu3 %v2373_v33  ;;  %2430 = vmatpush.msra.mxu0 %v7364_v16  ;;  %v9341_v33 = vand.u32 4294901760, %v7442_v17  ;;  %9439 = vst [vmem:[#allocation26_spill] sm:$0xff] %v7475_v43  ;;  %v2657_v34 = vand.u32 4294901760, %v2656_v55 }
 0x1f5   : > { %2269 = vmatpush.msrb.mxu2 %v7305_v26  ;;  %2469 = vmatpush.msra.mxu1 %v7330_v48  ;;  %v7488_v2 = vsub.f32 %v2606_v18, %v7465_v42  ;;  %v7500_v18 = vsub.f32 %v2605_v29, %v7477_v36 }
 0x1f6   : > { %2380 = vmatpush.msrb.mxu3 %v2379_v6  ;;  %2433 = vmatpush.msra.mxu0 %v7376_v37  ;;  %v9345_v6 = vand.u32 4294901760, %v7453_v7 }
 0x1f7   : > { %2271 = vmatpush.msrb.mxu2 %v7318_v60  ;;  %2471 = vmatpush.msra.mxu1 %v7342_v21  ;;  %9440 = vst [vmem:[#allocation27_spill] sm:$0xff] %v7488_v2 }
 0x1f8   : > { %2386 = vmatpush.msrb.mxu3 %v2385_v12  ;;  %2436 = vmatpush.msra.mxu0 %v7388_v41  ;;  %v2662_v12 = vsub.f32 %v7442_v17, %v9341_v33  ;;  %v1208_v33 = vpop.f32.mrf.mxu0  ;;  %v7515_v41 = vand.u32 4294901760, %v2602_v39 }
 0x1f9   : > { %2273 = vmatpush.msrb.mxu2 %v7330_v48  ;;  %2473 = vmatpush.msra.mxu1 %v7354_v32  ;;  %v1310_v55 = vadd.f32 %v1309_v1, %v1208_v33 }
 0x1fa   : > { %2388 = vmatmul.f32.vlgmr.msrb.gmra.mxu3 %v7438_v46  ;;  %2439 = vmatpush.msra.mxu0 %v7398_v15  ;;  %v1363_v15 = vpop.f32.mrf.mxu2 }
 0x1fb   : > { %2555 = vmatpush.msra.mxu3 %v7198_v22  ;;  %2275 = vmatpush.msrb.mxu2 %v7342_v21  ;;  %v2668_v22 = vsub.f32 %v7453_v7, %v9345_v6  ;;  %v9441_v6 = vand.u32 4294901760, %v7463_v38  ;;  %v7512_v7 = vsub.f32 %v2604_v5, %v7490_v24  ;;  %v7524_v5 = vsub.f32 %v2603_v59, %v7502_v19  ;;  %v2593_v59 = vpop.permute.xlu1 %2592 }
 0x1fc   : > { %2475 = vmatpush.msra.mxu1 %v7366_v20  ;;  %2442 = vmatmul.f32.vlgmr.msra.gmra.mxu0 %v2283_v62  ;;  %v2601_v62 = vld [vmem:[#allocation11 + $0x1a8] sm:$0xff]  ;;  %v1364_v1 = vadd.f32 %v1363_v15, %v1310_v55 }
 0x1fd   : > { %2557 = vmatpush.msra.mxu3 %v7204_v3  ;;  %2613 = vmatpush.msrb.mxu0 %v7414_v31  ;;  %v2663_v3 = vand.u32 4294901760, %v2662_v12  ;;  %v2674_v58 = vsub.f32 %v7463_v38, %v9441_v6  ;;  %v2600_v12 = vld [vmem:[#allocation11 + $0x1a0] sm:$0xff]  ;;  %v7527_v29 = vand.u32 4294901760, %v2601_v62  ;;  %v1402_v6 = vpop.f32.mrf.mxu3 }
 0x1fe   : > { %2277 = vmatpush.msrb.mxu2 %v7354_v32  ;;  %2477 = vmatpush.msra.mxu1 %v7378_v45  ;;  %v7539_v15 = vand.u32 4294901760, %v2600_v12 }
 0x1ff   : > { %2481 = vmatmul.f32.vlgmr.msra.gmra.mxu1 %v2284_v30  ;;  %2559 = vmatpush.msra.mxu3 %v7214_v27  ;;  %v2669_v27 = vand.u32 4294901760, %v2668_v22  ;;  %v9442_v30 = vand.u32 4294901760, %v7475_v43  ;;  %v9443_v22 = vand.u32 4294901760, %v7488_v2 }
 0x200   : > { %2615 = vmatpush.msrb.mxu0 %v7423_v51  ;;  %2658 = vmatpush.msrb.mxu1 %v2657_v34  ;;  %v2286_v34 = vand.u32 4294901760, %v2285_v28  ;;  %v7537_v28 = vsub.f32 %v2602_v39, %v7515_v41  ;;  %v1403_v39 = vadd.f32 %v1402_v6, %v1364_v1  ;;  %v2597_v6 = vld [vmem:[#allocation11 + $0x188] sm:$0xff]  ;;  %v9448_v1 = vand.u32 4294901760, %v7233_v11 }
 0x201   : > { %2279 = vmatpush.msrb.mxu2 %v7366_v20  ;;  %2561 = vmatpush.msra.mxu3 %v7224_v47  ;;  %v2680_v33 = vsub.f32 %v7475_v43, %v9442_v30  ;;  %v2675_v47 = vand.u32 4294901760, %v2674_v58  ;;  %v2686_v30 = vsub.f32 %v7488_v2, %v9443_v22  ;;  %v2599_v43 = vld [vmem:[#allocation11 + $0x198] sm:$0xff]  ;;  %v9445_v58 = vand.u32 4294901760, %v7500_v18 }
 0x202   : > { %2617 = vmatpush.msrb.mxu0 %v7436_v63  ;;  %2664 = vmatpush.msrb.mxu1 %v2663_v3  ;;  %v9444_v3 = vand.u32 4294901760, %v7212_v57  ;;  %v7552_v2 = vand.u32 4294901760, %v2599_v43  ;;  %v2598_v57 = vld [vmem:[#allocation11 + $0x190] sm:$0xff]  ;;  %v9450_v11 = vand.u32 4294901760, %v7244_v44  ;;  %v9451_v44 = vand.u32 4294901760, %v7258_v61 }
 0x203   : > { %2281 = vmatpush.msrb.mxu2 %v7378_v45  ;;  %2563 = vmatpush.msra.mxu3 %v7235_v10  ;;  %v2681_v10 = vand.u32 4294901760, %v2680_v33  ;;  %v2692_v55 = vsub.f32 %v7500_v18, %v9445_v58  ;;  %v2687_v33 = vand.u32 4294901760, %v2686_v30  ;;  %v9447_v58 = vand.u32 4294901760, %v7512_v7 }
 0x204   : > { %2287 = vmatmul.f32.vlgmr.msrb.gmra.mxu2 %v2286_v34  ;;  %2619 = vmatpush.msrb.mxu0 %v7446_v49  ;;  %v7550_v34 = vsub.f32 %v2601_v62, %v7527_v29  ;;  %v7563_v62 = vsub.f32 %v2600_v12, %v7539_v15  ;;  %v9449_v30 = vand.u32 4294901760, %v7524_v5  ;;  %v9453_v61 = vand.u32 4294901760, %v7276_v40 }
 0x205   : > { %2488 = vmatpush.msra.mxu2 %v9444_v3  ;;  %2670 = vmatpush.msrb.mxu1 %v2669_v27  ;;  %v9446_v27 = vand.u32 4294901760, %v7222_v53  ;;  %v1471_v3 = vpop.f32.mrf.mxu0  ;;  %v2698_v22 = vsub.f32 %v7512_v7, %v9447_v58  ;;  %v2594_v53 = vmul.f32 %v2593_v59, %v6539_v14  ;;  %v7577_v14 = vsub.f32 %v2599_v43, %v7552_v2 }
 0x206   : > { %2565 = vmatpush.msra.mxu3 %v7248_v25  ;;  %2621 = vmatpush.msrb.mxu0 %v7455_v54  ;;  %v2709_v25 = vand.u32 4294901760, %v7537_v28  ;;  %v1472_v12 = vadd.f32 %v1471_v3, %v1403_v39  ;;  %v2715_v58 = vand.u32 4294901760, %v7550_v34  ;;  %v2721_v43 = vand.u32 4294901760, %v7563_v62 }
 0x207   : > { %2492 = vmatpush.msra.mxu2 %v9446_v27  ;;  %2676 = vmatpush.msrb.mxu1 %v2675_v47  ;;  %v2693_v47 = vand.u32 4294901760, %v2692_v55  ;;  %v2704_v27 = vsub.f32 %v7524_v5, %v9449_v30  ;;  %v2699_v59 = vand.u32 4294901760, %v2698_v22  ;;  %v7581_v55 = vand.u32 4294901760, %v2597_v6 }
 0x208   : > { %2567 = vmatpush.msra.mxu3 %v7260_v50  ;;  %2623 = vmatpush.msrb.mxu0 %v7465_v42  ;;  %v7571_v50 = vand.u32 4294901760, %v2598_v57  ;;  %v7589_v39 = vand.u32 4294901760, %v2594_v53  ;;  %v2716_v3 = vsub.f32 %v7550_v34, %v2715_v58  ;;  %v2727_v30 = vand.u32 4294901760, %v7577_v14 }
 0x209   : > { %2496 = vmatpush.msra.mxu2 %v9448_v1  ;;  %2682 = vmatpush.msrb.mxu1 %v2681_v10  ;;  %v1508_v10 = vpop.f32.mrf.mxu1  ;;  %v2596_v1 = vld [vmem:[#allocation11 + $0x180] sm:$0xff]  ;;  %v2705_v22 = vand.u32 4294901760, %v2704_v27  ;;  %v9454_v27 = vand.u32 4294901760, %v7286_v35  ;;  %v9455_v35 = vand.u32 4294901760, %v7299_v23 }
 0x20a   : > { %2569 = vmatpush.msra.mxu3 %v7271_v8  ;;  %2625 = vmatpush.msrb.mxu0 %v7477_v36  ;;  %v2710_v8 = vsub.f32 %v7537_v28, %v2709_v25 }
 0x20b   : > { %2500 = vmatpush.msra.mxu2 %v9450_v11  ;;  %2688 = vmatpush.msrb.mxu1 %v2687_v33  ;;  %v7594_v33 = vsub.f32 %v2598_v57, %v7571_v50  ;;  %v7604_v11 = vand.u32 4294901760, %v2596_v1  ;;  %v7609_v57 = vsub.f32 %v2597_v6, %v7581_v55  ;;  %v2728_v6 = vsub.f32 %v7577_v14, %v2727_v30 }
 0x20c   : > { %2571 = vmatpush.msra.mxu3 %v7290_v4  ;;  %2627 = vmatpush.msrb.mxu0 %v7490_v24  ;;  %v7598_v4 = vadd.f32 %v1508_v10, %v1472_v12  ;;  %v7620_v12 = vsub.f32 %v2594_v53, %v7589_v39 }
 0x20d   : > { %2504 = vmatpush.msra.mxu2 %v9451_v44  ;;  %2694 = vmatpush.msrb.mxu1 %v2693_v47  ;;  %v2722_v47 = vsub.f32 %v7563_v62, %v2721_v43  ;;  %v2733_v40 = vand.u32 4294901760, %v7594_v33  ;;  %v2739_v53 = vand.u32 4294901760, %v7609_v57 }
 0x20e   : > { %2573 = vmatpush.msra.mxu3 %v7305_v26  ;;  %2629 = vmatpush.msrb.mxu0 %v7502_v19  ;;  %9452 = vst [vmem:[#allocation28_spill] sm:$0xff] %v7598_v4  ;;  %v2711_v26 = vand.u32 4294901760, %v2710_v8  ;;  %v2646_v23 = vand.u32 4294901760, %v7620_v12  ;;  %v2729_v8 = vand.u32 4294901760, %v2728_v6  ;;  %v9466_v6 = vld [vmem:[#allocation24_spill] sm:$0xff] }
 0x20f   : > { %2508 = vmatpush.msra.mxu2 %v9453_v61  ;;  %2700 = vmatpush.msrb.mxu1 %v2699_v59  ;;  %v7629_v59 = vsub.f32 %v2596_v1, %v7604_v11  ;;  %v2723_v10 = vand.u32 4294901760, %v2722_v47  ;;  %v2734_v1 = vsub.f32 %v7594_v33, %v2733_v40  ;;  %v9460_v61 = vand.u32 4294901760, %v7364_v16 }
 0x210   : > { %2575 = vmatpush.msra.mxu3 %v7318_v60  ;;  %2631 = vmatpush.msrb.mxu0 %v7515_v41  ;;  %v2717_v60 = vand.u32 4294901760, %v2716_v3  ;;  %v9463_v16 = vand.u32 4294901760, %v7442_v17 }
 0x211   : > { %2512 = vmatpush.msra.mxu2 %v9454_v27  ;;  %2706 = vmatpush.msrb.mxu1 %v2705_v22  ;;  %v2745_v44 = vand.u32 4294901760, %v7629_v59  ;;  %v9458_v22 = vand.u32 4294901760, %v7340_v56  ;;  %v9459_v56 = vand.u32 4294901760, %v7352_v9  ;;  %v9461_v9 = vand.u32 4294901760, %v7432_v0  ;;  %v9464_v27 = vld [vmem:[#allocation23_spill] sm:$0xff] }
 0x212   : > { %3690 = vrot.lane.b32.xlu2 %v7598_v4, %s5773_s13  ;;  %2577 = vmatpush.msra.mxu3 %v7330_v48  ;;  %v9456_v48 = vand.u32 4294901760, %v7316_v13  ;;  %v2740_v13 = vsub.f32 %v7609_v57, %v2739_v53 }
 0x213   : > { %2516 = vmatpush.msra.mxu2 %v9455_v35  ;;  %2633 = vmatpush.msrb.mxu0 %v7527_v29  ;;  %v2746_v3 = vsub.f32 %v7629_v59, %v2745_v44  ;;  %v9467_v35 = vand.u32 4294901760, %v9466_v6 }
 0x214   : > { %2712 = vmatpush.msrb.mxu1 %v2711_v26  ;;  %2579 = vmatpush.msra.mxu3 %v7342_v21  ;;  %v9457_v21 = vand.u32 4294901760, %v7328_v52  ;;  %v2647_v52 = vsub.f32 %v7620_v12, %v2646_v23 }
 0x215   : > { %2520 = vmatpush.msra.mxu2 %v9456_v48  ;;  %2635 = vmatpush.msrb.mxu0 %v7539_v15  ;;  %v2747_v47 = vand.u32 4294901760, %v2746_v3  ;;  %v9471_v48 = vld [vmem:[#allocation26_spill] sm:$0xff] }
 0x216   : > { %2718 = vmatpush.msrb.mxu1 %v2717_v60  ;;  %2581 = vmatpush.msra.mxu3 %v7354_v32  ;;  %v2735_v32 = vand.u32 4294901760, %v2734_v1  ;;  %v2648_v26 = vand.u32 4294901760, %v2647_v52  ;;  %v9465_v60 = vand.u32 4294901760, %v9464_v27 }
 0x217   : > { %2524 = vmatpush.msra.mxu2 %v9457_v21  ;;  %2637 = vmatpush.msrb.mxu0 %v7552_v2 }
 0x218   : > { %2724 = vmatpush.msrb.mxu1 %v2723_v10  ;;  %2583 = vmatpush.msra.mxu3 %v7366_v20  ;;  %v2741_v20 = vand.u32 4294901760, %v2740_v13 }
 0x219   : > { %2528 = vmatpush.msra.mxu2 %v9458_v22  ;;  %2639 = vmatpush.msrb.mxu0 %v7571_v50 }
 0x21a   : > { %2730 = vmatpush.msrb.mxu1 %v2729_v8  ;;  %4052 = vrot.lane.b32.xlu2 %v7598_v4, %s5774_s19 }
 0x21b   : > { %4414 = vrot.lane.b32.xlu0 %v7598_v4, %s5772_s2  ;;  %2532 = vmatpush.msra.mxu2 %v9459_v56  ;;  %v4421_v4 = vld [vmem:[#allocation13 + $0x1a0] sm:$0xff] }
 0x21c   : > { %2585 = vmatpush.msra.mxu3 %v7378_v45  ;;  %2641 = vmatpush.msrb.mxu0 %v7581_v55  ;;  %v9462_v45 = vand.u32 4294901760, %v7376_v37  ;;  %v9468_v37 = vld [vmem:[#allocation25_spill] sm:$0xff] }
 0x21d   : > { %2736 = vmatpush.msrb.mxu1 %v2735_v32  ;;  %2587 = vmatmul.f32.vlgmr.msra.gmra.mxu3 %v7438_v46  ;;  %v9469_v10 = vand.u32 4294901760, %v9468_v37  ;;  %v2966_v37 = vld [vmem:[#allocation14 + $0x38] sm:$0xff] }
 0x21e   : > { %2809 = vmatpush.msrb.mxu3 %v7414_v31  ;;  %2536 = vmatpush.msra.mxu2 %v9460_v61 }
 0x21f   : > { %2643 = vmatpush.msrb.mxu0 %v7604_v11  ;;  %2742 = vmatpush.msrb.mxu1 %v2741_v20 }
 0x220   : > { %2649 = vmatmul.f32.vlgmr.msrb.gmra.mxu0 %v2648_v26  ;;  %2811 = vmatpush.msrb.mxu3 %v7423_v51 }
 0x221   : > { %2850 = vmatpush.msra.mxu0 %v9461_v9  ;;  %2540 = vmatpush.msra.mxu2 %v9462_v45 }
 0x222   : > { %2748 = vmatpush.msrb.mxu1 %v2747_v47  ;;  %2813 = vmatpush.msrb.mxu3 %v7436_v63 }
 0x223   : > { %2750 = vmatmul.f32.vlgmr.msrb.gmra.mxu1 %v7589_v39  ;;  %2854 = vmatpush.msra.mxu0 %v9463_v16 }
 0x224   : > { %2917 = vmatpush.msra.mxu1 %v7414_v31  ;;  %2544 = vmatpush.msra.mxu2 %v9465_v60  ;;  %v9470_v31 = vand.u32 4294901760, %v7463_v38 }
 0x225   : > { %2815 = vmatpush.msrb.mxu3 %v7446_v49  ;;  %2858 = vmatpush.msra.mxu0 %v9467_v35 }
 0x226   : > { %2919 = vmatpush.msra.mxu1 %v7423_v51  ;;  %2548 = vmatpush.msra.mxu2 %v9469_v10  ;;  %v9472_v51 = vand.u32 4294901760, %v9471_v48  ;;  %v2965_v10 = vld [vmem:[#allocation14 + $0x30] sm:$0xff] }
 0x227   : > { %2550 = vmatmul.f32.vlgmr.msra.gmra.mxu2 %v7438_v46  ;;  %2817 = vmatpush.msrb.mxu3 %v7455_v54  ;;  %v9473_v46 = vld [vmem:[#allocation27_spill] sm:$0xff] }
 0x228   : > { %2756 = vmatpush.msrb.mxu2 %v7432_v0  ;;  %2862 = vmatpush.msra.mxu0 %v9470_v31  ;;  %v9474_v0 = vand.u32 4294901760, %v9473_v46  ;;  %v2964_v31 = vld [vmem:[#allocation14 + $0x28] sm:$0xff] }
 0x229   : > { %2921 = vmatpush.msra.mxu1 %v7436_v63  ;;  %2819 = vmatpush.msrb.mxu3 %v7465_v42  ;;  %v9475_v63 = vand.u32 4294901760, %v7500_v18 }
 0x22a   : > { %2759 = vmatpush.msrb.mxu2 %v7442_v17  ;;  %2866 = vmatpush.msra.mxu0 %v9472_v51  ;;  %v9476_v17 = vand.u32 4294901760, %v7512_v7 }
 0x22b   : > { %2923 = vmatpush.msra.mxu1 %v7446_v49  ;;  %2821 = vmatpush.msrb.mxu3 %v7477_v36 }
 0x22c   : > { %2762 = vmatpush.msrb.mxu2 %v9466_v6  ;;  %2870 = vmatpush.msra.mxu0 %v9474_v0 }
 0x22d   : > { %2925 = vmatpush.msra.mxu1 %v7455_v54  ;;  %2823 = vmatpush.msrb.mxu3 %v7490_v24 }
 0x22e   : > { %2765 = vmatpush.msrb.mxu2 %v7463_v38  ;;  %2874 = vmatpush.msra.mxu0 %v9475_v63  ;;  %v9477_v38 = vand.u32 4294901760, %v7524_v5 }
 0x22f   : > { %2927 = vmatpush.msra.mxu1 %v7465_v42  ;;  %2825 = vmatpush.msrb.mxu3 %v7502_v19 }
 0x230   : > { %2768 = vmatpush.msrb.mxu2 %v9471_v48  ;;  %2878 = vmatpush.msra.mxu0 %v9476_v17 }
 0x231   : > { %2929 = vmatpush.msra.mxu1 %v7477_v36  ;;  %2827 = vmatpush.msrb.mxu3 %v7515_v41 }
 0x232   : > { %2771 = vmatpush.msrb.mxu2 %v9473_v46  ;;  %2882 = vmatpush.msra.mxu0 %v9477_v38 }
 0x233   : > { %2931 = vmatpush.msra.mxu1 %v7490_v24  ;;  %2829 = vmatpush.msrb.mxu3 %v7527_v29 }
 0x234   : > { %2774 = vmatpush.msrb.mxu2 %v7500_v18  ;;  %2886 = vmatpush.msra.mxu0 %v2709_v25  ;;  %v2973_v25 = vld [vmem:[#allocation14 + $0x70] sm:$0xff] }
 0x235   : > { %2933 = vmatpush.msra.mxu1 %v7502_v19  ;;  %2831 = vmatpush.msrb.mxu3 %v7539_v15 }
 0x236   : > { %2777 = vmatpush.msrb.mxu2 %v7512_v7  ;;  %2890 = vmatpush.msra.mxu0 %v2715_v58  ;;  %v1780_v42 = vpop.f32.mrf.mxu1 }
 0x237   : > { %2935 = vmatpush.msra.mxu1 %v7515_v41  ;;  %2833 = vmatpush.msrb.mxu3 %v7552_v2 }
 0x238   : > { %2780 = vmatpush.msrb.mxu2 %v7524_v5  ;;  %2894 = vmatpush.msra.mxu0 %v2721_v43  ;;  %v1687_v24 = vpop.f32.mrf.mxu3 }
 0x239   : > { %2937 = vmatpush.msra.mxu1 %v7527_v29  ;;  %2835 = vmatpush.msrb.mxu3 %v7571_v50 }
 0x23a   : > { %2783 = vmatpush.msrb.mxu2 %v7537_v28  ;;  %2898 = vmatpush.msra.mxu0 %v2727_v30  ;;  %v2969_v30 = vld [vmem:[#allocation14 + $0x50] sm:$0xff] }
 0x23b   : > { %2939 = vmatpush.msra.mxu1 %v7539_v15  ;;  %2837 = vmatpush.msrb.mxu3 %v7581_v55 }
 0x23c   : > { %2786 = vmatpush.msrb.mxu2 %v7550_v34  ;;  %2902 = vmatpush.msra.mxu0 %v2733_v40  ;;  %v2974_v34 = vld [vmem:[#allocation14 + $0x78] sm:$0xff] }
 0x23d   : > { %2941 = vmatpush.msra.mxu1 %v7552_v2  ;;  %2839 = vmatpush.msrb.mxu3 %v7604_v11  ;;  %v1741_v2 = vpop.f32.mrf.mxu0 }
 0x23e   : > { %2789 = vmatpush.msrb.mxu2 %v7563_v62  ;;  %2906 = vmatpush.msra.mxu0 %v2739_v53  ;;  %v2972_v62 = vld [vmem:[#allocation14 + $0x68] sm:$0xff]  ;;  %v2967_v53 = vld [vmem:[#allocation14 + $0x40] sm:$0xff] }
 0x23f   : > { %2943 = vmatpush.msra.mxu1 %v7571_v50  ;;  %2843 = vmatmul.f32.vlgmr.msrb.gmra.mxu3 %v2646_v23  ;;  %v7780_v43 = vand.u32 4294901760, %v2972_v62  ;;  %v7810_v32 = vand.u32 4294901760, %v2967_v53 }
 0x240   : > { %2792 = vmatpush.msrb.mxu2 %v7577_v14  ;;  %2910 = vmatpush.msra.mxu0 %v2745_v44  ;;  %v1586_v19 = vpop.f32.mrf.mxu2  ;;  %v7766_v18 = vpop.f32.mrf.mxu1  ;;  %v7776_v14 = vand.u32 4294901760, %v2974_v34 }
 0x241   : > { %2945 = vmatpush.msra.mxu1 %v7581_v55  ;;  %2912 = vmatmul.f32.vlgmr.msra.gmra.mxu0 %v7589_v39  ;;  %v1688_v41 = vadd.f32 %v1687_v24, %v1586_v19  ;;  %v1886_v7 = vpop.f32.mrf.mxu3  ;;  %v7778_v55 = vand.u32 4294901760, %v2973_v25  ;;  %v7795_v8 = vsub.f32 %v2972_v62, %v7780_v43  ;;  %v7836_v35 = vsub.f32 %v2967_v53, %v7810_v32  ;;  %v2963_v24 = vld [vmem:[#allocation14 + $0x20] sm:$0xff] }
 0x242   : > { %2795 = vmatpush.msrb.mxu2 %v7594_v33  ;;  %v2970_v33 = vld [vmem:[#allocation14 + $0x58] sm:$0xff]  ;;  %v7789_v1 = vsub.f32 %v2974_v34, %v7776_v14  ;;  %v7870_v62 = vand.u32 4294901760, %v2963_v24 }
 0x243   : > { %2947 = vmatpush.msra.mxu1 %v7604_v11  ;;  %v1742_v54 = vadd.f32 %v1741_v2, %v1688_v41  ;;  %v7784_v40 = vand.u32 4294901760, %v2970_v33  ;;  %v7792_v23 = vsub.f32 %v2973_v25, %v7778_v55  ;;  %v3030_v20 = vand.u32 4294901760, %v7795_v8 }
 0x244   : > { %2949 = vmatmul.f32.vlgmr.msra.gmra.mxu1 %v7589_v39  ;;  %2798 = vmatpush.msrb.mxu2 %v7609_v57  ;;  %v2971_v39 = vld [vmem:[#allocation14 + $0x60] sm:$0xff]  ;;  %v3018_v3 = vand.u32 4294901760, %v7789_v1  ;;  %v7852_v41 = vand.u32 4294901760, %v2965_v10 }
 0x245   : > { %v1927_v36 = vpop.f32.mrf.mxu0  ;;  %v1781_v29 = vadd.f32 %v1780_v42, %v1742_v54  ;;  %v7782_v57 = vand.u32 4294901760, %v2971_v39  ;;  %3172 = vmatpush.msrb.mxu1 %v7776_v14  ;;  %v7805_v13 = vsub.f32 %v2970_v33, %v7784_v40  ;;  %v3024_v56 = vand.u32 4294901760, %v7792_v23  ;;  %3119 = vmatpush.msrb.mxu0 %v7789_v1 }
 0x246   : > { %2801 = vmatpush.msrb.mxu2 %v7629_v59  ;;  %v2968_v59 = vld [vmem:[#allocation14 + $0x48] sm:$0xff]  ;;  %v3019_v45 = vsub.f32 %v7789_v1, %v3018_v3  ;;  %v3031_v27 = vsub.f32 %v7795_v8, %v3030_v20  ;;  %v7850_v42 = vand.u32 4294901760, %v2966_v37  ;;  %v3344_v1 = vld [vmem:[#allocation13 + $0x60] sm:$0xff] }
 0x247   : > { %2804 = vmatmul.f32.vlgmr.msrb.gmra.mxu2 %v7620_v12  ;;  %v7786_v12 = vand.u32 4294901760, %v2969_v30  ;;  %v7798_v44 = vand.u32 4294901760, %v2968_v59  ;;  %v7802_v21 = vsub.f32 %v2971_v39, %v7782_v57  ;;  %v3042_v26 = vand.u32 4294901760, %v7805_v13  ;;  %3174 = vmatpush.msrb.mxu1 %v7778_v55 }
 0x248   : > { %2976 = vmatpush.msra.mxu2 %v7776_v14  ;;  %v3025_v16 = vsub.f32 %v7792_v23, %v3024_v56  ;;  %3122 = vmatpush.msrb.mxu0 %v7792_v23  ;;  %v3020_v46 = vand.u32 4294901760, %v3019_v45  ;;  %v3032_v2 = vand.u32 4294901760, %v3031_v27  ;;  %v7864_v25 = vsub.f32 %v2966_v37, %v7850_v42  ;;  %v3343_v23 = vld [vmem:[#allocation13 + $0x58] sm:$0xff] }
 0x249   : > { %v7808_v22 = vsub.f32 %v2969_v30, %v7786_v12  ;;  %v3036_v61 = vand.u32 4294901760, %v7802_v21  ;;  %v7820_v47 = vsub.f32 %v2968_v59, %v7798_v44  ;;  %3176 = vmatpush.msrb.mxu1 %v7780_v43  ;;  %v3043_v38 = vsub.f32 %v7805_v13, %v3042_v26 }
 0x24a   : > { %v1849_v49 = vpop.f32.mrf.mxu2  ;;  %2978 = vmatpush.msra.mxu2 %v7778_v55  ;;  %v3026_v0 = vand.u32 4294901760, %v3025_v16  ;;  %3125 = vmatpush.msrb.mxu0 %v7795_v8  ;;  %v2960_v16 = vld [vmem:[#allocation14 + $0x8] sm:$0xff]  ;;  %v3342_v8 = vld [vmem:[#allocation13 + $0x50] sm:$0xff] }
 0x24b   : > { %v1850_v28 = vadd.f32 %v1849_v49, %v1781_v29  ;;  %v3048_v6 = vand.u32 4294901760, %v7808_v22  ;;  %v3037_v63 = vsub.f32 %v7802_v21, %v3036_v61  ;;  %v3054_v19 = vand.u32 4294901760, %v7820_v47  ;;  %3178 = vmatpush.msrb.mxu1 %v7782_v57  ;;  %3021 = vmatpush.msra.mxu3 %v3020_v46  ;;  %v2962_v29 = vld [vmem:[#allocation14 + $0x18] sm:$0xff] }
 0x24c   : > { %2980 = vmatpush.msra.mxu2 %v7780_v43  ;;  %v7854_v49 = vand.u32 4294901760, %v2964_v31  ;;  %3128 = vmatpush.msrb.mxu0 %v7802_v21  ;;  %v3044_v53 = vand.u32 4294901760, %v3043_v38  ;;  %v8022_v21 = vand.u32 4294901760, %v3344_v1 }
 0x24d   : > { %v1887_v11 = vadd.f32 %v1886_v7, %v1850_v28  ;;  %v3049_v54 = vsub.f32 %v7808_v22, %v3048_v6  ;;  %3180 = vmatpush.msrb.mxu1 %v7784_v40  ;;  %3027 = vmatpush.msra.mxu3 %v3026_v0  ;;  %v3038_v34 = vand.u32 4294901760, %v3037_v63  ;;  %v3055_v30 = vsub.f32 %v7820_v47, %v3054_v19 }
 0x24e   : > { %2982 = vmatpush.msra.mxu2 %v7782_v57  ;;  %3131 = vmatpush.msrb.mxu0 %v7805_v13  ;;  %v8024_v13 = vand.u32 4294901760, %v3343_v23 }
 0x24f   : > { %v1928_v60 = vadd.f32 %v1927_v36, %v1887_v11  ;;  %v3060_v36 = vand.u32 4294901760, %v7836_v35  ;;  %v2961_v11 = vld [vmem:[#allocation14 + $0x10] sm:$0xff]  ;;  %3182 = vmatpush.msrb.mxu1 %v7786_v12  ;;  %3033 = vmatpush.msra.mxu3 %v3032_v2  ;;  %v3050_v37 = vand.u32 4294901760, %v3049_v54  ;;  %v3056_v63 = vand.u32 4294901760, %v3055_v30 }
 0x250   : > { %2984 = vmatpush.msra.mxu2 %v7784_v40  ;;  %3134 = vmatpush.msrb.mxu0 %v7808_v22  ;;  %v8026_v22 = vand.u32 4294901760, %v3342_v8 }
 0x251   : > { %v2029_v7 = vadd.f32 %v7766_v18, %v1928_v60  ;;  %v7868_v18 = vsub.f32 %v2965_v10, %v7852_v41  ;;  %v3061_v45 = vsub.f32 %v7836_v35, %v3060_v36  ;;  %3184 = vmatpush.msrb.mxu1 %v7798_v44  ;;  %3039 = vmatpush.msra.mxu3 %v3038_v34 }
 0x252   : > { %2986 = vmatpush.msra.mxu2 %v7786_v12  ;;  %3137 = vmatpush.msrb.mxu0 %v7820_v47  ;;  %v8043_v47 = vsub.f32 %v3343_v23, %v8024_v13 }
 0x253   : > { %v3072_v10 = vand.u32 4294901760, %v7868_v18  ;;  %3186 = vmatpush.msrb.mxu1 %v7810_v32  ;;  %3045 = vmatpush.msra.mxu3 %v3044_v53  ;;  %v3062_v54 = vand.u32 4294901760, %v3061_v45 }
 0x254   : > { %2988 = vmatpush.msra.mxu2 %v7798_v44  ;;  %3140 = vmatpush.msrb.mxu0 %v7836_v35 }
 0x255   : > { %3188 = vmatpush.msrb.mxu1 %v7850_v42  ;;  %3051 = vmatpush.msra.mxu3 %v3050_v37 }
 0x256   : > { %2990 = vmatpush.msra.mxu2 %v7810_v32  ;;  %3143 = vmatpush.msrb.mxu0 %v7864_v25 }
 0x257   : > { %v7772_v50 = vpop.f32.mrf.mxu0  ;;  %3190 = vmatpush.msrb.mxu1 %v7852_v41  ;;  %3057 = vmatpush.msra.mxu3 %v3056_v63 }
 0x258   : > { %2992 = vmatpush.msra.mxu2 %v7850_v42  ;;  %3146 = vmatpush.msrb.mxu0 %v7868_v18 }
 0x259   : > { %3192 = vmatpush.msrb.mxu1 %v7854_v49  ;;  %3063 = vmatpush.msra.mxu3 %v3062_v54 }
 0x25a   : > { %v7774_v58 = vpop.f32.mrf.mxu1  ;;  %2994 = vmatpush.msra.mxu2 %v7852_v41 }
 0x25b   : > { %v7770_v15 = vpop.f32.mrf.mxu3  ;;  %3194 = vmatpush.msrb.mxu1 %v7870_v62 }
 0x25c   : > { %2996 = vmatpush.msra.mxu2 %v7854_v49 }
 0x25e   : > { %2998 = vmatpush.msra.mxu2 %v7870_v62 }
 0x265   : > { %v7768_v5 = vpop.f32.mrf.mxu2 }
 0x266   : > { %v2083_v39 = vadd.f32 %v7768_v5, %v2029_v7  ;;  %v7883_v5 = vand.u32 4294901760, %v2962_v29 }
 0x268   : > { %v2122_v46 = vadd.f32 %v7770_v15, %v2083_v39  ;;  %v7908_v15 = vand.u32 4294901760, %v2960_v16  ;;  %v3073_v39 = vsub.f32 %v7868_v18, %v3072_v10  ;;  %3000 = vmatpush.msra.mxu2 %v7883_v5  ;;  %3196 = vmatpush.msrb.mxu1 %v7883_v5 }
 0x26a   : > { %v3074_v63 = vand.u32 4294901760, %v3073_v39 }
 0x279   : > { %v2443_v48 = vpop.f32.mrf.mxu0 }
 0x27c   : > { %v2482_v51 = vpop.f32.mrf.mxu1 }
 0x27d   : > { %v2389_v9 = vpop.f32.mrf.mxu3 }
 0x287   : > { %v2288_v52 = vpop.f32.mrf.mxu2 }
 0x288   : > { %v2390_v17 = vadd.f32 %v2389_v9, %v2288_v52  ;;  %v3066_v52 = vand.u32 4294901760, %v7864_v25  ;;  %v7881_v9 = vsub.f32 %v2964_v31, %v7854_v49  ;;  %v7893_v31 = vsub.f32 %v2963_v24, %v7870_v62 }
 0x289   : > { %v7906_v24 = vsub.f32 %v2962_v29, %v7883_v5 }
 0x28a   : > { %v2444_v33 = vadd.f32 %v2443_v48, %v2390_v17  ;;  %v7895_v48 = vand.u32 4294901760, %v2961_v11  ;;  %v2959_v17 = vld [vmem:[#allocation14] sm:$0xff]  ;;  %v3067_v38 = vsub.f32 %v7864_v25, %v3066_v52  ;;  %v3078_v2 = vand.u32 4294901760, %v7881_v9  ;;  %3149 = vmatpush.msrb.mxu0 %v7881_v9 }
 0x28b   : > { %v7920_v30 = vand.u32 4294901760, %v2959_v17  ;;  %v3090_v37 = vand.u32 4294901760, %v7906_v24  ;;  %v3415_v25 = vand.u32 4294901760, %v8043_v47 }
 0x28c   : > { %v2483_v0 = vadd.f32 %v2482_v51, %v2444_v33  ;;  %v3084_v33 = vand.u32 4294901760, %v7893_v31  ;;  %v7918_v29 = vsub.f32 %v2961_v11, %v7895_v48  ;;  %v7931_v11 = vsub.f32 %v2960_v16, %v7908_v15  ;;  %3152 = vmatpush.msrb.mxu0 %v7893_v31  ;;  %3002 = vmatpush.msra.mxu2 %v7895_v48 }
 0x28d   : > { %v7941_v16 = vsub.f32 %v2959_v17, %v7920_v30  ;;  %v3091_v39 = vsub.f32 %v7906_v24, %v3090_v37  ;;  %3198 = vmatpush.msrb.mxu1 %v7895_v48 }
 0x28e   : > { %3155 = vmatpush.msrb.mxu0 %v7906_v24  ;;  %3004 = vmatpush.msra.mxu2 %v7908_v15  ;;  %v3416_v24 = vsub.f32 %v8043_v47, %v3415_v25 }
 0x28f   : > { %3200 = vmatpush.msrb.mxu1 %v7908_v15 }
 0x290   : > { %3158 = vmatpush.msrb.mxu0 %v7918_v29  ;;  %3006 = vmatpush.msra.mxu2 %v7920_v30 }
 0x291   : > { %3202 = vmatpush.msrb.mxu1 %v7920_v30 }
 0x292   : > { %3213 = vmatpush.msrb.mxu2 %v3018_v3  ;;  %3161 = vmatpush.msrb.mxu0 %v7931_v11 }
 0x294   : > { %3217 = vmatpush.msrb.mxu2 %v3024_v56  ;;  %3164 = vmatpush.msrb.mxu0 %v7941_v16 }
 0x296   : > { %3221 = vmatpush.msrb.mxu2 %v3030_v20 }
 0x298   : > { %3225 = vmatpush.msrb.mxu2 %v3036_v61 }
 0x29a   : > { %3229 = vmatpush.msrb.mxu2 %v3042_v26  ;;  %v8040_v26 = vsub.f32 %v3344_v1, %v8022_v21 }
 0x29c   : > { %3233 = vmatpush.msrb.mxu2 %v3048_v6  ;;  %v8046_v6 = vsub.f32 %v3342_v8, %v8026_v22 }
 0x29d   : > { %v2650_v27 = vpop.f32.mrf.mxu0 }
 0x29e   : > { %3237 = vmatpush.msrb.mxu2 %v3054_v19 }
 0x2a0   : > { %v2588_v59 = vpop.f32.mrf.mxu3  ;;  %v2751_v60 = vpop.f32.mrf.mxu1  ;;  %3241 = vmatpush.msrb.mxu2 %v3060_v36  ;;  %v3409_v36 = vand.u32 4294901760, %v8040_v26 }
 0x2a1   : > { %v2752_v51 = vadd.f32 %v2751_v60, %v2650_v27  ;;  %v3068_v27 = vand.u32 4294901760, %v3067_v38  ;;  %v3079_v60 = vsub.f32 %v7881_v9, %v3078_v2  ;;  %v3085_v38 = vsub.f32 %v7893_v31, %v3084_v33 }
 0x2a2   : > { %3245 = vmatpush.msrb.mxu2 %v3066_v52  ;;  %v3410_v31 = vsub.f32 %v8040_v26, %v3409_v36 }
 0x2a3   : > { %3069 = vmatpush.msra.mxu3 %v3068_v27  ;;  %v3108_v27 = vand.u32 4294901760, %v7941_v16 }
 0x2a4   : > { %3249 = vmatpush.msrb.mxu2 %v3072_v10 }
 0x2a5   : > { %3075 = vmatpush.msra.mxu3 %v3074_v63  ;;  %v3109_v63 = vsub.f32 %v7941_v16, %v3108_v27 }
 0x2a6   : > { %3253 = vmatpush.msrb.mxu2 %v3078_v2 }
 0x2a8   : > { %3257 = vmatpush.msrb.mxu2 %v3084_v33 }
 0x2aa   : > { %v2551_v28 = vpop.f32.mrf.mxu2  ;;  %3261 = vmatpush.msrb.mxu2 %v3090_v37 }
 0x2ab   : > { %v2552_v7 = vadd.f32 %v2551_v28, %v2483_v0  ;;  %v2191_v28 = vadd.f32 %v7772_v50, %v2122_v46 }
 0x2ad   : > { %v2589_v50 = vadd.f32 %v2588_v59, %v2552_v7  ;;  %v2228_v7 = vadd.f32 %v7774_v58, %v2191_v28  ;;  %v3086_v58 = vand.u32 4294901760, %v3085_v38 }
 0x2af   : > { %v2591_v17 = vadd.f32 %v2589_v50, %v2228_v7  ;;  %v3092_v50 = vand.u32 4294901760, %v3091_v39 }
 0x2be   : > { %v2913_v0 = vpop.f32.mrf.mxu0 }
 0x2c1   : > { %v2950_v54 = vpop.f32.mrf.mxu1 }
 0x2c2   : > { %v2844_v45 = vpop.f32.mrf.mxu3 }
 0x2ca   : > { %v2805_v34 = vpop.f32.mrf.mxu2 }
 0x2cb   : > { %v2806_v53 = vadd.f32 %v2805_v34, %v2752_v51  ;;  %v3096_v51 = vand.u32 4294901760, %v7918_v29  ;;  %v3080_v34 = vand.u32 4294901760, %v3079_v60 }
 0x2cd   : > { %v2845_v46 = vadd.f32 %v2844_v45, %v2806_v53  ;;  %v3102_v53 = vand.u32 4294901760, %v7931_v11  ;;  %v3097_v28 = vsub.f32 %v7918_v29, %v3096_v51  ;;  %3081 = vmatpush.msra.mxu3 %v3080_v34  ;;  %3265 = vmatpush.msrb.mxu2 %v3096_v51  ;;  %v3411_v29 = vand.u32 4294901760, %v3410_v31 }
 0x2cf   : > { %v2914_v59 = vadd.f32 %v2913_v0, %v2845_v46  ;;  %v3103_v46 = vsub.f32 %v7931_v11, %v3102_v53  ;;  %3087 = vmatpush.msra.mxu3 %v3086_v58  ;;  %v3098_v0 = vand.u32 4294901760, %v3097_v28  ;;  %3269 = vmatpush.msrb.mxu2 %v3102_v53  ;;  %v3417_v11 = vand.u32 4294901760, %v3416_v24  ;;  %v3339_v58 = vld [vmem:[#allocation13 + $0x38] sm:$0xff] }
 0x2d1   : > { %v2951_v45 = vadd.f32 %v2950_v54, %v2914_v59  ;;  %3093 = vmatpush.msra.mxu3 %v3092_v50  ;;  %v3104_v38 = vand.u32 4294901760, %v3103_v46  ;;  %v3110_v59 = vand.u32 4294901760, %v3109_v63  ;;  %3273 = vmatpush.msrb.mxu2 %v3108_v27  ;;  %v8110_v27 = vand.u32 4294901760, %v3339_v58  ;;  %v3337_v63 = vld [vmem:[#allocation13 + $0x28] sm:$0xff] }
 0x2d3   : > { %v7958_v60 = vadd.f32 %v2951_v45, %v2591_v17  ;;  %3099 = vmatpush.msra.mxu3 %v3098_v0  ;;  %v3340_v17 = vld [vmem:[#allocation13 + $0x40] sm:$0xff]  ;;  %v8116_v46 = vsub.f32 %v3339_v58, %v8110_v27 }
 0x2d4   : > { %v8105_v45 = vand.u32 4294901760, %v3340_v17 }
 0x2d5   : > { %2954 = vmax.xlane.f32.xlu1 %v7958_v60  ;;  %3105 = vmatpush.msra.mxu3 %v3104_v38 }
 0x2d6   : > { %v8108_v28 = vsub.f32 %v3340_v17, %v8105_v45 }
 0x2d7   : > { %3111 = vmatpush.msra.mxu3 %v3110_v59  ;;  %v3439_v59 = vand.u32 4294901760, %v8116_v46 }
 0x2d8   : > { %v3433_v50 = vand.u32 4294901760, %v8108_v28 }
 0x2d9   : > { %3280 = vmatpush.msrb.mxu3 %v7776_v14  ;;  %v3347_v14 = vld [vmem:[#allocation13 + $0x78] sm:$0xff]  ;;  %v3440_v23 = vsub.f32 %v8116_v46, %v3439_v59 }
 0x2da   : > { %v3434_v38 = vsub.f32 %v8108_v28, %v3433_v50 }
 0x2db   : > { %3282 = vmatpush.msrb.mxu3 %v7778_v55  ;;  %v3346_v55 = vld [vmem:[#allocation13 + $0x70] sm:$0xff] }
 0x2dc   : > { %v3435_v1 = vand.u32 4294901760, %v3434_v38 }
 0x2dd   : > { %3284 = vmatpush.msrb.mxu3 %v7780_v43  ;;  %v3345_v43 = vld [vmem:[#allocation13 + $0x68] sm:$0xff] }
 0x2df   : > { %3286 = vmatpush.msrb.mxu3 %v7782_v57  ;;  %v8016_v57 = vand.u32 4294901760, %v3347_v14 }
 0x2e1   : > { %3288 = vmatpush.msrb.mxu3 %v7784_v40  ;;  %v8018_v40 = vand.u32 4294901760, %v3346_v55  ;;  %v8030_v56 = vsub.f32 %v3347_v14, %v8016_v57  ;;  %3349 = vmatpush.msra.mxu0 %v8016_v57 }
 0x2e3   : > { %3290 = vmatpush.msrb.mxu3 %v7786_v12  ;;  %v8020_v12 = vand.u32 4294901760, %v3345_v43  ;;  %v8033_v20 = vsub.f32 %v3346_v55, %v8018_v40  ;;  %3351 = vmatpush.msra.mxu0 %v8018_v40  ;;  %v8131_v55 = vand.u32 4294901760, %v3337_v63 }
 0x2e5   : > { %3292 = vmatpush.msrb.mxu3 %v7798_v44  ;;  %v8036_v61 = vsub.f32 %v3345_v43, %v8020_v12  ;;  %3353 = vmatpush.msra.mxu0 %v8020_v12  ;;  %v3336_v43 = vld [vmem:[#allocation13 + $0x20] sm:$0xff] }
 0x2e7   : > { %3294 = vmatpush.msrb.mxu3 %v7810_v32  ;;  %v3341_v32 = vld [vmem:[#allocation13 + $0x48] sm:$0xff]  ;;  %3355 = vmatpush.msra.mxu0 %v8022_v21 }
 0x2e8   : > { %v8048_v35 = vand.u32 4294901760, %v3341_v32 }
 0x2e9   : > { %3296 = vmatpush.msrb.mxu3 %v7850_v42  ;;  %v3391_v42 = vand.u32 4294901760, %v8030_v56  ;;  %3357 = vmatpush.msra.mxu0 %v8024_v13 }
 0x2ea   : > { %v8057_v18 = vsub.f32 %v3341_v32, %v8048_v35  ;;  %v8144_v32 = vand.u32 4294901760, %v3336_v43 }
 0x2eb   : > { %3298 = vmatpush.msrb.mxu3 %v7852_v41  ;;  %v3397_v41 = vand.u32 4294901760, %v8033_v20  ;;  %3359 = vmatpush.msra.mxu0 %v8026_v22 }
 0x2ed   : > { %3300 = vmatpush.msrb.mxu3 %v7854_v49  ;;  %v3403_v49 = vand.u32 4294901760, %v8036_v61  ;;  %v3398_v52 = vsub.f32 %v8033_v20, %v3397_v41  ;;  %3361 = vmatpush.msra.mxu0 %v8048_v35 }
 0x2ef   : > { %3302 = vmatpush.msrb.mxu3 %v7870_v62  ;;  %v3392_v62 = vsub.f32 %v8030_v56, %v3391_v42  ;;  %v3404_v9 = vsub.f32 %v8036_v61, %v3403_v49  ;;  %v3399_v10 = vand.u32 4294901760, %v3398_v52  ;;  %3363 = vmatpush.msra.mxu0 %v8105_v45 }
 0x2f1   : > { %3304 = vmatpush.msrb.mxu3 %v7883_v5  ;;  %v3393_v5 = vand.u32 4294901760, %v3392_v62  ;;  %v3405_v2 = vand.u32 4294901760, %v3404_v9  ;;  %3365 = vmatpush.msra.mxu0 %v8110_v27 }
 0x2f3   : > { %3306 = vmatpush.msrb.mxu3 %v7895_v48  ;;  %v3421_v48 = vand.u32 4294901760, %v8046_v6  ;;  %3394 = vmatpush.msra.mxu1 %v3393_v5  ;;  %v8155_v5 = vsub.f32 %v3336_v43, %v8144_v32 }
 0x2f5   : > { %3308 = vmatpush.msrb.mxu3 %v7908_v15  ;;  %v3427_v15 = vand.u32 4294901760, %v8057_v18  ;;  %3400 = vmatpush.msra.mxu1 %v3399_v10  ;;  %v3334_v10 = vld [vmem:[#allocation13 + $0x10] sm:$0xff] }
 0x2f7   : > { %3310 = vmatpush.msrb.mxu3 %v7920_v30  ;;  %v3422_v30 = vsub.f32 %v8046_v6, %v3421_v48  ;;  %3406 = vmatpush.msra.mxu1 %v3405_v2  ;;  %v3428_v51 = vsub.f32 %v8057_v18, %v3427_v15 }
 0x2f9   : > { %3412 = vmatpush.msra.mxu1 %v3411_v29  ;;  %v3423_v7 = vand.u32 4294901760, %v3422_v30  ;;  %v3429_v34 = vand.u32 4294901760, %v3428_v51  ;;  %v8165_v29 = vand.u32 4294901760, %v3334_v10  ;;  %v3457_v30 = vand.u32 4294901760, %v8155_v5 }
 0x2fb   : > { %3418 = vmatpush.msra.mxu1 %v3417_v11 }
 0x2fd   : > { %3424 = vmatpush.msra.mxu1 %v3423_v7 }
 0x2ff   : > { %3430 = vmatpush.msra.mxu1 %v3429_v34  ;;  %v3332_v34 = vld [vmem:[#allocation13] sm:$0xff] }
 0x300   : > { %v8189_v58 = vand.u32 4294901760, %v3332_v34 }
 0x301   : > { %3436 = vmatpush.msra.mxu1 %v3435_v1 }
 0x302   : > { %v8199_v1 = vsub.f32 %v3332_v34, %v8189_v58 }
 0x348   : > { %v2955_v44 = vpop.xlane.xlu1 %2954 }
 0x349   : > { %v2956_v3 = vsub.f32 %v7958_v60, %v2955_v44  ;;  %v3338_v60 = vld [vmem:[#allocation13 + $0x30] sm:$0xff]  ;;  %v8140_v44 = vsub.f32 %v3337_v63, %v8131_v55 }
 0x34a   : > { %v8119_v0 = vand.u32 4294901760, %v3338_v60 }
 0x34b   : > { %v2957_v19 = vmul.f32 1.442695, %v2956_v3  ;;  %v3335_v3 = vld [vmem:[#allocation13 + $0x18] sm:$0xff]  ;;  %v3451_v52 = vand.u32 4294901760, %v8140_v44 }
 0x34c   : > { %v8128_v14 = vsub.f32 %v3338_v60, %v8119_v0  ;;  %3367 = vmatpush.msra.mxu0 %v8119_v0  ;;  %v8152_v9 = vand.u32 4294901760, %v3335_v3 }
 0x34d   : > { %5435 = vpow2.f32 %v2957_v19  ;;  %v3441_v19 = vand.u32 4294901760, %v3440_v23  ;;  %v3452_v2 = vsub.f32 %v8140_v44, %v3451_v52 }
 0x34e   : > { %v3445_v8 = vand.u32 4294901760, %v8128_v14  ;;  %3369 = vmatpush.msra.mxu0 %v8131_v55  ;;  %v8163_v24 = vsub.f32 %v3335_v3, %v8152_v9 }
 0x34f   : > { %3442 = vmatpush.msra.mxu1 %v3441_v19  ;;  %v3453_v11 = vand.u32 4294901760, %v3452_v2  ;;  %v3481_v19 = vand.u32 4294901760, %v8199_v1 }
 0x350   : > { %v3446_v62 = vsub.f32 %v8128_v14, %v3445_v8  ;;  %3371 = vmatpush.msra.mxu0 %v8144_v32  ;;  %v3463_v51 = vand.u32 4294901760, %v8163_v24 }
 0x351   : > { %v3482_v2 = vsub.f32 %v8199_v1, %v3481_v19 }
 0x352   : > { %v3447_v31 = vand.u32 4294901760, %v3446_v62  ;;  %3373 = vmatpush.msra.mxu0 %v8152_v9  ;;  %v3708_v62 = vld [vmem:[#allocation13 + $0xf8] sm:$0xff] }
 0x353   : > { %v8079_v33 = vpop.eup %5435  ;;  %v3483_v34 = vand.u32 4294901760, %v3482_v2 }
 0x354   : > { %v3007_v37 = vand.u32 4294901760, %v8079_v33  ;;  %3448 = vmatpush.msra.mxu1 %v3447_v31  ;;  %3375 = vmatpush.msra.mxu0 %v8165_v29 }
 0x356   : > { %3113 = vmatmul.f32.vlgmr.msra.gmra.mxu3 %v3007_v37  ;;  %v3008_v16 = vsub.f32 %v8079_v33, %v3007_v37  ;;  %3454 = vmatpush.msra.mxu1 %v3453_v11 }
 0x357   : > { %3545 = vmatpush.msra.mxu3 %v8016_v57 }
 0x358   : > { %3167 = vmatmul.f32.vlgmr.msrb.gmra.mxu0 %v3008_v16  ;;  %v3009_v54 = vand.u32 4294901760, %v3008_v16 }
 0x359   : > { %3547 = vmatpush.msra.mxu3 %v8018_v40 }
 0x35a   : > { %3206 = vmatmul.f32.vlgmr.msrb.gmra.mxu1 %v3009_v54  ;;  %v3010_v39 = vsub.f32 %v3008_v16, %v3009_v54  ;;  %v8172_v16 = vsub.f32 %v3334_v10, %v8165_v29  ;;  %v3458_v54 = vsub.f32 %v8155_v5, %v3457_v30  ;;  %v8210_v10 = vand.u32 4294901760, %v3708_v62 }
 0x35b   : > { %3549 = vmatpush.msra.mxu3 %v8020_v12 }
 0x35c   : > { %v3011_v53 = vand.u32 4294901760, %v3010_v39  ;;  %v3464_v39 = vsub.f32 %v8163_v24, %v3463_v51  ;;  %v3459_v60 = vand.u32 4294901760, %v3458_v54  ;;  %v8219_v11 = vsub.f32 %v3708_v62, %v8210_v10 }
 0x35d   : > { %3551 = vmatpush.msra.mxu3 %v8022_v21 }
 0x35e   : > { %3012 = vmatmul.f32.vlgmr.msra.gmra.mxu2 %v3011_v53  ;;  %3312 = vmatmul.f32.vlgmr.msrb.gmra.mxu3 %v3007_v37  ;;  %v3469_v53 = vand.u32 4294901760, %v8172_v16  ;;  %v3465_v63 = vand.u32 4294901760, %v3464_v39  ;;  %v3706_v39 = vld [vmem:[#allocation13 + $0xe8] sm:$0xff] }
 0x35f   : > { %3492 = vmatpush.msra.mxu2 %v8030_v56  ;;  %3553 = vmatpush.msra.mxu3 %v8024_v13  ;;  %v8227_v56 = vand.u32 4294901760, %v3706_v39 }
 0x360   : > { %v3470_v38 = vsub.f32 %v8172_v16, %v3469_v53  ;;  %3460 = vmatpush.msra.mxu1 %v3459_v60  ;;  %v3752_v60 = vand.u32 4294901760, %v8219_v11 }
 0x361   : > { %3495 = vmatpush.msra.mxu2 %v8033_v20  ;;  %3555 = vmatpush.msra.mxu3 %v8026_v22 }
 0x362   : > { %v3471_v23 = vand.u32 4294901760, %v3470_v38  ;;  %3466 = vmatpush.msra.mxu1 %v3465_v63  ;;  %v3705_v63 = vld [vmem:[#allocation13 + $0xe0] sm:$0xff]  ;;  %v3753_v20 = vsub.f32 %v8219_v11, %v3752_v60 }
 0x363   : > { %3498 = vmatpush.msra.mxu2 %v8036_v61  ;;  %3557 = vmatpush.msra.mxu3 %v8048_v35  ;;  %v8239_v38 = vand.u32 4294901760, %v3705_v63 }
 0x364   : > { %3472 = vmatpush.msra.mxu1 %v3471_v23  ;;  %v8242_v23 = vsub.f32 %v3706_v39, %v8227_v56  ;;  %v3754_v61 = vand.u32 4294901760, %v3753_v20  ;;  %v3702_v39 = vld [vmem:[#allocation13 + $0xc8] sm:$0xff] }
 0x365   : > { %3501 = vmatpush.msra.mxu2 %v8040_v26  ;;  %3559 = vmatpush.msra.mxu3 %v8105_v45  ;;  %v8256_v2 = vsub.f32 %v3705_v63, %v8239_v38  ;;  %v8275_v63 = vand.u32 4294901760, %v3702_v39 }
 0x366   : > { %3275 = vmatmul.f32.vlgmr.msrb.gmra.mxu2 %v3007_v37  ;;  %v3333_v37 = vld [vmem:[#allocation13 + $0x8] sm:$0xff]  ;;  %v3764_v62 = vand.u32 4294901760, %v8242_v23 }
 0x367   : > { %3504 = vmatpush.msra.mxu2 %v8043_v47  ;;  %3561 = vmatpush.msra.mxu3 %v8110_v27  ;;  %v8174_v7 = vand.u32 4294901760, %v3333_v37 }
 0x369   : > { %3507 = vmatpush.msra.mxu2 %v8046_v6  ;;  %3563 = vmatpush.msra.mxu3 %v8119_v0  ;;  %v8187_v17 = vsub.f32 %v3333_v37, %v8174_v7  ;;  %v3707_v37 = vld [vmem:[#allocation13 + $0xf0] sm:$0xff] }
 0x36a   : > { %3377 = vmatpush.msra.mxu0 %v8174_v7  ;;  %v8221_v54 = vand.u32 4294901760, %v3707_v37 }
 0x36b   : > { %3510 = vmatpush.msra.mxu2 %v8057_v18  ;;  %3565 = vmatpush.msra.mxu3 %v8131_v55  ;;  %v3475_v43 = vand.u32 4294901760, %v8187_v17 }
 0x36c   : > { %3379 = vmatpush.msra.mxu0 %v8189_v58 }
 0x36d   : > { %3513 = vmatpush.msra.mxu2 %v8108_v28  ;;  %3567 = vmatpush.msra.mxu3 %v8144_v32  ;;  %v3476_v3 = vsub.f32 %v8187_v17, %v3475_v43 }
 0x36e   : > { %3586 = vmatpush.msrb.mxu0 %v3391_v42  ;;  %v8230_v42 = vsub.f32 %v3707_v37, %v8221_v54 }
 0x36f   : > { %3516 = vmatpush.msra.mxu2 %v8116_v46  ;;  %3569 = vmatpush.msra.mxu3 %v8152_v9  ;;  %v3477_v31 = vand.u32 4294901760, %v3476_v3  ;;  %v3704_v3 = vld [vmem:[#allocation13 + $0xd8] sm:$0xff]  ;;  %v3697_v46 = vld [vmem:[#allocation13 + $0xa0] sm:$0xff] }
 0x370   : > { %3590 = vmatpush.msrb.mxu0 %v3397_v41  ;;  %v3758_v41 = vand.u32 4294901760, %v8230_v42 }
 0x371   : > { %3519 = vmatpush.msra.mxu2 %v8128_v14  ;;  %3571 = vmatpush.msra.mxu3 %v8165_v29 }
 0x372   : > { %3478 = vmatpush.msra.mxu1 %v3477_v31  ;;  %3594 = vmatpush.msrb.mxu0 %v3403_v49  ;;  %v3759_v49 = vsub.f32 %v8230_v42, %v3758_v41  ;;  %v8252_v31 = vand.u32 4294901760, %v3704_v3 }
 0x373   : > { %3522 = vmatpush.msra.mxu2 %v8140_v44  ;;  %3573 = vmatpush.msra.mxu3 %v8174_v7  ;;  %v3695_v44 = vld [vmem:[#allocation13 + $0x90] sm:$0xff] }
 0x374   : > { %3484 = vmatpush.msra.mxu1 %v3483_v34  ;;  %3598 = vmatpush.msrb.mxu0 %v3409_v36  ;;  %v3760_v26 = vand.u32 4294901760, %v3759_v49  ;;  %v3765_v36 = vsub.f32 %v8242_v23, %v3764_v62  ;;  %v8267_v34 = vsub.f32 %v3704_v3, %v8252_v31  ;;  %v3701_v3 = vld [vmem:[#allocation13 + $0xc0] sm:$0xff] }
 0x375   : > { %3525 = vmatpush.msra.mxu2 %v8155_v5  ;;  %3575 = vmatpush.msra.mxu3 %v8189_v58  ;;  %v3694_v5 = vld [vmem:[#allocation13 + $0x88] sm:$0xff] }
 0x376   : > { %3653 = vmatpush.msrb.mxu1 %v8016_v57  ;;  %v3703_v57 = vld [vmem:[#allocation13 + $0xd0] sm:$0xff]  ;;  %3602 = vmatpush.msrb.mxu0 %v3415_v25  ;;  %v3766_v47 = vand.u32 4294901760, %v3765_v36  ;;  %v3776_v25 = vand.u32 4294901760, %v8267_v34 }
 0x377   : > { %3528 = vmatpush.msra.mxu2 %v8163_v24  ;;  %3755 = vmatpush.msrb.mxu3 %v3754_v61  ;;  %v8264_v37 = vand.u32 4294901760, %v3703_v57  ;;  %v8291_v61 = vand.u32 4294901760, %v3701_v3  ;;  %v3693_v24 = vld [vmem:[#allocation13 + $0x80] sm:$0xff] }
 0x378   : > { %3655 = vmatpush.msrb.mxu1 %v8018_v40  ;;  %v3770_v40 = vand.u32 4294901760, %v8256_v2  ;;  %3606 = vmatpush.msrb.mxu0 %v3421_v48  ;;  %v3777_v6 = vsub.f32 %v8267_v34, %v3776_v25 }
 0x379   : > { %3531 = vmatpush.msra.mxu2 %v8172_v16  ;;  %3761 = vmatpush.msrb.mxu3 %v3760_v26  ;;  %v8278_v20 = vsub.f32 %v3703_v57, %v8264_v37  ;;  %v3700_v57 = vld [vmem:[#allocation13 + $0xb8] sm:$0xff] }
 0x37a   : > { %3657 = vmatpush.msrb.mxu1 %v8020_v12  ;;  %v3771_v12 = vsub.f32 %v8256_v2, %v3770_v40  ;;  %3610 = vmatpush.msrb.mxu0 %v3427_v15  ;;  %v3778_v18 = vand.u32 4294901760, %v3777_v6  ;;  %v8304_v36 = vand.u32 4294901760, %v3700_v57 }
 0x37b   : > { %3534 = vmatpush.msra.mxu2 %v8187_v17  ;;  %3767 = vmatpush.msrb.mxu3 %v3766_v47  ;;  %v3782_v48 = vand.u32 4294901760, %v8278_v20 }
 0x37c   : > { %3659 = vmatpush.msrb.mxu1 %v8022_v21  ;;  %v8294_v21 = vsub.f32 %v3702_v39, %v8275_v63  ;;  %v3772_v49 = vand.u32 4294901760, %v3771_v12  ;;  %3614 = vmatpush.msrb.mxu0 %v3433_v50  ;;  %v3699_v39 = vld [vmem:[#allocation13 + $0xb0] sm:$0xff]  ;;  %v8317_v12 = vsub.f32 %v3700_v57, %v8304_v36 }
 0x37d   : > { %3537 = vmatpush.msra.mxu2 %v8199_v1  ;;  %v3783_v15 = vsub.f32 %v8278_v20, %v3782_v48  ;;  %v8314_v47 = vand.u32 4294901760, %v3699_v39 }
 0x37e   : > { %3661 = vmatpush.msrb.mxu1 %v8024_v13  ;;  %v9354_v26 = vand.u32 4294901760, %v8294_v21  ;;  %3773 = vmatpush.msrb.mxu3 %v3772_v49  ;;  %v8308_v13 = vsub.f32 %v3701_v3, %v8291_v61  ;;  %v3698_v3 = vld [vmem:[#allocation13 + $0xa8] sm:$0xff]  ;;  %v9355_v49 = vand.u32 4294901760, %v8317_v12 }
 0x37f   : > { %3710 = vmatpush.msrb.mxu2 %v8210_v10  ;;  %v3784_v28 = vand.u32 4294901760, %v3783_v15  ;;  %3618 = vmatpush.msrb.mxu0 %v3439_v59  ;;  %v8325_v15 = vand.u32 4294901760, %v3698_v3 }
 0x380   : > { %3663 = vmatpush.msrb.mxu1 %v8026_v22  ;;  %v3789_v50 = vsub.f32 %v8294_v21, %v9354_v26  ;;  %3779 = vmatpush.msrb.mxu3 %v3778_v18  ;;  %v3794_v22 = vand.u32 4294901760, %v8308_v13  ;;  %v8328_v26 = vsub.f32 %v3699_v39, %v8314_v47  ;;  %v3801_v59 = vsub.f32 %v8317_v12, %v9355_v49 }
 0x381   : > { %3712 = vmatpush.msrb.mxu2 %v8221_v54  ;;  %3622 = vmatpush.msrb.mxu0 %v3445_v8  ;;  %v8341_v18 = vand.u32 4294901760, %v3697_v46  ;;  %v8344_v14 = vsub.f32 %v3698_v3, %v8325_v15  ;;  %v3696_v8 = vld [vmem:[#allocation13 + $0x98] sm:$0xff] }
 0x382   : > { %3665 = vmatpush.msrb.mxu1 %v8048_v35  ;;  %v3790_v6 = vand.u32 4294901760, %v3789_v50  ;;  %3785 = vmatpush.msrb.mxu3 %v3784_v28  ;;  %v3795_v35 = vsub.f32 %v8308_v13, %v3794_v22  ;;  %v3806_v57 = vand.u32 4294901760, %v8328_v26  ;;  %v3802_v39 = vand.u32 4294901760, %v3801_v59 }
 0x383   : > { %3714 = vmatpush.msrb.mxu2 %v8227_v56  ;;  %3626 = vmatpush.msrb.mxu0 %v3451_v52  ;;  %v3812_v50 = vand.u32 4294901760, %v8344_v14  ;;  %v8354_v49 = vand.u32 4294901760, %v3696_v8  ;;  %v8377_v59 = vand.u32 4294901760, %v3694_v5 }
 0x384   : > { %3667 = vmatpush.msrb.mxu1 %v8105_v45  ;;  %3791 = vmatpush.msrb.mxu3 %v3790_v6  ;;  %v3796_v45 = vand.u32 4294901760, %v3795_v35  ;;  %v3807_v28 = vsub.f32 %v8328_v26, %v3806_v57  ;;  %v8366_v6 = vand.u32 4294901760, %v3695_v44 }
 0x385   : > { %3716 = vmatpush.msrb.mxu2 %v8239_v38  ;;  %3630 = vmatpush.msrb.mxu0 %v3457_v30  ;;  %v3813_v3 = vsub.f32 %v8344_v14, %v3812_v50  ;;  %v8369_v35 = vsub.f32 %v3696_v8, %v8354_v49  ;;  %v8396_v16 = vsub.f32 %v3694_v5, %v8377_v59 }
 0x386   : > { %3669 = vmatpush.msrb.mxu1 %v8110_v27  ;;  %3797 = vmatpush.msrb.mxu3 %v3796_v45  ;;  %v8360_v27 = vsub.f32 %v3697_v46, %v8341_v18  ;;  %v3808_v52 = vand.u32 4294901760, %v3807_v28  ;;  %v8380_v45 = vsub.f32 %v3695_v44, %v8366_v6 }
 0x387   : > { %3718 = vmatpush.msrb.mxu2 %v8252_v31  ;;  %3634 = vmatpush.msrb.mxu0 %v3463_v51  ;;  %v3814_v30 = vand.u32 4294901760, %v3813_v3  ;;  %v3824_v46 = vand.u32 4294901760, %v8369_v35  ;;  %v9356_v3 = vand.u32 4294901760, %v8396_v16 }
 0x388   : > { %3671 = vmatpush.msrb.mxu1 %v8119_v0  ;;  %3803 = vmatpush.msrb.mxu3 %v3802_v39  ;;  %v3818_v0 = vand.u32 4294901760, %v8360_v27  ;;  %v9357_v8 = vand.u32 4294901760, %v8380_v45  ;;  %v8393_v39 = vand.u32 4294901760, %v3693_v24 }
 0x389   : > { %3720 = vmatpush.msrb.mxu2 %v8264_v37  ;;  %3638 = vmatpush.msrb.mxu0 %v3469_v53  ;;  %v3825_v51 = vsub.f32 %v8369_v35, %v3824_v46 }
 0x38a   : > { %3673 = vmatpush.msrb.mxu1 %v8131_v55  ;;  %3809 = vmatpush.msrb.mxu3 %v3808_v52  ;;  %v3819_v55 = vsub.f32 %v8360_v27, %v3818_v0  ;;  %v3831_v52 = vsub.f32 %v8380_v45, %v9357_v8  ;;  %v8407_v5 = vsub.f32 %v3693_v24, %v8393_v39 }
 0x38b   : > { %3722 = vmatpush.msrb.mxu2 %v8275_v63  ;;  %3642 = vmatpush.msrb.mxu0 %v3475_v43  ;;  %v3826_v44 = vand.u32 4294901760, %v3825_v51 }
 0x38c   : > { %3675 = vmatpush.msrb.mxu1 %v8144_v32  ;;  %3815 = vmatpush.msrb.mxu3 %v3814_v30  ;;  %v3820_v32 = vand.u32 4294901760, %v3819_v55  ;;  %v3832_v43 = vand.u32 4294901760, %v3831_v52  ;;  %v3837_v30 = vsub.f32 %v8396_v16, %v9356_v3  ;;  %v9358_v55 = vand.u32 4294901760, %v8407_v5 }
 0x38d   : > { %3724 = vmatpush.msrb.mxu2 %v8291_v61  ;;  %3646 = vmatpush.msrb.mxu0 %v3481_v19 }
 0x38e   : > { %3677 = vmatpush.msrb.mxu1 %v8152_v9  ;;  %3821 = vmatpush.msrb.mxu3 %v3820_v32  ;;  %v3838_v24 = vand.u32 4294901760, %v3837_v30  ;;  %v3843_v1 = vsub.f32 %v8407_v5, %v9358_v55 }
 0x38f   : > { %3726 = vmatpush.msrb.mxu2 %v8304_v36 }
 0x390   : > { %3679 = vmatpush.msrb.mxu1 %v8165_v29  ;;  %3827 = vmatpush.msrb.mxu3 %v3826_v44  ;;  %v3844_v19 = vand.u32 4294901760, %v3843_v1 }
 0x391   : > { %3728 = vmatpush.msrb.mxu2 %v8314_v47 }
 0x392   : > { %3681 = vmatpush.msrb.mxu1 %v8174_v7  ;;  %3833 = vmatpush.msrb.mxu3 %v3832_v43 }
 0x393   : > { %3730 = vmatpush.msrb.mxu2 %v8325_v15 }
 0x394   : > { %3683 = vmatpush.msrb.mxu1 %v8189_v58  ;;  %3839 = vmatpush.msrb.mxu3 %v3838_v24 }
 0x395   : > { %3732 = vmatpush.msrb.mxu2 %v8341_v18 }
 0x396   : > { %3845 = vmatpush.msrb.mxu3 %v3844_v19 }
 0x397   : > { %3734 = vmatpush.msrb.mxu2 %v8354_v49 }
 0x399   : > { %3736 = vmatpush.msrb.mxu2 %v8366_v6 }
 0x39b   : > { %3738 = vmatpush.msrb.mxu2 %v8377_v59 }
 0x39d   : > { %3740 = vmatpush.msrb.mxu2 %v8393_v39 }
 0x3d5   : > { %v3168_v17 = vpop.f32.mrf.mxu0 }
 0x3d7   : > { %v3207_v29 = vpop.f32.mrf.mxu1 }
 0x3d9   : > { %v3114_v53 = vpop.f32.mrf.mxu3 }
 0x3e1   : > { %v3013_v28 = vpop.f32.mrf.mxu2  ;;  %v3313_v52 = vpop.f32.mrf.mxu3 }
 0x3e2   : > { %v3115_v9 = vadd.f32 %v3114_v53, %v3013_v28 }
 0x3e4   : > { %v3169_v51 = vadd.f32 %v3168_v17, %v3115_v9 }
 0x3e6   : > { %v3208_v32 = vadd.f32 %v3207_v29, %v3169_v51 }
 0x3e9   : > { %v3276_v53 = vpop.f32.mrf.mxu2 }
 0x3ea   : > { %v3277_v28 = vadd.f32 %v3276_v53, %v3208_v32 }
 0x3ec   : > { %v3314_v9 = vadd.f32 %v3313_v52, %v3277_v28  ;;  %v9483_v52 = vand.u32 4294901760, %v8396_v16 }
 0x3ee   : > { %v3316_v17 = vmax.f32 %v3314_v9, 1e-30 }
 0x3f0   : > { %5437 = vrcp.f32 %v3316_v17  ;;  %v3328_v3 = vand.u32 2147483648, %v3316_v17  ;;  %v3326_v55 = vand.u32 2147483647, %v3316_v17  ;;  %vm3322_vm1 = vweird.f32 %v3316_v17 }
 0x3f2   : > { %v3329_v43 = vor.u32 1.1754944e-38, %v3328_v3  ;;  %vm3327_vm3 = vcmp.eq.f32.partialorder %v3326_v55, 8.507059e+37 }
 0x3f6   : > { %v5438_v7 = vpop.eup %5437 }
 0x3f7   : > { %v3318_v44 = vmul.f32 %v5438_v7, %v3316_v17  ;;  %vm3323_vm0 = vweird.f32 %v5438_v7 }
 0x3f8   : > { %vm3324_vm2 = vmor %vm3322_vm1, %vm3323_vm0 }
 0x3f9   : > { %v3319_v30 = vsub.f32 1.0, %v3318_v44 }
 0x3fb   : > { %v3320_v8 = vmul.f32 %v5438_v7, %v3319_v30 }
 0x3fd   : > { %v3321_v58 = vadd.f32 %v5438_v7, %v3320_v8 }
 0x3ff   : > { %v3325_v51 = vsel %vm3324_vm2, %v5438_v7, %v3321_v58  ;;  %v4060_v7 = vld [vmem:[#allocation13 + $0x128] sm:$0xff] }
 0x400   : > { %v3330_v24 = vsel %vm3327_vm3, %v3329_v43, %v3325_v51  ;;  %v4059_v51 = vld [vmem:[#allocation13 + $0x120] sm:$0xff] }
 0x401   : > { %v3331_v1 = vmul.f32 %v8079_v33, %v3330_v24  ;;  %v8589_v24 = vand.u32 4294901760, %v4060_v7 }
 0x403   : > { %v8422_v29 = vand.u32 4294901760, %v3331_v1 }
 0x405   : > { %3486 = vmatmul.f32.vlgmr.msra.gmra.mxu1 %v8422_v29  ;;  %v8426_v19 = vsub.f32 %v3331_v1, %v8422_v29 }
 0x406   : > { %3906 = vmatpush.msra.mxu1 %v8210_v10 }
 0x407   : > { %9478 = vst [vmem:[#allocation23_spill] sm:$0xff] %v8426_v19  ;;  %3540 = vmatmul.f32.vlgmr.msra.gmra.mxu2 %v8426_v19  ;;  %v8431_v8 = vand.u32 4294901760, %v8426_v19 }
 0x408   : > { %3908 = vmatpush.msra.mxu1 %v8221_v54  ;;  %3947 = vmatpush.msra.mxu2 %v3752_v60  ;;  %v9480_v60 = vand.u32 4294901760, %v8294_v21 }
 0x409   : > { %9479 = vst [vmem:[#allocation24_spill] sm:$0xff] %v8431_v8  ;;  %3579 = vmatmul.f32.vlgmr.msra.gmra.mxu3 %v8431_v8  ;;  %v3383_v33 = vsub.f32 %v8426_v19, %v8431_v8 }
 0x40a   : > { %3910 = vmatpush.msra.mxu1 %v8227_v56  ;;  %3951 = vmatpush.msra.mxu2 %v3758_v41  ;;  %v4067_v41 = vld [vmem:[#allocation13 + $0x160] sm:$0xff] }
 0x40b   : > { %4014 = vmatpush.msra.mxu3 %v8210_v10  ;;  %v8443_v3 = vand.u32 4294901760, %v3383_v33  ;;  %v4070_v10 = vld [vmem:[#allocation13 + $0x178] sm:$0xff] }
 0x40c   : > { %3912 = vmatpush.msra.mxu1 %v8239_v38  ;;  %3955 = vmatpush.msra.mxu2 %v3764_v62  ;;  %v4066_v62 = vld [vmem:[#allocation13 + $0x158] sm:$0xff] }
 0x40d   : > { %4016 = vmatpush.msra.mxu3 %v8221_v54  ;;  %3385 = vmatmul.f32.vlgmr.msra.gmra.mxu0 %v8443_v3  ;;  %v8469_v54 = vand.u32 4294901760, %v4070_v10 }
 0x40e   : > { %3685 = vmatmul.f32.vlgmr.msrb.gmra.mxu1 %v8422_v29  ;;  %3853 = vmatpush.msra.mxu0 %v8219_v11  ;;  %v4069_v11 = vld [vmem:[#allocation13 + $0x170] sm:$0xff] }
 0x40f   : > { %3914 = vmatpush.msra.mxu1 %v8252_v31  ;;  %3959 = vmatpush.msra.mxu2 %v3770_v40 }
 0x410   : > { %4018 = vmatpush.msra.mxu3 %v8227_v56  ;;  %3746 = vmatmul.f32.vlgmr.msrb.gmra.mxu2 %v8443_v3  ;;  %v4068_v56 = vld [vmem:[#allocation13 + $0x168] sm:$0xff] }
 0x411   : > { %3856 = vmatpush.msra.mxu0 %v8230_v42  ;;  %3916 = vmatpush.msra.mxu1 %v8264_v37  ;;  %v8476_v42 = vand.u32 4294901760, %v4069_v11 }
 0x412   : > { %3963 = vmatpush.msra.mxu2 %v3776_v25  ;;  %4020 = vmatpush.msra.mxu3 %v8239_v38  ;;  %v8484_v38 = vsub.f32 %v4070_v10, %v8469_v54  ;;  %v8507_v25 = vand.u32 4294901760, %v4066_v62  ;;  %v4058_v10 = vld [vmem:[#allocation13 + $0x118] sm:$0xff] }
 0x413   : > { %3847 = vmatmul.f32.vlgmr.msrb.gmra.mxu3 %v8422_v29  ;;  %3859 = vmatpush.msra.mxu0 %v8242_v23  ;;  %v8486_v23 = vand.u32 4294901760, %v4068_v56 }
 0x414   : > { %3918 = vmatpush.msra.mxu1 %v8275_v63  ;;  %3967 = vmatpush.msra.mxu2 %v3782_v48 }
 0x415   : > { %4022 = vmatpush.msra.mxu3 %v8252_v31  ;;  %3862 = vmatpush.msra.mxu0 %v8256_v2  ;;  %v9481_v31 = vand.u32 4294901760, %v8317_v12  ;;  %v8494_v2 = vsub.f32 %v4069_v11, %v8476_v42  ;;  %v8505_v40 = vsub.f32 %v4068_v56, %v8486_v23 }
 0x416   : > { %3920 = vmatpush.msra.mxu1 %v8291_v61  ;;  %3971 = vmatpush.msra.mxu2 %v9480_v60  ;;  %v8601_v60 = vand.u32 4294901760, %v4059_v51 }
 0x417   : > { %4024 = vmatpush.msra.mxu3 %v8264_v37  ;;  %3648 = vmatmul.f32.vlgmr.msrb.gmra.mxu0 %v8422_v29  ;;  %v8496_v37 = vand.u32 4294901760, %v4067_v41  ;;  %v9375_v48 = vand.u32 4294901760, %v8494_v2 }
 0x418   : > { %3865 = vmatpush.msra.mxu0 %v8267_v34  ;;  %3922 = vmatpush.msra.mxu1 %v8304_v36  ;;  %v9376_v34 = vand.u32 4294901760, %v8484_v38 }
 0x419   : > { %3975 = vmatpush.msra.mxu2 %v3794_v22  ;;  %4026 = vmatpush.msra.mxu3 %v8275_v63  ;;  %v4065_v63 = vld [vmem:[#allocation13 + $0x150] sm:$0xff]  ;;  %v8530_v22 = vsub.f32 %v4066_v62, %v8507_v25  ;;  %v8611_v62 = vsub.f32 %v4060_v7, %v8589_v24 }
 0x41a   : > { %3868 = vmatpush.msra.mxu0 %v8278_v20  ;;  %3924 = vmatpush.msra.mxu1 %v8314_v47  ;;  %v4064_v20 = vld [vmem:[#allocation13 + $0x148] sm:$0xff] }
 0x41b   : > { %3979 = vmatpush.msra.mxu2 %v9481_v31  ;;  %4028 = vmatpush.msra.mxu3 %v8291_v61  ;;  %v8516_v61 = vsub.f32 %v4067_v41, %v8496_v37  ;;  %v9371_v32 = vand.u32 4294901760, %v8530_v22  ;;  %v8613_v31 = vand.u32 4294901760, %v4058_v10 }
 0x41c   : > { %3871 = vmatpush.msra.mxu0 %v8294_v21  ;;  %3926 = vmatpush.msra.mxu1 %v8325_v15  ;;  %v8520_v21 = vand.u32 4294901760, %v4065_v63 }
 0x41d   : > { %3983 = vmatpush.msra.mxu2 %v3806_v57  ;;  %4030 = vmatpush.msra.mxu3 %v8304_v36  ;;  %v4063_v36 = vld [vmem:[#allocation13 + $0x140] sm:$0xff]  ;;  %v9372_v57 = vand.u32 4294901760, %v8516_v61  ;;  %v4139_v58 = vsub.f32 %v8530_v22, %v9371_v32 }
 0x41e   : > { %3874 = vmatpush.msra.mxu0 %v8308_v13  ;;  %3928 = vmatpush.msra.mxu1 %v8341_v18  ;;  %v4115_v13 = vsub.f32 %v8484_v38, %v9376_v34 }
 0x41f   : > { %3987 = vmatpush.msra.mxu2 %v3812_v50  ;;  %4032 = vmatpush.msra.mxu3 %v8314_v47  ;;  %v9373_v47 = vand.u32 4294901760, %v8505_v40  ;;  %v8543_v50 = vand.u32 4294901760, %v4063_v36  ;;  %v4133_v9 = vsub.f32 %v8516_v61, %v9372_v57  ;;  %v4140_v56 = vand.u32 4294901760, %v4139_v58 }
 0x420   : > { %3877 = vmatpush.msra.mxu0 %v8317_v12  ;;  %3930 = vmatpush.msra.mxu1 %v8354_v49  ;;  %v8532_v12 = vand.u32 4294901760, %v4064_v20 }
 0x421   : > { %3991 = vmatpush.msra.mxu2 %v3818_v0  ;;  %4034 = vmatpush.msra.mxu3 %v8325_v15  ;;  %v4121_v15 = vsub.f32 %v8494_v2, %v9375_v48  ;;  %v4062_v0 = vld [vmem:[#allocation13 + $0x138] sm:$0xff]  ;;  %v4127_v55 = vsub.f32 %v8505_v40, %v9373_v47  ;;  %v8571_v17 = vsub.f32 %v4063_v36, %v8543_v50  ;;  %v4134_v1 = vand.u32 4294901760, %v4133_v9  ;;  %v4422_v47 = vld [vmem:[#allocation13 + $0x1a8] sm:$0xff] }
 0x422   : > { %3880 = vmatpush.msra.mxu0 %v8328_v26  ;;  %3932 = vmatpush.msra.mxu1 %v8366_v6  ;;  %v8548_v26 = vsub.f32 %v4065_v63, %v8520_v21  ;;  %v8558_v53 = vsub.f32 %v4064_v20, %v8532_v12  ;;  %v8562_v28 = vand.u32 4294901760, %v4062_v0  ;;  %v4056_v20 = vld [vmem:[#allocation13 + $0x108] sm:$0xff] }
 0x423   : > { %3995 = vmatpush.msra.mxu2 %v3824_v46  ;;  %4036 = vmatpush.msra.mxu3 %v8341_v18  ;;  %v9482_v46 = vand.u32 4294901760, %v8380_v45  ;;  %v4116_v18 = vand.u32 4294901760, %v4115_v13  ;;  %v4128_v30 = vand.u32 4294901760, %v4127_v55  ;;  %v9367_v33 = vand.u32 4294901760, %v8571_v17 }
 0x424   : > { %3883 = vmatpush.msra.mxu0 %v8344_v14  ;;  %3934 = vmatpush.msra.mxu1 %v8377_v59  ;;  %v4061_v14 = vld [vmem:[#allocation13 + $0x130] sm:$0xff]  ;;  %v9368_v43 = vand.u32 4294901760, %v8558_v53  ;;  %v9364_v55 = vand.u32 4294901760, %v8611_v62 }
 0x425   : > { %3999 = vmatpush.msra.mxu2 %v9482_v46  ;;  %4038 = vmatpush.msra.mxu3 %v8354_v49  ;;  %v4122_v49 = vand.u32 4294901760, %v4121_v15  ;;  %v8576_v44 = vand.u32 4294901760, %v4061_v14  ;;  %v4157_v63 = vsub.f32 %v8571_v17, %v9367_v33  ;;  %v8623_v15 = vsub.f32 %v4059_v51, %v8601_v60  ;;  %v4055_v46 = vld [vmem:[#allocation13 + $0x100] sm:$0xff] }
 0x426   : > { %3886 = vmatpush.msra.mxu0 %v8360_v27  ;;  %3936 = vmatpush.msra.mxu1 %v8393_v39  ;;  %v9369_v27 = vand.u32 4294901760, %v8548_v26  ;;  %v4151_v41 = vsub.f32 %v8558_v53, %v9368_v43  ;;  %v4175_v58 = vsub.f32 %v8611_v62, %v9364_v55  ;;  %v4425_v33 = vld [vmem:[#allocation13 + $0x1c0] sm:$0xff] }
 0x427   : > { %4003 = vmatpush.msra.mxu2 %v9483_v52  ;;  %4040 = vmatpush.msra.mxu3 %v8366_v6  ;;  %v9484_v6 = vand.u32 4294901760, %v8407_v5  ;;  %v8599_v11 = vsub.f32 %v4061_v14, %v8576_v44  ;;  %v8635_v14 = vsub.f32 %v4058_v10, %v8613_v31  ;;  %v8637_v52 = vand.u32 4294901760, %v4056_v20 }
 0x428   : > { %3940 = vmatmul.f32.vlgmr.msra.gmra.mxu1 %v8431_v8  ;;  %3889 = vmatpush.msra.mxu0 %v8369_v35  ;;  %v8587_v35 = vsub.f32 %v4062_v0, %v8562_v28  ;;  %v9362_v9 = vand.u32 4294901760, %v8623_v15  ;;  %v8757_v32 = vand.u32 4294901760, %v4425_v33 }
 0x429   : > { %4117 = vmatpush.msrb.mxu1 %v4116_v18  ;;  %4007 = vmatpush.msra.mxu2 %v9484_v6  ;;  %v9365_v13 = vand.u32 4294901760, %v8599_v11  ;;  %v8649_v6 = vand.u32 4294901760, %v4055_v46  ;;  %v9360_v51 = vand.u32 4294901760, %v8635_v14 }
 0x42a   : > { %4042 = vmatpush.msra.mxu3 %v8377_v59  ;;  %4009 = vmatmul.f32.vlgmr.msra.gmra.mxu2 %v8422_v29  ;;  %v4145_v59 = vsub.f32 %v8548_v26, %v9369_v27 }
 0x42b   : > { %4123 = vmatpush.msrb.mxu1 %v4122_v49  ;;  %4215 = vmatpush.msrb.mxu2 %v8484_v38  ;;  %v4169_v49 = vsub.f32 %v8599_v11, %v9365_v13 }
 0x42c   : > { %3892 = vmatpush.msra.mxu0 %v8380_v45  ;;  %4044 = vmatpush.msra.mxu3 %v8393_v39  ;;  %v4057_v45 = vld [vmem:[#allocation13 + $0x110] sm:$0xff]  ;;  %v9366_v39 = vand.u32 4294901760, %v8587_v35  ;;  %v4146_v36 = vand.u32 4294901760, %v4145_v59  ;;  %v4181_v59 = vsub.f32 %v8623_v15, %v9362_v9  ;;  %v4428_v9 = vld [vmem:[#allocation13 + $0x1d8] sm:$0xff] }
 0x42d   : > { %4046 = vmatmul.f32.vlgmr.msra.gmra.mxu3 %v8422_v29  ;;  %4129 = vmatpush.msrb.mxu1 %v4128_v30  ;;  %v8625_v0 = vand.u32 4294901760, %v4057_v45  ;;  %v4170_v10 = vand.u32 4294901760, %v4169_v49 }
 0x42e   : > { %4218 = vmatpush.msrb.mxu2 %v8494_v2  ;;  %4268 = vmatpush.msrb.mxu3 %v8469_v54  ;;  %v4163_v18 = vsub.f32 %v8587_v35, %v9366_v39  ;;  %v4426_v39 = vld [vmem:[#allocation13 + $0x1c8] sm:$0xff] }
 0x42f   : > { %3895 = vmatpush.msra.mxu0 %v8396_v16  ;;  %4135 = vmatpush.msrb.mxu1 %v4134_v1  ;;  %v4152_v16 = vand.u32 4294901760, %v4151_v41  ;;  %v8647_v7 = vsub.f32 %v4057_v45, %v8625_v0  ;;  %v8659_v1 = vsub.f32 %v4056_v20, %v8637_v52  ;;  %v8669_v41 = vsub.f32 %v4055_v46, %v8649_v6  ;;  %v4432_v45 = vld [vmem:[#allocation13 + $0x1f8] sm:$0xff] }
 0x430   : > { %4221 = vmatpush.msrb.mxu2 %v8505_v40  ;;  %4270 = vmatpush.msrb.mxu3 %v8476_v42  ;;  %v4164_v30 = vand.u32 4294901760, %v4163_v18  ;;  %v4187_v20 = vsub.f32 %v8635_v14, %v9360_v51  ;;  %v4182_v46 = vand.u32 4294901760, %v4181_v59  ;;  %v8685_v49 = vand.u32 4294901760, %v4432_v45  ;;  %v4430_v59 = vld [vmem:[#allocation13 + $0x1e8] sm:$0xff]  ;;  %v4429_v51 = vld [vmem:[#allocation13 + $0x1e0] sm:$0xff] }
 0x431   : > { %3898 = vmatpush.msra.mxu0 %v8407_v5  ;;  %4141 = vmatpush.msrb.mxu1 %v4140_v56  ;;  %v4158_v5 = vand.u32 4294901760, %v4157_v63  ;;  %v9359_v56 = vand.u32 4294901760, %v8647_v7  ;;  %v4176_v63 = vand.u32 4294901760, %v4175_v58  ;;  %v8744_v27 = vand.u32 4294901760, %v4426_v39 }
 0x432   : > { %3901 = vmatmul.f32.vlgmr.msra.gmra.mxu0 %v8426_v19  ;;  %4224 = vmatpush.msrb.mxu2 %v8516_v61 }
 0x433   : > { %4072 = vmatpush.msrb.mxu0 %v8469_v54  ;;  %4272 = vmatpush.msrb.mxu3 %v8486_v23  ;;  %v4193_v18 = vsub.f32 %v8647_v7, %v9359_v56 }
 0x434   : > { %4147 = vmatpush.msrb.mxu1 %v4146_v36  ;;  %4227 = vmatpush.msrb.mxu2 %v8530_v22  ;;  %v9361_v36 = vand.u32 4294901760, %v8659_v1 }
 0x435   : > { %4074 = vmatpush.msrb.mxu0 %v8476_v42  ;;  %4274 = vmatpush.msrb.mxu3 %v8496_v37  ;;  %v4194_v56 = vand.u32 4294901760, %v4193_v18 }
 0x436   : > { %4153 = vmatpush.msrb.mxu1 %v4152_v16  ;;  %4230 = vmatpush.msrb.mxu2 %v8548_v26  ;;  %v4431_v16 = vld [vmem:[#allocation13 + $0x1f0] sm:$0xff]  ;;  %v4199_v58 = vsub.f32 %v8659_v1, %v9361_v36  ;;  %v8706_v36 = vand.u32 4294901760, %v4430_v59 }
 0x437   : > { %4076 = vmatpush.msrb.mxu0 %v8486_v23  ;;  %4276 = vmatpush.msrb.mxu3 %v8507_v25 }
 0x438   : > { %4159 = vmatpush.msrb.mxu1 %v4158_v5  ;;  %4233 = vmatpush.msrb.mxu2 %v8558_v53  ;;  %v9363_v5 = vand.u32 4294901760, %v8669_v41 }
 0x439   : > { %4078 = vmatpush.msrb.mxu0 %v8496_v37  ;;  %4278 = vmatpush.msrb.mxu3 %v8520_v21 }
 0x43a   : > { %4165 = vmatpush.msrb.mxu1 %v4164_v30  ;;  %4236 = vmatpush.msrb.mxu2 %v8571_v17  ;;  %v4188_v30 = vand.u32 4294901760, %v4187_v20  ;;  %v8702_v20 = vsub.f32 %v4432_v45, %v8685_v49  ;;  %v8714_v45 = vand.u32 4294901760, %v4429_v51 }
 0x43b   : > { %4080 = vmatpush.msrb.mxu0 %v8507_v25  ;;  %4280 = vmatpush.msrb.mxu3 %v8532_v12 }
 0x43c   : > { %4171 = vmatpush.msrb.mxu1 %v4170_v10  ;;  %4239 = vmatpush.msrb.mxu2 %v8587_v35  ;;  %v8693_v10 = vand.u32 4294901760, %v4431_v16  ;;  %v9370_v13 = vand.u32 4294901760, %v8702_v20 }
 0x43d   : > { %4082 = vmatpush.msrb.mxu0 %v8520_v21  ;;  %4282 = vmatpush.msrb.mxu3 %v8543_v50 }
 0x43e   : > { %4177 = vmatpush.msrb.mxu1 %v4176_v63  ;;  %4242 = vmatpush.msrb.mxu2 %v8599_v11  ;;  %v4205_v63 = vsub.f32 %v8669_v41, %v9363_v5  ;;  %v8710_v18 = vsub.f32 %v4431_v16, %v8693_v10  ;;  %v4427_v5 = vld [vmem:[#allocation13 + $0x1d0] sm:$0xff]  ;;  %v8723_v16 = vsub.f32 %v4430_v59, %v8706_v36 }
 0x43f   : > { %4084 = vmatpush.msrb.mxu0 %v8532_v12  ;;  %4284 = vmatpush.msrb.mxu3 %v8562_v28  ;;  %v4477_v59 = vsub.f32 %v8702_v20, %v9370_v13 }
 0x440   : > { %4183 = vmatpush.msrb.mxu1 %v4182_v46  ;;  %4245 = vmatpush.msrb.mxu2 %v8611_v62  ;;  %v4200_v46 = vand.u32 4294901760, %v4199_v58  ;;  %v4206_v55 = vand.u32 4294901760, %v4205_v63  ;;  %v9374_v58 = vand.u32 4294901760, %v8710_v18  ;;  %v8732_v63 = vsub.f32 %v4429_v51, %v8714_v45  ;;  %v4424_v51 = vld [vmem:[#allocation13 + $0x1b8] sm:$0xff] }
 0x441   : > { %4086 = vmatpush.msrb.mxu0 %v8543_v50  ;;  %4286 = vmatpush.msrb.mxu3 %v8576_v44  ;;  %v9377_v43 = vand.u32 4294901760, %v8723_v16  ;;  %v4478_v57 = vand.u32 4294901760, %v4477_v59  ;;  %v8770_v48 = vand.u32 4294901760, %v4424_v51 }
 0x442   : > { %4189 = vmatpush.msrb.mxu1 %v4188_v30  ;;  %4248 = vmatpush.msrb.mxu2 %v8623_v15  ;;  %v8718_v30 = vand.u32 4294901760, %v4428_v9  ;;  %v9379_v13 = vand.u32 4294901760, %v8732_v63 }
 0x443   : > { %4088 = vmatpush.msrb.mxu0 %v8562_v28  ;;  %4288 = vmatpush.msrb.mxu3 %v8589_v24 }
 0x444   : > { %4195 = vmatpush.msrb.mxu1 %v4194_v56  ;;  %4251 = vmatpush.msrb.mxu2 %v8635_v14  ;;  %v8727_v56 = vand.u32 4294901760, %v4427_v5 }
 0x445   : > { %4090 = vmatpush.msrb.mxu0 %v8576_v44  ;;  %4290 = vmatpush.msrb.mxu3 %v8601_v60 }
 0x446   : > { %4201 = vmatpush.msrb.mxu1 %v4200_v46  ;;  %4254 = vmatpush.msrb.mxu2 %v8647_v7  ;;  %v8739_v46 = vsub.f32 %v4428_v9, %v8718_v30  ;;  %v8752_v9 = vsub.f32 %v4427_v5, %v8727_v56  ;;  %v8768_v5 = vsub.f32 %v4426_v39, %v8744_v27 }
 0x447   : > { %4092 = vmatpush.msrb.mxu0 %v8589_v24  ;;  %4292 = vmatpush.msrb.mxu3 %v8613_v31  ;;  %v8781_v39 = vsub.f32 %v4425_v33, %v8757_v32  ;;  %v8793_v33 = vsub.f32 %v4424_v51, %v8770_v48 }
 0x448   : > { %4207 = vmatpush.msrb.mxu1 %v4206_v55  ;;  %4257 = vmatpush.msrb.mxu2 %v8659_v1  ;;  %9485 = vst [vmem:[#allocation25_spill] sm:$0xff] %v8739_v46  ;;  %v4483_v55 = vsub.f32 %v8710_v18, %v9374_v58  ;;  %v4423_v58 = vld [vmem:[#allocation13 + $0x1b0] sm:$0xff] }
 0x449   : > { %4094 = vmatpush.msrb.mxu0 %v8601_v60  ;;  %4294 = vmatpush.msrb.mxu3 %v8625_v0  ;;  %9486 = vst [vmem:[#allocation26_spill] sm:$0xff] %v8752_v9 }
 0x44a   : > { %4209 = vmatmul.f32.vlgmr.msrb.gmra.mxu1 %v8422_v29  ;;  %4260 = vmatpush.msrb.mxu2 %v8669_v41  ;;  %9487 = vst [vmem:[#allocation27_spill] sm:$0xff] %v8768_v5  ;;  %v4484_v59 = vand.u32 4294901760, %v4483_v55  ;;  %v9488_v55 = vand.u32 4294901760, %v8739_v46 }
 0x44b   : > { %4376 = vmatpush.msra.mxu1 %v8469_v54  ;;  %4096 = vmatpush.msrb.mxu0 %v8613_v31  ;;  %v4489_v54 = vsub.f32 %v8723_v16, %v9377_v43  ;;  %v8783_v43 = vand.u32 4294901760, %v4423_v58 }
 0x44c   : > { %4296 = vmatpush.msrb.mxu3 %v8637_v52  ;;  %4263 = vmatmul.f32.vlgmr.msrb.gmra.mxu2 %v8426_v19  ;;  %v4501_v34 = vsub.f32 %v8739_v46, %v9488_v55  ;;  %v8795_v19 = vand.u32 4294901760, %v4422_v47  ;;  %v4419_v46 = vld [vmem:[#allocation13 + $0x190] sm:$0xff] }
 0x44d   : > { %4378 = vmatpush.msra.mxu1 %v8476_v42  ;;  %4434 = vmatpush.msra.mxu2 %v8685_v49  ;;  %v4495_v42 = vsub.f32 %v8732_v63, %v9379_v13  ;;  %v8805_v51 = vsub.f32 %v4423_v58, %v8783_v43  ;;  %v8807_v13 = vand.u32 4294901760, %v4421_v4 }
 0x44e   : > { %4098 = vmatpush.msrb.mxu0 %v8625_v0  ;;  %4298 = vmatpush.msrb.mxu3 %v8649_v6  ;;  %v8818_v58 = vsub.f32 %v4422_v47, %v8795_v19 }
 0x44f   : > { %4302 = vmatmul.f32.vlgmr.msrb.gmra.mxu3 %v8431_v8  ;;  %4380 = vmatpush.msra.mxu1 %v8486_v23  ;;  %v4490_v23 = vand.u32 4294901760, %v4489_v54  ;;  %v4420_v8 = vld [vmem:[#allocation13 + $0x198] sm:$0xff]  ;;  %v8831_v47 = vsub.f32 %v4421_v4, %v8807_v13  ;;  %v8833_v54 = vand.u32 4294901760, %v4419_v46 }
 0x450   : > { %4436 = vmatpush.msra.mxu2 %v8693_v10  ;;  %4479 = vmatpush.msra.mxu3 %v4478_v57  ;;  %v9489_v57 = vand.u32 4294901760, %v8752_v9 }
 0x451   : > { %4100 = vmatpush.msrb.mxu0 %v8637_v52  ;;  %4382 = vmatpush.msra.mxu1 %v8496_v37  ;;  %v4496_v37 = vand.u32 4294901760, %v4495_v42 }
 0x452   : > { %4438 = vmatpush.msra.mxu2 %v8706_v36  ;;  %4485 = vmatpush.msra.mxu3 %v4484_v59  ;;  %v4507_v55 = vsub.f32 %v8752_v9, %v9489_v57  ;;  %v4502_v59 = vand.u32 4294901760, %v4501_v34  ;;  %v9490_v57 = vand.u32 4294901760, %v8484_v38  ;;  %v8820_v9 = vand.u32 4294901760, %v4420_v8 }
 0x453   : > { %4102 = vmatpush.msrb.mxu0 %v8649_v6  ;;  %4384 = vmatpush.msra.mxu1 %v8507_v25  ;;  %v9491_v25 = vand.u32 4294901760, %v8768_v5  ;;  %v9492_v38 = vand.u32 4294901760, %v8494_v2  ;;  %v9494_v2 = vand.u32 4294901760, %v8505_v40  ;;  %v9496_v40 = vand.u32 4294901760, %v8516_v61 }
 0x454   : > { %4108 = vmatmul.f32.vlgmr.msrb.gmra.mxu0 %v8443_v3  ;;  %4440 = vmatpush.msra.mxu2 %v8714_v45  ;;  %v4508_v34 = vand.u32 4294901760, %v4507_v55  ;;  %v9495_v55 = vand.u32 4294901760, %v8793_v33  ;;  %v8844_v4 = vsub.f32 %v4420_v8, %v8820_v9  ;;  %v8857_v8 = vsub.f32 %v4419_v46, %v8833_v54 }
 0x455   : > { %4309 = vmatpush.msra.mxu0 %v9490_v57  ;;  %4491 = vmatpush.msra.mxu3 %v4490_v23  ;;  %v4513_v42 = vsub.f32 %v8768_v5, %v9491_v25  ;;  %v9493_v23 = vand.u32 4294901760, %v8781_v39  ;;  %v4530_v25 = vand.u32 4294901760, %v8805_v51  ;;  %v4418_v5 = vld [vmem:[#allocation13 + $0x188] sm:$0xff]  ;;  %v9497_v61 = vand.u32 4294901760, %v8530_v22 }
 0x456   : > { %4386 = vmatpush.msra.mxu1 %v8520_v21  ;;  %4442 = vmatpush.msra.mxu2 %v8718_v30  ;;  %v9498_v46 = vand.u32 4294901760, %v8548_v26 }
 0x457   : > { %4313 = vmatpush.msra.mxu0 %v9492_v38  ;;  %4497 = vmatpush.msra.mxu3 %v4496_v37  ;;  %v4519_v57 = vsub.f32 %v8781_v39, %v9493_v23  ;;  %v4514_v21 = vand.u32 4294901760, %v4513_v42  ;;  %v4525_v37 = vsub.f32 %v8793_v33, %v9495_v55  ;;  %v4536_v38 = vand.u32 4294901760, %v8818_v58  ;;  %v4417_v23 = vld [vmem:[#allocation13 + $0x180] sm:$0xff] }
 0x458   : > { %4388 = vmatpush.msra.mxu1 %v8532_v12  ;;  %4444 = vmatpush.msra.mxu2 %v8727_v56  ;;  %v8848_v12 = vand.u32 4294901760, %v4418_v5  ;;  %v4531_v42 = vsub.f32 %v8805_v51, %v4530_v25  ;;  %v4548_v55 = vand.u32 4294901760, %v8844_v4 }
 0x459   : > { %4317 = vmatpush.msra.mxu0 %v9494_v2  ;;  %4503 = vmatpush.msra.mxu3 %v4502_v59  ;;  %v4520_v59 = vand.u32 4294901760, %v4519_v57  ;;  %v4542_v2 = vand.u32 4294901760, %v8831_v47  ;;  %v4537_v57 = vsub.f32 %v8818_v58, %v4536_v38 }
 0x45a   : > { %4390 = vmatpush.msra.mxu1 %v8543_v50  ;;  %4446 = vmatpush.msra.mxu2 %v8744_v27  ;;  %v8861_v50 = vand.u32 4294901760, %v4417_v23  ;;  %v4532_v22 = vand.u32 4294901760, %v4531_v42 }
 0x45b   : > { %4321 = vmatpush.msra.mxu0 %v9496_v40  ;;  %4509 = vmatpush.msra.mxu3 %v4508_v34  ;;  %v4526_v34 = vand.u32 4294901760, %v4525_v37  ;;  %v4554_v37 = vand.u32 4294901760, %v8857_v8  ;;  %v4538_v26 = vand.u32 4294901760, %v4537_v57  ;;  %v4549_v40 = vsub.f32 %v8844_v4, %v4548_v55 }
 0x45c   : > { %4392 = vmatpush.msra.mxu1 %v8562_v28  ;;  %4448 = vmatpush.msra.mxu2 %v8757_v32  ;;  %v8872_v28 = vsub.f32 %v4418_v5, %v8848_v12  ;;  %v9499_v5 = vand.u32 4294901760, %v8558_v53  ;;  %v9504_v57 = vand.u32 4294901760, %v8623_v15  ;;  %v9507_v15 = vand.u32 4294901760, %v8647_v7 }
 0x45d   : > { %4325 = vmatpush.msra.mxu0 %v9497_v61  ;;  %4515 = vmatpush.msra.mxu3 %v4514_v21  ;;  %v4543_v21 = vsub.f32 %v8831_v47, %v4542_v2  ;;  %v4555_v53 = vsub.f32 %v8857_v8, %v4554_v37  ;;  %v4550_v61 = vand.u32 4294901760, %v4549_v40  ;;  %v9511_v7 = vand.u32 4294901760, %v8669_v41  ;;  %v9515_v41 = vld [vmem:[#allocation26_spill] sm:$0xff] }
 0x45e   : > { %4394 = vmatpush.msra.mxu1 %v8576_v44  ;;  %4450 = vmatpush.msra.mxu2 %v8770_v48  ;;  %v8883_v44 = vsub.f32 %v4417_v23, %v8861_v50 }
 0x45f   : > { %4329 = vmatpush.msra.mxu0 %v9498_v46  ;;  %4521 = vmatpush.msra.mxu3 %v4520_v59  ;;  %v9500_v59 = vand.u32 4294901760, %v8571_v17  ;;  %v4544_v23 = vand.u32 4294901760, %v4543_v21  ;;  %v9508_v46 = vand.u32 4294901760, %v8710_v18 }
 0x460   : > { %4396 = vmatpush.msra.mxu1 %v8589_v24  ;;  %4452 = vmatpush.msra.mxu2 %v8783_v43  ;;  %v4560_v24 = vand.u32 4294901760, %v8872_v28  ;;  %v4566_v42 = vand.u32 4294901760, %v8883_v44 }
 0x461   : > { %4333 = vmatpush.msra.mxu0 %v9499_v5  ;;  %4527 = vmatpush.msra.mxu3 %v4526_v34  ;;  %v9502_v34 = vand.u32 4294901760, %v8599_v11 }
 0x462   : > { %4398 = vmatpush.msra.mxu1 %v8601_v60  ;;  %4454 = vmatpush.msra.mxu2 %v8795_v19  ;;  %v9501_v60 = vand.u32 4294901760, %v8587_v35  ;;  %v4561_v17 = vsub.f32 %v8872_v28, %v4560_v24  ;;  %v4567_v35 = vsub.f32 %v8883_v44, %v4566_v42 }
 0x463   : > { %4337 = vmatpush.msra.mxu0 %v9500_v59  ;;  %4533 = vmatpush.msra.mxu3 %v4532_v22  ;;  %v9512_v22 = vand.u32 4294901760, %v8732_v63  ;;  %v4784_v59 = vld [vmem:[#allocation10 + $0x40] sm:$0xff] }
 0x464   : > { %4400 = vmatpush.msra.mxu1 %v8613_v31  ;;  %4456 = vmatpush.msra.mxu2 %v8807_v13  ;;  %v4556_v31 = vand.u32 4294901760, %v4555_v53  ;;  %v4562_v11 = vand.u32 4294901760, %v4561_v17  ;;  %v4783_v17 = vld [vmem:[#allocation10 + $0x38] sm:$0xff] }
 0x465   : > { %4341 = vmatpush.msra.mxu0 %v9501_v60  ;;  %4539 = vmatpush.msra.mxu3 %v4538_v26  ;;  %v9087_v60 = vand.u32 4294901760, %v4784_v59 }
 0x466   : > { %4402 = vmatpush.msra.mxu1 %v8625_v0  ;;  %4458 = vmatpush.msra.mxu2 %v8820_v9  ;;  %v9503_v0 = vand.u32 4294901760, %v8611_v62  ;;  %v9505_v62 = vand.u32 4294901760, %v8635_v14  ;;  %v9510_v14 = vand.u32 4294901760, %v8723_v16 }
 0x467   : > { %4345 = vmatpush.msra.mxu0 %v9502_v34  ;;  %4545 = vmatpush.msra.mxu3 %v4544_v23 }
 0x468   : > { %4404 = vmatpush.msra.mxu1 %v8637_v52  ;;  %4460 = vmatpush.msra.mxu2 %v8833_v54  ;;  %v4568_v52 = vand.u32 4294901760, %v4567_v35  ;;  %v9100_v35 = vsub.f32 %v4784_v59, %v9087_v60 }
 0x469   : > { %4349 = vmatpush.msra.mxu0 %v9503_v0  ;;  %4551 = vmatpush.msra.mxu3 %v4550_v61 }
 0x46a   : > { %4406 = vmatpush.msra.mxu1 %v8649_v6  ;;  %4462 = vmatpush.msra.mxu2 %v8848_v12  ;;  %v9506_v6 = vand.u32 4294901760, %v8702_v20 }
 0x46b   : > { %4353 = vmatpush.msra.mxu0 %v9504_v57  ;;  %4557 = vmatpush.msra.mxu3 %v4556_v31  ;;  %v4782_v57 = vld [vmem:[#allocation10 + $0x30] sm:$0xff] }
 0x46c   : > { %4408 = vmatmul.f32.vlgmr.msra.gmra.mxu1 %v8422_v29  ;;  %4464 = vmatpush.msra.mxu2 %v8861_v50 }
 0x46d   : > { %4630 = vmatpush.msrb.mxu1 %v8685_v49  ;;  %4357 = vmatpush.msra.mxu0 %v9505_v62 }
 0x46e   : > { %4563 = vmatpush.msra.mxu3 %v4562_v11  ;;  %4470 = vmatmul.f32.vlgmr.msra.gmra.mxu2 %v8443_v3  ;;  %v9509_v3 = vand.u32 4294901760, %v8659_v1  ;;  %v9513_v1 = vld [vmem:[#allocation25_spill] sm:$0xff]  ;;  %v9103_v11 = vand.u32 4294901760, %v4783_v17 }
 0x46f   : > { %4632 = vmatpush.msrb.mxu1 %v8693_v10  ;;  %4671 = vmatpush.msrb.mxu2 %v9506_v6  ;;  %v4877_v6 = vand.u32 4294901760, %v9100_v35 }
 0x470   : > { %4361 = vmatpush.msra.mxu0 %v9507_v15  ;;  %4569 = vmatpush.msra.mxu3 %v4568_v52  ;;  %v9113_v15 = vsub.f32 %v4783_v17, %v9103_v11 }
 0x471   : > { %4571 = vmatmul.f32.vlgmr.msra.gmra.mxu3 %v8422_v29  ;;  %4634 = vmatpush.msrb.mxu1 %v8706_v36 }
 0x472   : > { %4675 = vmatpush.msrb.mxu2 %v9508_v46  ;;  %4738 = vmatpush.msrb.mxu3 %v8685_v49  ;;  %v9514_v49 = vand.u32 4294901760, %v9513_v1  ;;  %v9115_v46 = vand.u32 4294901760, %v4782_v57 }
 0x473   : > { %4365 = vmatpush.msra.mxu0 %v9509_v3  ;;  %4636 = vmatpush.msrb.mxu1 %v8714_v45  ;;  %v4781_v3 = vld [vmem:[#allocation10 + $0x28] sm:$0xff] }
 0x474   : > { %4679 = vmatpush.msrb.mxu2 %v9510_v14  ;;  %4740 = vmatpush.msrb.mxu3 %v8693_v10  ;;  %v9516_v10 = vand.u32 4294901760, %v9515_v41 }
 0x475   : > { %4369 = vmatpush.msra.mxu0 %v9511_v7  ;;  %4638 = vmatpush.msrb.mxu1 %v8718_v30  ;;  %v4878_v7 = vsub.f32 %v9100_v35, %v4877_v6 }
 0x476   : > { %4371 = vmatmul.f32.vlgmr.msra.gmra.mxu0 %v8422_v29  ;;  %4683 = vmatpush.msrb.mxu2 %v9512_v22  ;;  %v9121_v22 = vand.u32 4294901760, %v4781_v3 }
 0x477   : > { %4577 = vmatpush.msrb.mxu0 %v8702_v20  ;;  %4742 = vmatpush.msrb.mxu3 %v8706_v36  ;;  %v9517_v36 = vld [vmem:[#allocation27_spill] sm:$0xff] }
 0x478   : > { %4640 = vmatpush.msrb.mxu1 %v8727_v56  ;;  %4687 = vmatpush.msrb.mxu2 %v9514_v49  ;;  %v9518_v20 = vand.u32 4294901760, %v9517_v36  ;;  %v9127_v49 = vsub.f32 %v4782_v57, %v9115_v46 }
 0x479   : > { %4580 = vmatpush.msrb.mxu0 %v8710_v18  ;;  %4744 = vmatpush.msrb.mxu3 %v8714_v45  ;;  %v9519_v18 = vand.u32 4294901760, %v8781_v39  ;;  %v9520_v45 = vand.u32 4294901760, %v8793_v33 }
 0x47a   : > { %4642 = vmatpush.msrb.mxu1 %v8744_v27  ;;  %4691 = vmatpush.msrb.mxu2 %v9516_v10  ;;  %v4879_v10 = vand.u32 4294901760, %v4878_v7 }
 0x47b   : > { %4583 = vmatpush.msrb.mxu0 %v8723_v16  ;;  %4746 = vmatpush.msrb.mxu3 %v8718_v30 }
 0x47c   : > { %4644 = vmatpush.msrb.mxu1 %v8757_v32  ;;  %4695 = vmatpush.msrb.mxu2 %v9518_v20 }
 0x47d   : > { %4586 = vmatpush.msrb.mxu0 %v8732_v63  ;;  %4748 = vmatpush.msrb.mxu3 %v8727_v56 }
 0x47e   : > { %4646 = vmatpush.msrb.mxu1 %v8770_v48  ;;  %4699 = vmatpush.msrb.mxu2 %v9519_v18  ;;  %v4779_v18 = vld [vmem:[#allocation10 + $0x18] sm:$0xff] }
 0x47f   : > { %4589 = vmatpush.msrb.mxu0 %v9513_v1  ;;  %4750 = vmatpush.msrb.mxu3 %v8744_v27  ;;  %v4883_v1 = vand.u32 4294901760, %v9113_v15 }
 0x480   : > { %4648 = vmatpush.msrb.mxu1 %v8783_v43  ;;  %4703 = vmatpush.msrb.mxu2 %v9520_v45  ;;  %v4778_v45 = vld [vmem:[#allocation10 + $0x10] sm:$0xff] }
 0x481   : > { %4592 = vmatpush.msrb.mxu0 %v9515_v41  ;;  %4752 = vmatpush.msrb.mxu3 %v8757_v32  ;;  %v4791_v32 = vld [vmem:[#allocation10 + $0x78] sm:$0xff]  ;;  %v4780_v41 = vld [vmem:[#allocation10 + $0x20] sm:$0xff] }
 0x482   : > { %4650 = vmatpush.msrb.mxu1 %v8795_v19  ;;  %4707 = vmatpush.msrb.mxu2 %v4530_v25  ;;  %v9018_v27 = vand.u32 4294901760, %v4791_v32  ;;  %v9133_v20 = vand.u32 4294901760, %v4780_v41 }
 0x483   : > { %4595 = vmatpush.msrb.mxu0 %v9517_v36  ;;  %4754 = vmatpush.msrb.mxu3 %v8770_v48  ;;  %v9522_v48 = vld [vmem:[#allocation23_spill] sm:$0xff]  ;;  %v9131_v36 = vsub.f32 %v4781_v3, %v9121_v22 }
 0x484   : > { %4652 = vmatpush.msrb.mxu1 %v8807_v13  ;;  %4711 = vmatpush.msrb.mxu2 %v4536_v38 }
 0x485   : > { %4598 = vmatpush.msrb.mxu0 %v8781_v39  ;;  %4756 = vmatpush.msrb.mxu3 %v8783_v43  ;;  %v4790_v43 = vld [vmem:[#allocation10 + $0x70] sm:$0xff] }
 0x486   : > { %4654 = vmatpush.msrb.mxu1 %v8820_v9  ;;  %4715 = vmatpush.msrb.mxu2 %v4542_v2  ;;  %v9023_v30 = vand.u32 4294901760, %v4790_v43  ;;  %v4786_v2 = vld [vmem:[#allocation10 + $0x50] sm:$0xff] }
 0x487   : > { %4601 = vmatpush.msrb.mxu0 %v8793_v33  ;;  %4758 = vmatpush.msrb.mxu3 %v8795_v19  ;;  %v9521_v19 = vld [vmem:[#allocation24_spill] sm:$0xff] }
 0x488   : > { %4656 = vmatpush.msrb.mxu1 %v8833_v54  ;;  %4719 = vmatpush.msrb.mxu2 %v4548_v55  ;;  %v9029_v56 = vsub.f32 %v4790_v43, %v9023_v30  ;;  %v9141_v43 = vand.u32 4294901760, %v4779_v18 }
 0x489   : > { %4604 = vmatpush.msrb.mxu0 %v8805_v51  ;;  %4760 = vmatpush.msrb.mxu3 %v8807_v13  ;;  %v9021_v13 = vsub.f32 %v4791_v32, %v9018_v27  ;;  %v4889_v32 = vand.u32 4294901760, %v9127_v49 }
 0x48a   : > { %4658 = vmatpush.msrb.mxu1 %v8848_v12  ;;  %4723 = vmatpush.msrb.mxu2 %v4554_v37  ;;  %v4841_v33 = vand.u32 4294901760, %v9029_v56  ;;  %v4785_v37 = vld [vmem:[#allocation10 + $0x48] sm:$0xff] }
 0x48b   : > { %4607 = vmatpush.msrb.mxu0 %v8818_v58  ;;  %4762 = vmatpush.msrb.mxu3 %v8820_v9  ;;  %v4835_v16 = vand.u32 4294901760, %v9021_v13  ;;  %v4788_v9 = vld [vmem:[#allocation10 + $0x60] sm:$0xff]  ;;  %v4787_v58 = vld [vmem:[#allocation10 + $0x58] sm:$0xff]  ;;  %v9078_v40 = vand.u32 4294901760, %v4785_v37 }
 0x48c   : > { %4660 = vmatpush.msrb.mxu1 %v8861_v50  ;;  %4727 = vmatpush.msrb.mxu2 %v4560_v24  ;;  %v9043_v51 = vand.u32 4294901760, %v4788_v9 }
 0x48d   : > { %4610 = vmatpush.msrb.mxu0 %v8831_v47  ;;  %4764 = vmatpush.msrb.mxu3 %v8833_v54  ;;  %v4836_v39 = vsub.f32 %v9021_v13, %v4835_v16  ;;  %v4842_v47 = vsub.f32 %v9029_v56, %v4841_v33 }
 0x48e   : > { %4664 = vmatmul.f32.vlgmr.msrb.gmra.mxu1 %v9521_v19  ;;  %4731 = vmatpush.msrb.mxu2 %v4566_v42  ;;  %v9085_v42 = vsub.f32 %v4785_v37, %v9078_v40  ;;  %v4777_v19 = vld [vmem:[#allocation10 + $0x8] sm:$0xff] }
 0x48f   : > { %4613 = vmatpush.msrb.mxu0 %v8844_v4  ;;  %4766 = vmatpush.msrb.mxu3 %v8848_v12  ;;  %v4837_v25 = vand.u32 4294901760, %v4836_v39  ;;  %v9053_v4 = vsub.f32 %v4788_v9, %v9043_v51  ;;  %v9057_v12 = vand.u32 4294901760, %v4787_v58  ;;  %v4776_v9 = vld [vmem:[#allocation10] sm:$0xff]  ;;  %v4895_v39 = vand.u32 4294901760, %v9131_v36 }
 0x490   : > { %4733 = vmatmul.f32.vlgmr.msrb.gmra.mxu2 %v8422_v29  ;;  %v4871_v31 = vand.u32 4294901760, %v9085_v42 }
 0x491   : > { %4616 = vmatpush.msrb.mxu0 %v8857_v8  ;;  %4768 = vmatpush.msrb.mxu3 %v8861_v50  ;;  %v4843_v8 = vand.u32 4294901760, %v4842_v47  ;;  %v4853_v55 = vand.u32 4294901760, %v9053_v4  ;;  %v9068_v21 = vsub.f32 %v4787_v58, %v9057_v12  ;;  %v9148_v58 = vsub.f32 %v4780_v41, %v9133_v20 }
 0x492   : > { %4770 = vmatmul.f32.vlgmr.msrb.gmra.mxu3 %v8422_v29  ;;  %v4789_v29 = vld [vmem:[#allocation10 + $0x68] sm:$0xff]  ;;  %4936 = vmatpush.msra.mxu2 %v9021_v13  ;;  %v4872_v62 = vsub.f32 %v9085_v42, %v4871_v31  ;;  %v9152_v47 = vand.u32 4294901760, %v4776_v9  ;;  %v3487_v13 = vpop.f32.mrf.mxu1 }
 0x493   : > { %4619 = vmatpush.msrb.mxu0 %v8872_v28  ;;  %4989 = vmatpush.msra.mxu3 %v9018_v27  ;;  %v9031_v63 = vand.u32 4294901760, %v4789_v29  ;;  %v9064_v28 = vand.u32 4294901760, %v4786_v2  ;;  %v4854_v5 = vsub.f32 %v9053_v4, %v4853_v55  ;;  %v4859_v24 = vand.u32 4294901760, %v9068_v21 }
 0x494   : > { %4939 = vmatpush.msra.mxu2 %v9029_v56  ;;  %4838 = vmatpush.msra.mxu1 %v4837_v25  ;;  %v4873_v14 = vand.u32 4294901760, %v4872_v62  ;;  %v9150_v25 = vand.u32 4294901760, %v4777_v19  ;;  %v3580_v56 = vpop.f32.mrf.mxu3 }
 0x495   : > { %4622 = vmatpush.msrb.mxu0 %v8883_v44  ;;  %4991 = vmatpush.msra.mxu3 %v9023_v30  ;;  %v9041_v54 = vsub.f32 %v4789_v29, %v9031_v63  ;;  %v9076_v26 = vsub.f32 %v4786_v2, %v9064_v28  ;;  %v4855_v23 = vand.u32 4294901760, %v4854_v5  ;;  %v4860_v61 = vsub.f32 %v9068_v21, %v4859_v24 }
 0x496   : > { %4625 = vmatmul.f32.vlgmr.msrb.gmra.mxu0 %v9522_v48  ;;  %4844 = vmatpush.msra.mxu1 %v4843_v8  ;;  %v4884_v48 = vsub.f32 %v9113_v15, %v4883_v1  ;;  %v9143_v29 = vand.u32 4294901760, %v4778_v45  ;;  %v4890_v8 = vsub.f32 %v9127_v49, %v4889_v32  ;;  %v4901_v5 = vand.u32 4294901760, %v9148_v58 }
 0x497   : > { %4793 = vmatpush.msra.mxu0 %v9018_v27  ;;  %4993 = vmatpush.msra.mxu3 %v9031_v63  ;;  %v4847_v38 = vand.u32 4294901760, %v9041_v54  ;;  %v4865_v53 = vand.u32 4294901760, %v9076_v26  ;;  %v4861_v0 = vand.u32 4294901760, %v4860_v61  ;;  %v9171_v59 = vsub.f32 %v4777_v19, %v9150_v25 }
 0x498   : > { %4942 = vmatpush.msra.mxu2 %v9041_v54  ;;  %v4885_v2 = vand.u32 4294901760, %v4884_v48  ;;  %v9163_v37 = vsub.f32 %v4778_v45, %v9143_v29  ;;  %v4891_v61 = vand.u32 4294901760, %v4890_v8  ;;  %v4902_v57 = vsub.f32 %v9148_v58, %v4901_v5 }
 0x499   : > { %4795 = vmatpush.msra.mxu0 %v9023_v30  ;;  %4995 = vmatpush.msra.mxu3 %v9043_v51  ;;  %v4848_v50 = vsub.f32 %v9041_v54, %v4847_v38  ;;  %v4866_v34 = vsub.f32 %v9076_v26, %v4865_v53 }
 0x49a   : > { %4945 = vmatpush.msra.mxu2 %v9053_v4  ;;  %v4903_v7 = vand.u32 4294901760, %v4902_v57 }
 0x49b   : > { %4797 = vmatpush.msra.mxu0 %v9031_v63  ;;  %4997 = vmatpush.msra.mxu3 %v9057_v12  ;;  %v4849_v44 = vand.u32 4294901760, %v4848_v50  ;;  %v4867_v52 = vand.u32 4294901760, %v4866_v34  ;;  %v9160_v50 = vsub.f32 %v4779_v18, %v9141_v43  ;;  %v4913_v34 = vand.u32 4294901760, %v9163_v37 }
 0x49c   : > { %4948 = vmatpush.msra.mxu2 %v9068_v21 }
 0x49d   : > { %4799 = vmatpush.msra.mxu0 %v9043_v51  ;;  %4850 = vmatpush.msra.mxu1 %v4849_v44  ;;  %v4896_v44 = vsub.f32 %v9131_v36, %v4895_v39  ;;  %v4907_v17 = vand.u32 4294901760, %v9160_v50  ;;  %v4914_v3 = vsub.f32 %v9163_v37, %v4913_v34 }
 0x49e   : > { %4999 = vmatpush.msra.mxu3 %v9064_v28  ;;  %4951 = vmatpush.msra.mxu2 %v9076_v26 }
 0x49f   : > { %4801 = vmatpush.msra.mxu0 %v9057_v12  ;;  %4856 = vmatpush.msra.mxu1 %v4855_v23  ;;  %v9174_v23 = vsub.f32 %v4776_v9, %v9152_v47  ;;  %v4908_v62 = vsub.f32 %v9160_v50, %v4907_v17  ;;  %v4915_v18 = vand.u32 4294901760, %v4914_v3  ;;  %v3386_v9 = vpop.f32.mrf.mxu0 }
 0x4a0   : > { %5001 = vmatpush.msra.mxu3 %v9078_v40  ;;  %4954 = vmatpush.msra.mxu2 %v9085_v42  ;;  %v3488_v21 = vadd.f32 %v3487_v13, %v3386_v9 }
 0x4a1   : > { %4803 = vmatpush.msra.mxu0 %v9064_v28  ;;  %4862 = vmatpush.msra.mxu1 %v4861_v0  ;;  %v4897_v0 = vand.u32 4294901760, %v4896_v44  ;;  %v4909_v41 = vand.u32 4294901760, %v4908_v62  ;;  %v9523_v44 = vld [vmem:[#allocation28_spill] sm:$0xff] }
 0x4a2   : > { %5003 = vmatpush.msra.mxu3 %v9087_v60  ;;  %4957 = vmatpush.msra.mxu2 %v9100_v35 }
 0x4a3   : > { %4805 = vmatpush.msra.mxu0 %v9078_v40  ;;  %4868 = vmatpush.msra.mxu1 %v4867_v52  ;;  %v4919_v52 = vand.u32 4294901760, %v9171_v59 }
 0x4a4   : > { %5005 = vmatpush.msra.mxu3 %v9103_v11  ;;  %4960 = vmatpush.msra.mxu2 %v9113_v15 }
 0x4a5   : > { %4807 = vmatpush.msra.mxu0 %v9087_v60  ;;  %4874 = vmatpush.msra.mxu1 %v4873_v14  ;;  %v4925_v14 = vand.u32 4294901760, %v9174_v23 }
 0x4a6   : > { %5007 = vmatpush.msra.mxu3 %v9115_v46  ;;  %4963 = vmatpush.msra.mxu2 %v9127_v49 }
 0x4a7   : > { %4809 = vmatpush.msra.mxu0 %v9103_v11  ;;  %4880 = vmatpush.msra.mxu1 %v4879_v10  ;;  %v4920_v10 = vsub.f32 %v9171_v59, %v4919_v52  ;;  %v4926_v45 = vsub.f32 %v9174_v23, %v4925_v14 }
 0x4a8   : > { %5009 = vmatpush.msra.mxu3 %v9121_v22  ;;  %4966 = vmatpush.msra.mxu2 %v9131_v36 }
 0x4a9   : > { %4811 = vmatpush.msra.mxu0 %v9115_v46  ;;  %4886 = vmatpush.msra.mxu1 %v4885_v2  ;;  %v4921_v19 = vand.u32 4294901760, %v4920_v10  ;;  %v4927_v48 = vand.u32 4294901760, %v4926_v45 }
 0x4aa   : > { %5011 = vmatpush.msra.mxu3 %v9133_v20  ;;  %4969 = vmatpush.msra.mxu2 %v9148_v58 }
 0x4ab   : > { %4813 = vmatpush.msra.mxu0 %v9121_v22  ;;  %4892 = vmatpush.msra.mxu1 %v4891_v61 }
 0x4ac   : > { %5013 = vmatpush.msra.mxu3 %v9141_v43  ;;  %4972 = vmatpush.msra.mxu2 %v9160_v50 }
 0x4ad   : > { %4815 = vmatpush.msra.mxu0 %v9133_v20  ;;  %4898 = vmatpush.msra.mxu1 %v4897_v0  ;;  %v4415_v0 = vpop.permute.xlu0 %4414 }
 0x4ae   : > { %5015 = vmatpush.msra.mxu3 %v9143_v29  ;;  %4975 = vmatpush.msra.mxu2 %v9163_v37 }
 0x4af   : > { %4817 = vmatpush.msra.mxu0 %v9141_v43  ;;  %4904 = vmatpush.msra.mxu1 %v4903_v7 }
 0x4b0   : > { %5017 = vmatpush.msra.mxu3 %v9150_v25  ;;  %4978 = vmatpush.msra.mxu2 %v9171_v59 }
 0x4b1   : > { %4819 = vmatpush.msra.mxu0 %v9143_v29  ;;  %4910 = vmatpush.msra.mxu1 %v4909_v41 }
 0x4b2   : > { %5019 = vmatpush.msra.mxu3 %v9152_v47  ;;  %4981 = vmatpush.msra.mxu2 %v9174_v23 }
 0x4b3   : > { %4821 = vmatpush.msra.mxu0 %v9150_v25  ;;  %4916 = vmatpush.msra.mxu1 %v4915_v18 }
 0x4b5   : > { %4823 = vmatpush.msra.mxu0 %v9152_v47  ;;  %4922 = vmatpush.msra.mxu1 %v4921_v19 }
 0x4b7   : > { %5030 = vmatpush.msrb.mxu0 %v4835_v16  ;;  %4928 = vmatpush.msra.mxu1 %v4927_v48  ;;  %v3541_v16 = vpop.f32.mrf.mxu2 }
 0x4b8   : > { %v3542_v42 = vadd.f32 %v3541_v16, %v3488_v21 }
 0x4b9   : > { %5034 = vmatpush.msrb.mxu0 %v4841_v33  ;;  %5097 = vmatpush.msrb.mxu1 %v9018_v27  ;;  %v3649_v27 = vpop.f32.mrf.mxu0  ;;  %v3848_v33 = vpop.f32.mrf.mxu3 }
 0x4ba   : > { %v3581_v15 = vadd.f32 %v3580_v56, %v3542_v42 }
 0x4bb   : > { %5038 = vmatpush.msrb.mxu0 %v4847_v38  ;;  %5099 = vmatpush.msrb.mxu1 %v9023_v30  ;;  %v3686_v30 = vpop.f32.mrf.mxu1 }
 0x4bc   : > { %v3650_v36 = vadd.f32 %v3649_v27, %v3581_v15 }
 0x4bd   : > { %5042 = vmatpush.msrb.mxu0 %v4853_v55  ;;  %5101 = vmatpush.msrb.mxu1 %v9031_v63 }
 0x4bf   : > { %5046 = vmatpush.msrb.mxu0 %v4859_v24  ;;  %5103 = vmatpush.msrb.mxu1 %v9043_v51  ;;  %v3747_v63 = vpop.f32.mrf.mxu2 }
 0x4c0   : > { %v3849_v55 = vadd.f32 %v3848_v33, %v3747_v63 }
 0x4c1   : > { %5050 = vmatpush.msrb.mxu0 %v4865_v53  ;;  %5105 = vmatpush.msrb.mxu1 %v9057_v12  ;;  %v3902_v54 = vpop.f32.mrf.mxu0  ;;  %v4047_v4 = vpop.f32.mrf.mxu3 }
 0x4c2   : > { %v3903_v26 = vadd.f32 %v3902_v54, %v3849_v55 }
 0x4c3   : > { %5054 = vmatpush.msrb.mxu0 %v4871_v31  ;;  %5107 = vmatpush.msrb.mxu1 %v9064_v28  ;;  %v3941_v51 = vpop.f32.mrf.mxu1 }
 0x4c5   : > { %5058 = vmatpush.msrb.mxu0 %v4877_v6  ;;  %5109 = vmatpush.msrb.mxu1 %v9078_v40 }
 0x4c7   : > { %5062 = vmatpush.msrb.mxu0 %v4883_v1  ;;  %5111 = vmatpush.msrb.mxu1 %v9087_v60  ;;  %v4010_v38 = vpop.f32.mrf.mxu2  ;;  %v3942_v60 = vadd.f32 %v3941_v51, %v3903_v26 }
 0x4c9   : > { %5066 = vmatpush.msrb.mxu0 %v4889_v32  ;;  %5113 = vmatpush.msrb.mxu1 %v9103_v11  ;;  %v3691_v11 = vpop.permute.xlu2 %3690 }
 0x4cb   : > { %5070 = vmatpush.msrb.mxu0 %v4895_v39  ;;  %5115 = vmatpush.msrb.mxu1 %v9115_v46  ;;  %v4210_v28 = vpop.f32.mrf.mxu1  ;;  %v4011_v46 = vadd.f32 %v4010_v38, %v3942_v60  ;;  %v3687_v39 = vadd.f32 %v3686_v30, %v3650_v36 }
 0x4cd   : > { %5074 = vmatpush.msrb.mxu0 %v4901_v5  ;;  %5117 = vmatpush.msrb.mxu1 %v9121_v22  ;;  %v4048_v32 = vadd.f32 %v4047_v4, %v4011_v46  ;;  %v3689_v5 = vmul.f32 %v3687_v39, %v9523_v44 }
 0x4cf   : > { %5078 = vmatpush.msrb.mxu0 %v4907_v17  ;;  %5119 = vmatpush.msrb.mxu1 %v9133_v20  ;;  %v4264_v24 = vpop.f32.mrf.mxu2  ;;  %v4050_v8 = vmul.f32 %v4048_v32, %v3691_v11 }
 0x4d1   : > { %5082 = vmatpush.msrb.mxu0 %v4913_v34  ;;  %v4109_v12 = vpop.f32.mrf.mxu0  ;;  %5121 = vmatpush.msrb.mxu1 %v9141_v43  ;;  %v4051_v17 = vadd.f32 %v4050_v8, %v3689_v5 }
 0x4d2   : > { %v4211_v40 = vadd.f32 %v4210_v28, %v4109_v12  ;;  %v4303_v53 = vpop.f32.mrf.mxu3 }
 0x4d3   : > { %5086 = vmatpush.msrb.mxu0 %v4919_v52  ;;  %5123 = vmatpush.msrb.mxu1 %v9143_v29 }
 0x4d4   : > { %v4265_v31 = vadd.f32 %v4264_v24, %v4211_v40 }
 0x4d5   : > { %5090 = vmatpush.msrb.mxu0 %v4925_v14  ;;  %5125 = vmatpush.msrb.mxu1 %v9150_v25 }
 0x4d6   : > { %v4304_v22 = vadd.f32 %v4303_v53, %v4265_v31 }
 0x4d7   : > { %5127 = vmatpush.msrb.mxu1 %v9152_v47  ;;  %v4053_v47 = vpop.permute.xlu2 %4052 }
 0x4e9   : > { %v4409_v6 = vpop.f32.mrf.mxu1 }
 0x4f1   : > { %v4471_v1 = vpop.f32.mrf.mxu2 }
 0x4f3   : > { %v4372_v35 = vpop.f32.mrf.mxu0 }
 0x4f4   : > { %v4572_v49 = vpop.f32.mrf.mxu3  ;;  %v4373_v20 = vadd.f32 %v4372_v35, %v4304_v22 }
 0x4f5   : > { %v4573_v43 = vadd.f32 %v4572_v49, %v4471_v1 }
 0x4f6   : > { %v4410_v58 = vadd.f32 %v4409_v6, %v4373_v20 }
 0x4f8   : > { %v4412_v59 = vmul.f32 %v4410_v58, %v4053_v47 }
 0x4fa   : > { %v4413_v57 = vadd.f32 %v4412_v59, %v4051_v17 }
 0x50b   : > { %v4665_v2 = vpop.f32.mrf.mxu1 }
 0x513   : > { %v4626_v29 = vpop.f32.mrf.mxu0  ;;  %v4734_v37 = vpop.f32.mrf.mxu2 }
 0x514   : > { %v4627_v25 = vadd.f32 %v4626_v29, %v4573_v43 }
 0x515   : > { %v4771_v61 = vpop.f32.mrf.mxu3 }
 0x516   : > { %v4666_v50 = vadd.f32 %v4665_v2, %v4627_v25 }
 0x518   : > { %v4735_v23 = vadd.f32 %v4734_v37, %v4666_v50 }
 0x51a   : > { %v4772_v34 = vadd.f32 %v4771_v61, %v4735_v23 }
 0x51c   : > { %v4774_v52 = vmul.f32 %v4772_v34, %v4415_v0 }
 0x51e   : > { %v4775_v62 = vadd.f32 %v4774_v52, %v4413_v57 }
 0x520   : > { %v4824_v3 = vand.u32 4294901760, %v4775_v62 }
 0x522   : > { %v4825_v14 = vsub.f32 %v4775_v62, %v4824_v3  ;;  %4930 = vmatmul.f32.vlgmr.msra.gmra.mxu1 %v4824_v3 }
 0x524   : > { %4984 = vmatmul.f32.vlgmr.msra.gmra.mxu2 %v4825_v14  ;;  %v4826_v7 = vand.u32 4294901760, %v4825_v14 }
 0x526   : > { %5023 = vmatmul.f32.vlgmr.msra.gmra.mxu3 %v4826_v7  ;;  %v4827_v41 = vsub.f32 %v4825_v14, %v4826_v7 }
 0x528   : > { %v4828_v10 = vand.u32 4294901760, %v4827_v41 }
 0x52a   : > { %4829 = vmatmul.f32.vlgmr.msra.gmra.mxu0 %v4828_v10  ;;  %5129 = vmatmul.f32.vlgmr.msrb.gmra.mxu1 %v4824_v3 }
 0x532   : > { %5092 = vmatmul.f32.vlgmr.msrb.gmra.mxu0 %v4824_v3 }
 0x59f   : > { %v4931_v18 = vpop.f32.mrf.mxu1 }
 0x5a7   : > { %v4830_v45 = vpop.f32.mrf.mxu0  ;;  %v4985_v48 = vpop.f32.mrf.mxu2 }
 0x5a8   : > { %v4932_v19 = vadd.f32 %v4931_v18, %v4830_v45  ;;  %v5130_v30 = vpop.f32.mrf.mxu1 }
 0x5a9   : > { %v5024_v13 = vpop.f32.mrf.mxu3 }
 0x5aa   : > { %v4986_v9 = vadd.f32 %v4985_v48, %v4932_v19 }
 0x5ac   : > { %v5025_v16 = vadd.f32 %v5024_v13, %v4986_v9 }
 0x5af   : > { %v5093_v56 = vpop.f32.mrf.mxu0 }
 0x5b0   : > { %v5094_v27 = vadd.f32 %v5093_v56, %v5025_v16 }
 0x5b2   : > { %v5131_v63 = vadd.f32 %v5130_v30, %v5094_v27 }
 0x5b4   : > { %5133 = vst [vmem:[%s438_s17] sm:$0xff] %v5131_v63 }
 0x5b5   : > { %5706 = shalt.err (!%p5703_p9)
}
 0x5b6   : > { %5343 = dma.vmem_to_hbm [thread:$0]  (%p5937_p13), %s5148_s14, 128, %s5150_s11, %s5135_s12  }
 0x5b7 PF: > { %s5161_s26 = sand.u32 1, %s5749_s27   ;;  %p9524_p10 = scmp.ge.s32.totalorder %s5761_s30, 2 }
 0x5b8   : > { %s5162_s20 = scalar_lea.sflag [#allocation4], %s5161_s26 }
 0x5b9   : > { %p5372_p11 = pnand %p9524_p10, %p5942_p4 }
 0x5bb   : > { %p5373_p0 = pneg %p5372_p11 }
 0x5bd   : > { %5744 = dma.done.wait (%p5373_p0), %s5162_s20, 128  }
 0x5be   : > { %5746 = vsyncadd (%p5373_p0), %s5162_s20, 4294967168  ;;  %p25_p2 = scmp.ge.s32.totalorder %s5917_s23, 4   ;;  %s9525_s27 = smov %s5753_s28 }
 0x5bf   : > { %s9526_s28 = smov %s5757_s29  ;;  %s9527_s29 = smov %s5929_s9 }
 0x5c0   : > { %s9528_s30 = smov %s5917_s23  ;;  %27 = sbr.rel (!%p25_p2) target bundleno = 12 (0xc), region = 131 }
 0x5c5   :  { %5168 = vsyncpa [#allocation3], 1 }
 0x5c6   :  { %5170 = vsyncpa [#allocation3 + $0x1], 1 }
 0x5c7   :  { %5171 = vsyncpa [#allocation6], 1 }
 0x5c8   :  { %5172 = vsyncpa [#allocation9], 1 }
 0x5c9   :  { %5173 = vsyncpa [#allocation12], 1 }
 0x5ca   :  { %5174 = vsyncpa [#allocation15], 1 }
 0x5cb   :  { %5175 = vsyncpa [#allocation4], 1 }
 0x5cc   :  { %5177 = vsyncpa [#allocation4 + $0x1], 1 }

</bundles_post_ra>
